<compile_context>
chip_gen: v5e
topology: v5e:2x2
jax: 0.10.0
libtpu: 0.0.40
codegen_flags: <defaults>
</compile_context>

<pallas_src>
import math

import numpy as np

import jax
import jax.numpy as jnp
from jax import lax
from jax.experimental import pallas as pl
from jax.experimental.pallas import tpu as pltpu

# ---------------- DAISY-style descriptor configuration (deterministic) --------
_Q_HIST = 8                      # orientation bins per sample location
_Q_THETA = 4                     # sample locations per ring
_RADII = (2, 5)                  # ring radii (pixels)
_SIGMA_C = 1.0                   # Gaussian sigma for the center histogram
_SIGMA_R = (1.5, 2.5)            # Gaussian sigma per ring
_SIGMAS = (_SIGMA_C,) + _SIGMA_R
_DESC_DIM = _Q_HIST * (1 + len(_RADII) * _Q_THETA)   # 72

# ImageNet stats used by `unnormalize` in the reference pipeline.
_MEAN = (0.485, 0.456, 0.406)
_STD = (0.229, 0.224, 0.225)
_LUM = (0.299, 0.587, 0.114)

_EPS = 1e-12                     # torch F.normalize default eps

_HALO = 16                       # input halo (rows & cols) around every tile
_ROW_MARGIN = 8                  # row margin kept around the output band (ring dy)
_MAX_TILE_H = 128                # upper bound on output rows per grid step
_LANE = 128

# worst-case data reach: gradient (1) + widest blur half-width + ring radius
_MAX_REACH = 1 + max(int(math.ceil(2.0 * s)) for s in _SIGMAS) + max(_RADII)
assert _MAX_REACH <= _HALO, "halo too small for blur + ring reach"
assert max(_RADII) <= _ROW_MARGIN, "row margin too small for ring dy"


def _round_up(x, m):
    return ((x + m - 1) // m) * m


def _gauss_taps(sigma):
    k = int(math.ceil(2.0 * sigma))
    offs = np.arange(-k, k + 1)
    w = np.exp(-(offs.astype(np.float64) ** 2) / (2.0 * sigma * sigma))
    return offs, (w / w.sum())


def _ring_offsets():
    offs = []
    for r_idx, radius in enumerate(_RADII):
        for t in range(_Q_THETA):
            ang = 2.0 * math.pi * t / _Q_THETA
            dy = int(round(radius * math.sin(ang)))
            dx = int(round(radius * math.cos(ang)))
            offs.append((r_idx, dy, dx))
    return offs


def _make_vertical_mats(band_h, h_t):
    """A[s]: (band_h, h_t) banded matrices.  (A @ X)[r, :] is the G_sigma row
    blur of X at tile-local padded row r + (_HALO - _ROW_MARGIN)."""
    row_off = _HALO - _ROW_MARGIN
    mats = []
    for sigma in _SIGMAS:
        offs, w = _gauss_taps(sigma)
        a = np.zeros((band_h, h_t), np.float32)
        r = np.arange(band_h)
        for o, wo in zip(offs, w):
            src = r + row_off + o
            ok = (src >= 0) & (src < h_t)
            a[r[ok], src[ok]] += wo
        mats.append(a)
    return np.stack(mats, 0)


def _make_horizontal_mats(w_pad):
    """B[s]: (w_pad, w_pad) CIRCULAR banded matrices.  (X @ B)[:, c] is the
    G_sigma column blur of X at padded column (c + _HALO) mod w_pad, i.e. the
    +HALO shift into image-column frame is folded in; the circular wrap makes
    the later ring dx lane-rolls land exactly on the left-halo values."""
    mats = []
    for sigma in _SIGMAS:
        offs, w = _gauss_taps(sigma)
        b = np.zeros((w_pad, w_pad), np.float32)
        c = np.arange(w_pad)
        for o, wo in zip(offs, w):
            src = (c + _HALO + o) % w_pad
            b[src, c] += wo
        mats.append(b)
    return np.stack(mats, 0)


# ---------------- in-kernel helpers (trace-time unrolled) ----------------------
def _shift2(x, dy, dx):
    """out[y, x] = x[y + dy, x + dx], circular (XLU rolls).  All shifts used
    here keep wraparound confined to halo / padding regions."""
    h, w = x.shape
    sy = (-dy) % h
    if sy:
        x = pltpu.roll(x, sy, 0)
    sx = (-dx) % w
    if sx:
        x = pltpu.roll(x, sx, 1)
    return x


# ---------------- Pallas kernel: one (image, row-tile) -> descriptors ---------
def _daisy_kernel(img_ref, a_ref, b_ref, out_ref):
    # img_ref: (3, H_pad, w_pad) f32   whole replicate-padded image (resident per n)
    # a_ref:   (3, band_h, h_t) bf16   banded vertical-blur matrices (center, r0, r1)
    # b_ref:   (3, w_pad, w_pad) bf16  circular banded horizontal-blur matrices
    # out_ref: (DESC_DIM, tile_h, w_out)  L2-normalized descriptor planes
    tile_h, w_out = out_ref.shape[1], out_ref.shape[2]
    h_t = a_ref.shape[2]

    row0 = pl.multiple_of(pl.program_id(1) * tile_h, 8)   # halo'd row window start

    # unnormalize -> [0,255] uint8-quantized -> grayscale (fused chain).
    # TODO(synk): round-half-up differs from torch's cast-to-uint8 truncation.
    gray = None
    for c in range(3):
        v = img_ref[c, pl.ds(row0, h_t), :] * (_STD[c] * 255.0) + (_MEAN[c] * 255.0)
        v = jnp.floor(jnp.clip(v, 0.0, 255.0) + 0.5)
        gray = _LUM[c] * v if gray is None else gray + _LUM[c] * v

    # central-difference gradients (roll wrap stays inside the halo).
    gx = 0.5 * (_shift2(gray, 0, 1) - _shift2(gray, 0, -1))
    gy = 0.5 * (_shift2(gray, 1, 0) - _shift2(gray, -1, 0))

    a_mats = [a_ref[s] for s in range(3)]
    b_mats = [b_ref[s] for s in range(3)]

    # Oriented-gradient layers -> separable Gaussian blurs on the MXU.
    # bf16 operands, f32 accumulation.  smooth[s][q] is (band_h, w_pad), already
    # shifted into image-column frame by the circular B.
    smooth = [[], [], []]
    ssq = [None, None, None]      # per-scale sum over the 8 bins of plane^2
    for q in range(_Q_HIST):
        ang = 2.0 * math.pi * q / _Q_HIST
        layer = jnp.maximum(math.cos(ang) * gx + math.sin(ang) * gy, 0.0)
        layer = layer.astype(jnp.bfloat16)
        for s in range(3):
            vert = jnp.dot(a_mats[s], layer, preferred_element_type=jnp.float32)
            sm = jnp.dot(vert.astype(jnp.bfloat16), b_mats[s],
                         preferred_element_type=jnp.float32)
            smooth[s].append(sm)
            ssq[s] = sm * sm if ssq[s] is None else ssq[s] + sm * sm

    rows = slice(_ROW_MARGIN, _ROW_MARGIN + tile_h)   # sublane-aligned output band
    cols = slice(0, w_out)                            # lane-aligned, start 0
    offsets = _ring_offsets()

    # L2 normalization factor over the full 72-dim descriptor, computed before
    # assembly so every plane is stored exactly once; rsqrt runs on the EUP.
    sumsq = ssq[0][rows, cols]
    for r_idx, dy, dx in offsets:
        sumsq = sumsq + _shift2(ssq[1 + r_idx], dy, dx)[rows, cols]
    inv = lax.rsqrt(jnp.maximum(sumsq, _EPS * _EPS))

    # assemble normalized descriptor planes directly into the output block.
    for q in range(_Q_HIST):
        out_ref[q, :, :] = (smooth[0][q][rows, cols] * inv).astype(out_ref.dtype)
    base = _Q_HIST
    for r_idx, dy, dx in offsets:
        s = 1 + r_idx
        for q in range(_Q_HIST):
            plane = _shift2(smooth[s][q], dy, dx)     # one small XLU roll
            out_ref[base + q, :, :] = (plane[rows, cols] * inv).astype(out_ref.dtype)
        base += _Q_HIST


# ---------------- tiling / VMEM budgeting --------------------------------------
def _pick_tiling(H, W, out_bytes):
    w_pad = _round_up(W + 2 * _HALO, _LANE)
    w_out = _round_up(W, _LANE)
    try:
        vmem_cap = int(pltpu.get_tpu_info().vmem_capacity_bytes)
    except Exception:
        vmem_cap = 64 * 1024 * 1024          # v7x-safe fallback
    budget = int(vmem_cap * 0.80)

    def estimate(th):
        band, h_t = th + 2 * _ROW_MARGIN, th + 2 * _HALO
        h_pad = _round_up(H, th) + 2 * _HALO
        est = (2 * 3 * h_pad * w_pad * 4                     # input block (x2 buffers)
               + 2 * _DESC_DIM * th * w_out * out_bytes      # output block (x2 buffers)
               + 2 * 3 * (band * h_t + w_pad * w_pad) * 2    # A / B bf16 (x2 buffers)
               + (3 * _Q_HIST + 8) * band * w_pad * 4        # smooth/ssq/roll temps
               + 8 * h_t * w_pad * 4)                        # gray/gx/gy/layer temps
        return int(est * 1.25)

    cap = min(_MAX_TILE_H, _round_up(max(H, 8), 8))
    cands = list(range(cap, 7, -8))
    fitting = [c for c in cands if estimate(c) <= budget] or [8]
    tile_h = fitting[0]
    if H % 8 == 0:                           # prefer no post-kernel row crop
        for c in fitting:
            if H % c == 0:
                tile_h = c
                break
    vmem_limit = max(32 * 1024 * 1024,
                     min(int(vmem_cap * 0.9), 128 * 1024 * 1024))
    return tile_h, w_pad, w_out, vmem_limit


# ---------------- wrappers (module-equivalent API) -----------------------------
def daisy_feature(images, out_dtype=jnp.bfloat16):
    """DaisyFeature.forward: [N, 3, H, W] -> [N, 72, H, W] unit-L2 descriptors.

    out_dtype defaults to bfloat16 (descriptors are L2-normalized, bf16 halves
    the dominant HBM writeback and the output VMEM block); compute stays
    f32 / bf16-MXU.  Pass jnp.float32 for a full-precision output.
    """
    images = jnp.asarray(images, jnp.float32)
    N, C, H, W = images.shape
    assert C == 3
    out_bytes = jnp.dtype(out_dtype).itemsize

    tile_h, w_pad, w_out, vmem_limit = _pick_tiling(H, W, out_bytes)
    n_tiles = int(pl.cdiv(H, tile_h))
    h_tiled = n_tiles * tile_h
    band_h = tile_h + 2 * _ROW_MARGIN
    h_t = tile_h + 2 * _HALO
    h_pad = h_tiled + 2 * _HALO

    # Replicate-pad once.  The padded image is the (only) spatial input block;
    # the kernel slices its own halo'd row window, so it is DMA'd to VMEM once
    # per image and reused across all row tiles (no overlapping-window gather).
    padded = jnp.pad(
        images,
        ((0, 0), (0, 0),
         (_HALO, h_tiled - H + _HALO),
         (_HALO, w_pad - W - _HALO)),
        mode="edge")

    a_mats = jnp.asarray(_make_vertical_mats(band_h, h_t), jnp.bfloat16)
    b_mats = jnp.asarray(_make_horizontal_mats(w_pad), jnp.bfloat16)

    matmul_flops = 2 * _Q_HIST * 3 * band_h * w_pad * (h_t + w_pad)
    cost = pl.CostEstimate(
        flops=int(N * n_tiles * (matmul_flops + 48 * h_t * w_pad)),
        transcendentals=int(N * n_tiles * tile_h * w_out),
        bytes_accessed=int(N * 3 * h_pad * w_pad * 4
                           + N * n_tiles * _DESC_DIM * tile_h * w_out * out_bytes
                           + 3 * (band_h * h_t + w_pad * w_pad) * 2))

    out = pl.pallas_call(
        _daisy_kernel,
        out_shape=jax.ShapeDtypeStruct((N, _DESC_DIM, h_tiled, w_out), out_dtype),
        grid=(N, n_tiles),
        in_specs=[
            pl.BlockSpec((None, 3, h_pad, w_pad), lambda n, t: (n, 0, 0, 0)),
            pl.BlockSpec((3, band_h, h_t), lambda n, t: (0, 0, 0)),
            pl.BlockSpec((3, w_pad, w_pad), lambda n, t: (0, 0, 0)),
        ],
        out_specs=pl.BlockSpec((None, _DESC_DIM, tile_h, w_out),
                               lambda n, t: (n, 0, t, 0)),
        compiler_params=pltpu.CompilerParams(
            dimension_semantics=("parallel", "parallel"),
            vmem_limit_bytes=vmem_limit),
        cost_estimate=cost,
    )(padded, a_mats, b_mats)

    # Output is already in image-column frame (the +HALO shift is folded into
    # the circular B), so only alignment padding may need trimming; when
    # tile_h | H and W % 128 == 0 this is the identity (no copy at all).
    if h_tiled == H and w_out == W:
        return out
    return out[:, :, :H, :W]


def daisy_forward(images0, images1, targets=None):
    """Daisy.forward"""
    descs0 = daisy_feature(images0)
    descs1 = daisy_feature(images1)
    return dict(descrs0=descs0, descrs1=descs1)


def daisy_inference(images, scale=1):
    """Daisy.inference"""
    return daisy_feature(images)


# ---------------- demo ----------------------------------------------------------
if __name__ == "__main__":
    key = jax.random.PRNGKey(0)
    k0, k1 = jax.random.split(key)
    N, C, H, W = 2, 3, 16, 16
    images0 = jax.random.normal(k0, (N, C, H, W), dtype=jnp.float32)
    images1 = jax.random.normal(k1, (N, C, H, W), dtype=jnp.float32)

    out = jax.jit(daisy_forward)(images0, images1)
    out = jax.block_until_ready(out)

    d0, d1 = out["descrs0"], out["descrs1"]
    assert d0.shape == (N, _DESC_DIM, H, W), d0.shape
    assert d1.shape == (N, _DESC_DIM, H, W), d1.shape
    d0f = d0.astype(jnp.float32)
    d1f = d1.astype(jnp.float32)
    assert bool(jnp.all(jnp.isfinite(d0f))) and bool(jnp.all(jnp.isfinite(d1f)))
    # descriptors should be (near) unit L2 norm along the channel dim
    # (bf16 output -> looser tolerance than the f32 path)
    nrm = jnp.sqrt(jnp.sum(d0f * d0f, axis=1))
    assert bool(jnp.all(jnp.abs(nrm - 1.0) < 2e-2)), "normalization failed"
    print("KERNEL_OK")
</pallas_src>

<mosaic_0001>
module attributes {stable_mosaic.version = 11 : i64} {
  func.func @_daisy_kernel(%arg0: i32, %arg1: i32, %arg2: memref<1x3x48x128xf32, #tpu.memory_space<vmem>>, %arg3: memref<3x32x48xbf16, #tpu.memory_space<vmem>>, %arg4: memref<3x128x128xbf16, #tpu.memory_space<vmem>>, %arg5: memref<1x72x16x128xbf16, #tpu.memory_space<vmem>>) attributes {dimension_semantics = [#tpu.dimension_semantics<parallel>, #tpu.dimension_semantics<parallel>], iteration_bounds = array<i64: 2, 1>, scalar_prefetch = 0 : i64, scratch_operands = 0 : i64, tpu.core_type = #tpu.core_type<tc>, window_params = [{transform_indices = @transform_0, window_bounds = array<i64: 1, 3, 48, 128>}, {pipeline_mode = #tpu.pipeline_mode<synchronous>, transform_indices = @transform_1, window_bounds = array<i64: 3, 32, 48>}, {pipeline_mode = #tpu.pipeline_mode<synchronous>, transform_indices = @transform_2, window_bounds = array<i64: 3, 128, 128>}, {transform_indices = @transform_3, window_bounds = array<i64: 1, 72, 16, 128>}]} {
    %c16_i32 = arith.constant 16 : i32
    %0 = arith.muli %arg1, %c16_i32 : i32
    %1 = tpu.assume_multiple %0, 8 : i32
    %c0 = arith.constant 0 : index
    %c0_0 = arith.constant 0 : index
    %2 = arith.index_cast %1 : i32 to index
    %c0_1 = arith.constant 0 : index
    %3 = vector.load %arg2[%c0, %c0_0, %2, %c0_1] : memref<1x3x48x128xf32, #tpu.memory_space<vmem>>, vector<1x1x48x128xf32>
    %4 = vector.shape_cast %3 : vector<1x1x48x128xf32> to vector<48x128xf32>
    %cst = arith.constant 5.839500e+01 : f32
    %5 = vector.broadcast %cst : f32 to vector<48x128xf32>
    %6 = arith.mulf %4, %5 : vector<48x128xf32>
    %cst_2 = arith.constant 1.236750e+02 : f32
    %7 = vector.broadcast %cst_2 : f32 to vector<48x128xf32>
    %8 = arith.addf %6, %7 : vector<48x128xf32>
    %cst_3 = arith.constant 0.000000e+00 : f32
    %cst_4 = arith.constant 2.550000e+02 : f32
    %9 = vector.broadcast %cst_3 : f32 to vector<48x128xf32>
    %10 = arith.maximumf %9, %8 : vector<48x128xf32>
    %11 = vector.broadcast %cst_4 : f32 to vector<48x128xf32>
    %12 = arith.minimumf %11, %10 : vector<48x128xf32>
    %cst_5 = arith.constant 5.000000e-01 : f32
    %13 = vector.broadcast %cst_5 : f32 to vector<48x128xf32>
    %14 = arith.addf %12, %13 : vector<48x128xf32>
    %15 = math.floor %14 : vector<48x128xf32>
    %cst_6 = arith.constant 2.990000e-01 : f32
    %16 = vector.broadcast %cst_6 : f32 to vector<48x128xf32>
    %17 = arith.mulf %16, %15 : vector<48x128xf32>
    %c0_7 = arith.constant 0 : index
    %c1 = arith.constant 1 : index
    %18 = arith.index_cast %1 : i32 to index
    %c0_8 = arith.constant 0 : index
    %19 = vector.load %arg2[%c0_7, %c1, %18, %c0_8] : memref<1x3x48x128xf32, #tpu.memory_space<vmem>>, vector<1x1x48x128xf32>
    %20 = vector.shape_cast %19 : vector<1x1x48x128xf32> to vector<48x128xf32>
    %cst_9 = arith.constant 5.712000e+01 : f32
    %21 = vector.broadcast %cst_9 : f32 to vector<48x128xf32>
    %22 = arith.mulf %20, %21 : vector<48x128xf32>
    %cst_10 = arith.constant 1.162800e+02 : f32
    %23 = vector.broadcast %cst_10 : f32 to vector<48x128xf32>
    %24 = arith.addf %22, %23 : vector<48x128xf32>
    %cst_11 = arith.constant 0.000000e+00 : f32
    %cst_12 = arith.constant 2.550000e+02 : f32
    %25 = vector.broadcast %cst_11 : f32 to vector<48x128xf32>
    %26 = arith.maximumf %25, %24 : vector<48x128xf32>
    %27 = vector.broadcast %cst_12 : f32 to vector<48x128xf32>
    %28 = arith.minimumf %27, %26 : vector<48x128xf32>
    %cst_13 = arith.constant 5.000000e-01 : f32
    %29 = vector.broadcast %cst_13 : f32 to vector<48x128xf32>
    %30 = arith.addf %28, %29 : vector<48x128xf32>
    %31 = math.floor %30 : vector<48x128xf32>
    %cst_14 = arith.constant 5.870000e-01 : f32
    %32 = vector.broadcast %cst_14 : f32 to vector<48x128xf32>
    %33 = arith.mulf %32, %31 : vector<48x128xf32>
    %34 = arith.addf %17, %33 : vector<48x128xf32>
    %c0_15 = arith.constant 0 : index
    %c2 = arith.constant 2 : index
    %35 = arith.index_cast %1 : i32 to index
    %c0_16 = arith.constant 0 : index
    %36 = vector.load %arg2[%c0_15, %c2, %35, %c0_16] : memref<1x3x48x128xf32, #tpu.memory_space<vmem>>, vector<1x1x48x128xf32>
    %37 = vector.shape_cast %36 : vector<1x1x48x128xf32> to vector<48x128xf32>
    %cst_17 = arith.constant 5.737500e+01 : f32
    %38 = vector.broadcast %cst_17 : f32 to vector<48x128xf32>
    %39 = arith.mulf %37, %38 : vector<48x128xf32>
    %cst_18 = arith.constant 1.035300e+02 : f32
    %40 = vector.broadcast %cst_18 : f32 to vector<48x128xf32>
    %41 = arith.addf %39, %40 : vector<48x128xf32>
    %cst_19 = arith.constant 0.000000e+00 : f32
    %cst_20 = arith.constant 2.550000e+02 : f32
    %42 = vector.broadcast %cst_19 : f32 to vector<48x128xf32>
    %43 = arith.maximumf %42, %41 : vector<48x128xf32>
    %44 = vector.broadcast %cst_20 : f32 to vector<48x128xf32>
    %45 = arith.minimumf %44, %43 : vector<48x128xf32>
    %cst_21 = arith.constant 5.000000e-01 : f32
    %46 = vector.broadcast %cst_21 : f32 to vector<48x128xf32>
    %47 = arith.addf %45, %46 : vector<48x128xf32>
    %48 = math.floor %47 : vector<48x128xf32>
    %cst_22 = arith.constant 1.140000e-01 : f32
    %49 = vector.broadcast %cst_22 : f32 to vector<48x128xf32>
    %50 = arith.mulf %49, %48 : vector<48x128xf32>
    %51 = arith.addf %34, %50 : vector<48x128xf32>
    %c127_i32 = arith.constant 127 : i32
    %52 = tpu.dynamic_rotate %51 by %c127_i32 dim 1 : vector<48x128xf32>, i32 -> vector<48x128xf32>
    %c1_i32 = arith.constant 1 : i32
    %53 = tpu.dynamic_rotate %51 by %c1_i32 dim 1 : vector<48x128xf32>, i32 -> vector<48x128xf32>
    %54 = arith.subf %52, %53 : vector<48x128xf32>
    %cst_23 = arith.constant 5.000000e-01 : f32
    %55 = vector.broadcast %cst_23 : f32 to vector<48x128xf32>
    %56 = arith.mulf %55, %54 : vector<48x128xf32>
    %c47_i32 = arith.constant 47 : i32
    %57 = tpu.dynamic_rotate %51 by %c47_i32 dim 0 : vector<48x128xf32>, i32 -> vector<48x128xf32>
    %c1_i32_24 = arith.constant 1 : i32
    %58 = tpu.dynamic_rotate %51 by %c1_i32_24 dim 0 : vector<48x128xf32>, i32 -> vector<48x128xf32>
    %59 = arith.subf %57, %58 : vector<48x128xf32>
    %cst_25 = arith.constant 5.000000e-01 : f32
    %60 = vector.broadcast %cst_25 : f32 to vector<48x128xf32>
    %61 = arith.mulf %60, %59 : vector<48x128xf32>
    %c0_26 = arith.constant 0 : index
    %c0_27 = arith.constant 0 : index
    %c0_28 = arith.constant 0 : index
    %62 = vector.load %arg3[%c0_26, %c0_27, %c0_28] : memref<3x32x48xbf16, #tpu.memory_space<vmem>>, vector<1x32x48xbf16>
    %63 = vector.shape_cast %62 : vector<1x32x48xbf16> to vector<32x48xbf16>
    %c1_29 = arith.constant 1 : index
    %c0_30 = arith.constant 0 : index
    %c0_31 = arith.constant 0 : index
    %64 = vector.load %arg3[%c1_29, %c0_30, %c0_31] : memref<3x32x48xbf16, #tpu.memory_space<vmem>>, vector<1x32x48xbf16>
    %65 = vector.shape_cast %64 : vector<1x32x48xbf16> to vector<32x48xbf16>
    %c2_32 = arith.constant 2 : index
    %c0_33 = arith.constant 0 : index
    %c0_34 = arith.constant 0 : index
    %66 = vector.load %arg3[%c2_32, %c0_33, %c0_34] : memref<3x32x48xbf16, #tpu.memory_space<vmem>>, vector<1x32x48xbf16>
    %67 = vector.shape_cast %66 : vector<1x32x48xbf16> to vector<32x48xbf16>
    %c0_35 = arith.constant 0 : index
    %c0_36 = arith.constant 0 : index
    %c0_37 = arith.constant 0 : index
    %68 = vector.load %arg4[%c0_35, %c0_36, %c0_37] : memref<3x128x128xbf16, #tpu.memory_space<vmem>>, vector<1x128x128xbf16>
    %69 = vector.shape_cast %68 : vector<1x128x128xbf16> to vector<128x128xbf16>
    %c1_38 = arith.constant 1 : index
    %c0_39 = arith.constant 0 : index
    %c0_40 = arith.constant 0 : index
    %70 = vector.load %arg4[%c1_38, %c0_39, %c0_40] : memref<3x128x128xbf16, #tpu.memory_space<vmem>>, vector<1x128x128xbf16>
    %71 = vector.shape_cast %70 : vector<1x128x128xbf16> to vector<128x128xbf16>
    %c2_41 = arith.constant 2 : index
    %c0_42 = arith.constant 0 : index
    %c0_43 = arith.constant 0 : index
    %72 = vector.load %arg4[%c2_41, %c0_42, %c0_43] : memref<3x128x128xbf16, #tpu.memory_space<vmem>>, vector<1x128x128xbf16>
    %73 = vector.shape_cast %72 : vector<1x128x128xbf16> to vector<128x128xbf16>
    %cst_44 = arith.constant 1.000000e+00 : f32
    %74 = vector.broadcast %cst_44 : f32 to vector<48x128xf32>
    %75 = arith.mulf %74, %56 : vector<48x128xf32>
    %cst_45 = arith.constant 0.000000e+00 : f32
    %76 = vector.broadcast %cst_45 : f32 to vector<48x128xf32>
    %77 = arith.mulf %76, %61 : vector<48x128xf32>
    %78 = arith.addf %75, %77 : vector<48x128xf32>
    %cst_46 = arith.constant 0.000000e+00 : f32
    %79 = vector.broadcast %cst_46 : f32 to vector<48x128xf32>
    %80 = arith.maximumf %78, %79 : vector<48x128xf32>
    %81 = arith.truncf %80 : vector<48x128xf32> to vector<48x128xbf16>
    %cst_47 = arith.constant dense<0.000000e+00> : vector<32x128xf32>
    %82 = tpu.matmul %63, %81, %cst_47 {dimension_numbers = #tpu.dot_dimension_numbers<[1], [0], [0], [1], [0, 0, 1, 1], [], []>} : vector<32x48xbf16>, vector<48x128xbf16>, vector<32x128xf32> -> vector<32x128xf32>
    %83 = arith.truncf %82 : vector<32x128xf32> to vector<32x128xbf16>
    %cst_48 = arith.constant dense<0.000000e+00> : vector<32x128xf32>
    %84 = tpu.matmul %83, %69, %cst_48 {dimension_numbers = #tpu.dot_dimension_numbers<[1], [0], [0], [1], [0, 0, 1, 1], [], []>} : vector<32x128xbf16>, vector<128x128xbf16>, vector<32x128xf32> -> vector<32x128xf32>
    %85 = arith.mulf %84, %84 : vector<32x128xf32>
    %cst_49 = arith.constant dense<0.000000e+00> : vector<32x128xf32>
    %86 = tpu.matmul %65, %81, %cst_49 {dimension_numbers = #tpu.dot_dimension_numbers<[1], [0], [0], [1], [0, 0, 1, 1], [], []>} : vector<32x48xbf16>, vector<48x128xbf16>, vector<32x128xf32> -> vector<32x128xf32>
    %87 = arith.truncf %86 : vector<32x128xf32> to vector<32x128xbf16>
    %cst_50 = arith.constant dense<0.000000e+00> : vector<32x128xf32>
    %88 = tpu.matmul %87, %71, %cst_50 {dimension_numbers = #tpu.dot_dimension_numbers<[1], [0], [0], [1], [0, 0, 1, 1], [], []>} : vector<32x128xbf16>, vector<128x128xbf16>, vector<32x128xf32> -> vector<32x128xf32>
    %89 = arith.mulf %88, %88 : vector<32x128xf32>
    %cst_51 = arith.constant dense<0.000000e+00> : vector<32x128xf32>
    %90 = tpu.matmul %67, %81, %cst_51 {dimension_numbers = #tpu.dot_dimension_numbers<[1], [0], [0], [1], [0, 0, 1, 1], [], []>} : vector<32x48xbf16>, vector<48x128xbf16>, vector<32x128xf32> -> vector<32x128xf32>
    %91 = arith.truncf %90 : vector<32x128xf32> to vector<32x128xbf16>
    %cst_52 = arith.constant dense<0.000000e+00> : vector<32x128xf32>
    %92 = tpu.matmul %91, %73, %cst_52 {dimension_numbers = #tpu.dot_dimension_numbers<[1], [0], [0], [1], [0, 0, 1, 1], [], []>} : vector<32x128xbf16>, vector<128x128xbf16>, vector<32x128xf32> -> vector<32x128xf32>
    %93 = arith.mulf %92, %92 : vector<32x128xf32>
    %cst_53 = arith.constant 0.707106769 : f32
    %94 = vector.broadcast %cst_53 : f32 to vector<48x128xf32>
    %95 = arith.mulf %94, %56 : vector<48x128xf32>
    %cst_54 = arith.constant 0.707106769 : f32
    %96 = vector.broadcast %cst_54 : f32 to vector<48x128xf32>
    %97 = arith.mulf %96, %61 : vector<48x128xf32>
    %98 = arith.addf %95, %97 : vector<48x128xf32>
    %cst_55 = arith.constant 0.000000e+00 : f32
    %99 = vector.broadcast %cst_55 : f32 to vector<48x128xf32>
    %100 = arith.maximumf %98, %99 : vector<48x128xf32>
    %101 = arith.truncf %100 : vector<48x128xf32> to vector<48x128xbf16>
    %cst_56 = arith.constant dense<0.000000e+00> : vector<32x128xf32>
    %102 = tpu.matmul %63, %101, %cst_56 {dimension_numbers = #tpu.dot_dimension_numbers<[1], [0], [0], [1], [0, 0, 1, 1], [], []>} : vector<32x48xbf16>, vector<48x128xbf16>, vector<32x128xf32> -> vector<32x128xf32>
    %103 = arith.truncf %102 : vector<32x128xf32> to vector<32x128xbf16>
    %cst_57 = arith.constant dense<0.000000e+00> : vector<32x128xf32>
    %104 = tpu.matmul %103, %69, %cst_57 {dimension_numbers = #tpu.dot_dimension_numbers<[1], [0], [0], [1], [0, 0, 1, 1], [], []>} : vector<32x128xbf16>, vector<128x128xbf16>, vector<32x128xf32> -> vector<32x128xf32>
    %105 = arith.mulf %104, %104 : vector<32x128xf32>
    %106 = arith.addf %85, %105 : vector<32x128xf32>
    %cst_58 = arith.constant dense<0.000000e+00> : vector<32x128xf32>
    %107 = tpu.matmul %65, %101, %cst_58 {dimension_numbers = #tpu.dot_dimension_numbers<[1], [0], [0], [1], [0, 0, 1, 1], [], []>} : vector<32x48xbf16>, vector<48x128xbf16>, vector<32x128xf32> -> vector<32x128xf32>
    %108 = arith.truncf %107 : vector<32x128xf32> to vector<32x128xbf16>
    %cst_59 = arith.constant dense<0.000000e+00> : vector<32x128xf32>
    %109 = tpu.matmul %108, %71, %cst_59 {dimension_numbers = #tpu.dot_dimension_numbers<[1], [0], [0], [1], [0, 0, 1, 1], [], []>} : vector<32x128xbf16>, vector<128x128xbf16>, vector<32x128xf32> -> vector<32x128xf32>
    %110 = arith.mulf %109, %109 : vector<32x128xf32>
    %111 = arith.addf %89, %110 : vector<32x128xf32>
    %cst_60 = arith.constant dense<0.000000e+00> : vector<32x128xf32>
    %112 = tpu.matmul %67, %101, %cst_60 {dimension_numbers = #tpu.dot_dimension_numbers<[1], [0], [0], [1], [0, 0, 1, 1], [], []>} : vector<32x48xbf16>, vector<48x128xbf16>, vector<32x128xf32> -> vector<32x128xf32>
    %113 = arith.truncf %112 : vector<32x128xf32> to vector<32x128xbf16>
    %cst_61 = arith.constant dense<0.000000e+00> : vector<32x128xf32>
    %114 = tpu.matmul %113, %73, %cst_61 {dimension_numbers = #tpu.dot_dimension_numbers<[1], [0], [0], [1], [0, 0, 1, 1], [], []>} : vector<32x128xbf16>, vector<128x128xbf16>, vector<32x128xf32> -> vector<32x128xf32>
    %115 = arith.mulf %114, %114 : vector<32x128xf32>
    %116 = arith.addf %93, %115 : vector<32x128xf32>
    %cst_62 = arith.constant 6.12323426E-17 : f32
    %117 = vector.broadcast %cst_62 : f32 to vector<48x128xf32>
    %118 = arith.mulf %117, %56 : vector<48x128xf32>
    %cst_63 = arith.constant 1.000000e+00 : f32
    %119 = vector.broadcast %cst_63 : f32 to vector<48x128xf32>
    %120 = arith.mulf %119, %61 : vector<48x128xf32>
    %121 = arith.addf %118, %120 : vector<48x128xf32>
    %cst_64 = arith.constant 0.000000e+00 : f32
    %122 = vector.broadcast %cst_64 : f32 to vector<48x128xf32>
    %123 = arith.maximumf %121, %122 : vector<48x128xf32>
    %124 = arith.truncf %123 : vector<48x128xf32> to vector<48x128xbf16>
    %cst_65 = arith.constant dense<0.000000e+00> : vector<32x128xf32>
    %125 = tpu.matmul %63, %124, %cst_65 {dimension_numbers = #tpu.dot_dimension_numbers<[1], [0], [0], [1], [0, 0, 1, 1], [], []>} : vector<32x48xbf16>, vector<48x128xbf16>, vector<32x128xf32> -> vector<32x128xf32>
    %126 = arith.truncf %125 : vector<32x128xf32> to vector<32x128xbf16>
    %cst_66 = arith.constant dense<0.000000e+00> : vector<32x128xf32>
    %127 = tpu.matmul %126, %69, %cst_66 {dimension_numbers = #tpu.dot_dimension_numbers<[1], [0], [0], [1], [0, 0, 1, 1], [], []>} : vector<32x128xbf16>, vector<128x128xbf16>, vector<32x128xf32> -> vector<32x128xf32>
    %128 = arith.mulf %127, %127 : vector<32x128xf32>
    %129 = arith.addf %106, %128 : vector<32x128xf32>
    %cst_67 = arith.constant dense<0.000000e+00> : vector<32x128xf32>
    %130 = tpu.matmul %65, %124, %cst_67 {dimension_numbers = #tpu.dot_dimension_numbers<[1], [0], [0], [1], [0, 0, 1, 1], [], []>} : vector<32x48xbf16>, vector<48x128xbf16>, vector<32x128xf32> -> vector<32x128xf32>
    %131 = arith.truncf %130 : vector<32x128xf32> to vector<32x128xbf16>
    %cst_68 = arith.constant dense<0.000000e+00> : vector<32x128xf32>
    %132 = tpu.matmul %131, %71, %cst_68 {dimension_numbers = #tpu.dot_dimension_numbers<[1], [0], [0], [1], [0, 0, 1, 1], [], []>} : vector<32x128xbf16>, vector<128x128xbf16>, vector<32x128xf32> -> vector<32x128xf32>
    %133 = arith.mulf %132, %132 : vector<32x128xf32>
    %134 = arith.addf %111, %133 : vector<32x128xf32>
    %cst_69 = arith.constant dense<0.000000e+00> : vector<32x128xf32>
    %135 = tpu.matmul %67, %124, %cst_69 {dimension_numbers = #tpu.dot_dimension_numbers<[1], [0], [0], [1], [0, 0, 1, 1], [], []>} : vector<32x48xbf16>, vector<48x128xbf16>, vector<32x128xf32> -> vector<32x128xf32>
    %136 = arith.truncf %135 : vector<32x128xf32> to vector<32x128xbf16>
    %cst_70 = arith.constant dense<0.000000e+00> : vector<32x128xf32>
    %137 = tpu.matmul %136, %73, %cst_70 {dimension_numbers = #tpu.dot_dimension_numbers<[1], [0], [0], [1], [0, 0, 1, 1], [], []>} : vector<32x128xbf16>, vector<128x128xbf16>, vector<32x128xf32> -> vector<32x128xf32>
    %138 = arith.mulf %137, %137 : vector<32x128xf32>
    %139 = arith.addf %116, %138 : vector<32x128xf32>
    %cst_71 = arith.constant -0.707106769 : f32
    %140 = vector.broadcast %cst_71 : f32 to vector<48x128xf32>
    %141 = arith.mulf %140, %56 : vector<48x128xf32>
    %cst_72 = arith.constant 0.707106769 : f32
    %142 = vector.broadcast %cst_72 : f32 to vector<48x128xf32>
    %143 = arith.mulf %142, %61 : vector<48x128xf32>
    %144 = arith.addf %141, %143 : vector<48x128xf32>
    %cst_73 = arith.constant 0.000000e+00 : f32
    %145 = vector.broadcast %cst_73 : f32 to vector<48x128xf32>
    %146 = arith.maximumf %144, %145 : vector<48x128xf32>
    %147 = arith.truncf %146 : vector<48x128xf32> to vector<48x128xbf16>
    %cst_74 = arith.constant dense<0.000000e+00> : vector<32x128xf32>
    %148 = tpu.matmul %63, %147, %cst_74 {dimension_numbers = #tpu.dot_dimension_numbers<[1], [0], [0], [1], [0, 0, 1, 1], [], []>} : vector<32x48xbf16>, vector<48x128xbf16>, vector<32x128xf32> -> vector<32x128xf32>
    %149 = arith.truncf %148 : vector<32x128xf32> to vector<32x128xbf16>
    %cst_75 = arith.constant dense<0.000000e+00> : vector<32x128xf32>
    %150 = tpu.matmul %149, %69, %cst_75 {dimension_numbers = #tpu.dot_dimension_numbers<[1], [0], [0], [1], [0, 0, 1, 1], [], []>} : vector<32x128xbf16>, vector<128x128xbf16>, vector<32x128xf32> -> vector<32x128xf32>
    %151 = arith.mulf %150, %150 : vector<32x128xf32>
    %152 = arith.addf %129, %151 : vector<32x128xf32>
    %cst_76 = arith.constant dense<0.000000e+00> : vector<32x128xf32>
    %153 = tpu.matmul %65, %147, %cst_76 {dimension_numbers = #tpu.dot_dimension_numbers<[1], [0], [0], [1], [0, 0, 1, 1], [], []>} : vector<32x48xbf16>, vector<48x128xbf16>, vector<32x128xf32> -> vector<32x128xf32>
    %154 = arith.truncf %153 : vector<32x128xf32> to vector<32x128xbf16>
    %cst_77 = arith.constant dense<0.000000e+00> : vector<32x128xf32>
    %155 = tpu.matmul %154, %71, %cst_77 {dimension_numbers = #tpu.dot_dimension_numbers<[1], [0], [0], [1], [0, 0, 1, 1], [], []>} : vector<32x128xbf16>, vector<128x128xbf16>, vector<32x128xf32> -> vector<32x128xf32>
    %156 = arith.mulf %155, %155 : vector<32x128xf32>
    %157 = arith.addf %134, %156 : vector<32x128xf32>
    %cst_78 = arith.constant dense<0.000000e+00> : vector<32x128xf32>
    %158 = tpu.matmul %67, %147, %cst_78 {dimension_numbers = #tpu.dot_dimension_numbers<[1], [0], [0], [1], [0, 0, 1, 1], [], []>} : vector<32x48xbf16>, vector<48x128xbf16>, vector<32x128xf32> -> vector<32x128xf32>
    %159 = arith.truncf %158 : vector<32x128xf32> to vector<32x128xbf16>
    %cst_79 = arith.constant dense<0.000000e+00> : vector<32x128xf32>
    %160 = tpu.matmul %159, %73, %cst_79 {dimension_numbers = #tpu.dot_dimension_numbers<[1], [0], [0], [1], [0, 0, 1, 1], [], []>} : vector<32x128xbf16>, vector<128x128xbf16>, vector<32x128xf32> -> vector<32x128xf32>
    %161 = arith.mulf %160, %160 : vector<32x128xf32>
    %162 = arith.addf %139, %161 : vector<32x128xf32>
    %cst_80 = arith.constant -1.000000e+00 : f32
    %163 = vector.broadcast %cst_80 : f32 to vector<48x128xf32>
    %164 = arith.mulf %163, %56 : vector<48x128xf32>
    %cst_81 = arith.constant 1.22464685E-16 : f32
    %165 = vector.broadcast %cst_81 : f32 to vector<48x128xf32>
    %166 = arith.mulf %165, %61 : vector<48x128xf32>
    %167 = arith.addf %164, %166 : vector<48x128xf32>
    %cst_82 = arith.constant 0.000000e+00 : f32
    %168 = vector.broadcast %cst_82 : f32 to vector<48x128xf32>
    %169 = arith.maximumf %167, %168 : vector<48x128xf32>
    %170 = arith.truncf %169 : vector<48x128xf32> to vector<48x128xbf16>
    %cst_83 = arith.constant dense<0.000000e+00> : vector<32x128xf32>
    %171 = tpu.matmul %63, %170, %cst_83 {dimension_numbers = #tpu.dot_dimension_numbers<[1], [0], [0], [1], [0, 0, 1, 1], [], []>} : vector<32x48xbf16>, vector<48x128xbf16>, vector<32x128xf32> -> vector<32x128xf32>
    %172 = arith.truncf %171 : vector<32x128xf32> to vector<32x128xbf16>
    %cst_84 = arith.constant dense<0.000000e+00> : vector<32x128xf32>
    %173 = tpu.matmul %172, %69, %cst_84 {dimension_numbers = #tpu.dot_dimension_numbers<[1], [0], [0], [1], [0, 0, 1, 1], [], []>} : vector<32x128xbf16>, vector<128x128xbf16>, vector<32x128xf32> -> vector<32x128xf32>
    %174 = arith.mulf %173, %173 : vector<32x128xf32>
    %175 = arith.addf %152, %174 : vector<32x128xf32>
    %cst_85 = arith.constant dense<0.000000e+00> : vector<32x128xf32>
    %176 = tpu.matmul %65, %170, %cst_85 {dimension_numbers = #tpu.dot_dimension_numbers<[1], [0], [0], [1], [0, 0, 1, 1], [], []>} : vector<32x48xbf16>, vector<48x128xbf16>, vector<32x128xf32> -> vector<32x128xf32>
    %177 = arith.truncf %176 : vector<32x128xf32> to vector<32x128xbf16>
    %cst_86 = arith.constant dense<0.000000e+00> : vector<32x128xf32>
    %178 = tpu.matmul %177, %71, %cst_86 {dimension_numbers = #tpu.dot_dimension_numbers<[1], [0], [0], [1], [0, 0, 1, 1], [], []>} : vector<32x128xbf16>, vector<128x128xbf16>, vector<32x128xf32> -> vector<32x128xf32>
    %179 = arith.mulf %178, %178 : vector<32x128xf32>
    %180 = arith.addf %157, %179 : vector<32x128xf32>
    %cst_87 = arith.constant dense<0.000000e+00> : vector<32x128xf32>
    %181 = tpu.matmul %67, %170, %cst_87 {dimension_numbers = #tpu.dot_dimension_numbers<[1], [0], [0], [1], [0, 0, 1, 1], [], []>} : vector<32x48xbf16>, vector<48x128xbf16>, vector<32x128xf32> -> vector<32x128xf32>
    %182 = arith.truncf %181 : vector<32x128xf32> to vector<32x128xbf16>
    %cst_88 = arith.constant dense<0.000000e+00> : vector<32x128xf32>
    %183 = tpu.matmul %182, %73, %cst_88 {dimension_numbers = #tpu.dot_dimension_numbers<[1], [0], [0], [1], [0, 0, 1, 1], [], []>} : vector<32x128xbf16>, vector<128x128xbf16>, vector<32x128xf32> -> vector<32x128xf32>
    %184 = arith.mulf %183, %183 : vector<32x128xf32>
    %185 = arith.addf %162, %184 : vector<32x128xf32>
    %cst_89 = arith.constant -0.707106769 : f32
    %186 = vector.broadcast %cst_89 : f32 to vector<48x128xf32>
    %187 = arith.mulf %186, %56 : vector<48x128xf32>
    %cst_90 = arith.constant -0.707106769 : f32
    %188 = vector.broadcast %cst_90 : f32 to vector<48x128xf32>
    %189 = arith.mulf %188, %61 : vector<48x128xf32>
    %190 = arith.addf %187, %189 : vector<48x128xf32>
    %cst_91 = arith.constant 0.000000e+00 : f32
    %191 = vector.broadcast %cst_91 : f32 to vector<48x128xf32>
    %192 = arith.maximumf %190, %191 : vector<48x128xf32>
    %193 = arith.truncf %192 : vector<48x128xf32> to vector<48x128xbf16>
    %cst_92 = arith.constant dense<0.000000e+00> : vector<32x128xf32>
    %194 = tpu.matmul %63, %193, %cst_92 {dimension_numbers = #tpu.dot_dimension_numbers<[1], [0], [0], [1], [0, 0, 1, 1], [], []>} : vector<32x48xbf16>, vector<48x128xbf16>, vector<32x128xf32> -> vector<32x128xf32>
    %195 = arith.truncf %194 : vector<32x128xf32> to vector<32x128xbf16>
    %cst_93 = arith.constant dense<0.000000e+00> : vector<32x128xf32>
    %196 = tpu.matmul %195, %69, %cst_93 {dimension_numbers = #tpu.dot_dimension_numbers<[1], [0], [0], [1], [0, 0, 1, 1], [], []>} : vector<32x128xbf16>, vector<128x128xbf16>, vector<32x128xf32> -> vector<32x128xf32>
    %197 = arith.mulf %196, %196 : vector<32x128xf32>
    %198 = arith.addf %175, %197 : vector<32x128xf32>
    %cst_94 = arith.constant dense<0.000000e+00> : vector<32x128xf32>
    %199 = tpu.matmul %65, %193, %cst_94 {dimension_numbers = #tpu.dot_dimension_numbers<[1], [0], [0], [1], [0, 0, 1, 1], [], []>} : vector<32x48xbf16>, vector<48x128xbf16>, vector<32x128xf32> -> vector<32x128xf32>
    %200 = arith.truncf %199 : vector<32x128xf32> to vector<32x128xbf16>
    %cst_95 = arith.constant dense<0.000000e+00> : vector<32x128xf32>
    %201 = tpu.matmul %200, %71, %cst_95 {dimension_numbers = #tpu.dot_dimension_numbers<[1], [0], [0], [1], [0, 0, 1, 1], [], []>} : vector<32x128xbf16>, vector<128x128xbf16>, vector<32x128xf32> -> vector<32x128xf32>
    %202 = arith.mulf %201, %201 : vector<32x128xf32>
    %203 = arith.addf %180, %202 : vector<32x128xf32>
    %cst_96 = arith.constant dense<0.000000e+00> : vector<32x128xf32>
    %204 = tpu.matmul %67, %193, %cst_96 {dimension_numbers = #tpu.dot_dimension_numbers<[1], [0], [0], [1], [0, 0, 1, 1], [], []>} : vector<32x48xbf16>, vector<48x128xbf16>, vector<32x128xf32> -> vector<32x128xf32>
    %205 = arith.truncf %204 : vector<32x128xf32> to vector<32x128xbf16>
    %cst_97 = arith.constant dense<0.000000e+00> : vector<32x128xf32>
    %206 = tpu.matmul %205, %73, %cst_97 {dimension_numbers = #tpu.dot_dimension_numbers<[1], [0], [0], [1], [0, 0, 1, 1], [], []>} : vector<32x128xbf16>, vector<128x128xbf16>, vector<32x128xf32> -> vector<32x128xf32>
    %207 = arith.mulf %206, %206 : vector<32x128xf32>
    %208 = arith.addf %185, %207 : vector<32x128xf32>
    %cst_98 = arith.constant -1.83697015E-16 : f32
    %209 = vector.broadcast %cst_98 : f32 to vector<48x128xf32>
    %210 = arith.mulf %209, %56 : vector<48x128xf32>
    %cst_99 = arith.constant -1.000000e+00 : f32
    %211 = vector.broadcast %cst_99 : f32 to vector<48x128xf32>
    %212 = arith.mulf %211, %61 : vector<48x128xf32>
    %213 = arith.addf %210, %212 : vector<48x128xf32>
    %cst_100 = arith.constant 0.000000e+00 : f32
    %214 = vector.broadcast %cst_100 : f32 to vector<48x128xf32>
    %215 = arith.maximumf %213, %214 : vector<48x128xf32>
    %216 = arith.truncf %215 : vector<48x128xf32> to vector<48x128xbf16>
    %cst_101 = arith.constant dense<0.000000e+00> : vector<32x128xf32>
    %217 = tpu.matmul %63, %216, %cst_101 {dimension_numbers = #tpu.dot_dimension_numbers<[1], [0], [0], [1], [0, 0, 1, 1], [], []>} : vector<32x48xbf16>, vector<48x128xbf16>, vector<32x128xf32> -> vector<32x128xf32>
    %218 = arith.truncf %217 : vector<32x128xf32> to vector<32x128xbf16>
    %cst_102 = arith.constant dense<0.000000e+00> : vector<32x128xf32>
    %219 = tpu.matmul %218, %69, %cst_102 {dimension_numbers = #tpu.dot_dimension_numbers<[1], [0], [0], [1], [0, 0, 1, 1], [], []>} : vector<32x128xbf16>, vector<128x128xbf16>, vector<32x128xf32> -> vector<32x128xf32>
    %220 = arith.mulf %219, %219 : vector<32x128xf32>
    %221 = arith.addf %198, %220 : vector<32x128xf32>
    %cst_103 = arith.constant dense<0.000000e+00> : vector<32x128xf32>
    %222 = tpu.matmul %65, %216, %cst_103 {dimension_numbers = #tpu.dot_dimension_numbers<[1], [0], [0], [1], [0, 0, 1, 1], [], []>} : vector<32x48xbf16>, vector<48x128xbf16>, vector<32x128xf32> -> vector<32x128xf32>
    %223 = arith.truncf %222 : vector<32x128xf32> to vector<32x128xbf16>
    %cst_104 = arith.constant dense<0.000000e+00> : vector<32x128xf32>
    %224 = tpu.matmul %223, %71, %cst_104 {dimension_numbers = #tpu.dot_dimension_numbers<[1], [0], [0], [1], [0, 0, 1, 1], [], []>} : vector<32x128xbf16>, vector<128x128xbf16>, vector<32x128xf32> -> vector<32x128xf32>
    %225 = arith.mulf %224, %224 : vector<32x128xf32>
    %226 = arith.addf %203, %225 : vector<32x128xf32>
    %cst_105 = arith.constant dense<0.000000e+00> : vector<32x128xf32>
    %227 = tpu.matmul %67, %216, %cst_105 {dimension_numbers = #tpu.dot_dimension_numbers<[1], [0], [0], [1], [0, 0, 1, 1], [], []>} : vector<32x48xbf16>, vector<48x128xbf16>, vector<32x128xf32> -> vector<32x128xf32>
    %228 = arith.truncf %227 : vector<32x128xf32> to vector<32x128xbf16>
    %cst_106 = arith.constant dense<0.000000e+00> : vector<32x128xf32>
    %229 = tpu.matmul %228, %73, %cst_106 {dimension_numbers = #tpu.dot_dimension_numbers<[1], [0], [0], [1], [0, 0, 1, 1], [], []>} : vector<32x128xbf16>, vector<128x128xbf16>, vector<32x128xf32> -> vector<32x128xf32>
    %230 = arith.mulf %229, %229 : vector<32x128xf32>
    %231 = arith.addf %208, %230 : vector<32x128xf32>
    %cst_107 = arith.constant 0.707106769 : f32
    %232 = vector.broadcast %cst_107 : f32 to vector<48x128xf32>
    %233 = arith.mulf %232, %56 : vector<48x128xf32>
    %cst_108 = arith.constant -0.707106769 : f32
    %234 = vector.broadcast %cst_108 : f32 to vector<48x128xf32>
    %235 = arith.mulf %234, %61 : vector<48x128xf32>
    %236 = arith.addf %233, %235 : vector<48x128xf32>
    %cst_109 = arith.constant 0.000000e+00 : f32
    %237 = vector.broadcast %cst_109 : f32 to vector<48x128xf32>
    %238 = arith.maximumf %236, %237 : vector<48x128xf32>
    %239 = arith.truncf %238 : vector<48x128xf32> to vector<48x128xbf16>
    %cst_110 = arith.constant dense<0.000000e+00> : vector<32x128xf32>
    %240 = tpu.matmul %63, %239, %cst_110 {dimension_numbers = #tpu.dot_dimension_numbers<[1], [0], [0], [1], [0, 0, 1, 1], [], []>} : vector<32x48xbf16>, vector<48x128xbf16>, vector<32x128xf32> -> vector<32x128xf32>
    %241 = arith.truncf %240 : vector<32x128xf32> to vector<32x128xbf16>
    %cst_111 = arith.constant dense<0.000000e+00> : vector<32x128xf32>
    %242 = tpu.matmul %241, %69, %cst_111 {dimension_numbers = #tpu.dot_dimension_numbers<[1], [0], [0], [1], [0, 0, 1, 1], [], []>} : vector<32x128xbf16>, vector<128x128xbf16>, vector<32x128xf32> -> vector<32x128xf32>
    %243 = arith.mulf %242, %242 : vector<32x128xf32>
    %244 = arith.addf %221, %243 : vector<32x128xf32>
    %cst_112 = arith.constant dense<0.000000e+00> : vector<32x128xf32>
    %245 = tpu.matmul %65, %239, %cst_112 {dimension_numbers = #tpu.dot_dimension_numbers<[1], [0], [0], [1], [0, 0, 1, 1], [], []>} : vector<32x48xbf16>, vector<48x128xbf16>, vector<32x128xf32> -> vector<32x128xf32>
    %246 = arith.truncf %245 : vector<32x128xf32> to vector<32x128xbf16>
    %cst_113 = arith.constant dense<0.000000e+00> : vector<32x128xf32>
    %247 = tpu.matmul %246, %71, %cst_113 {dimension_numbers = #tpu.dot_dimension_numbers<[1], [0], [0], [1], [0, 0, 1, 1], [], []>} : vector<32x128xbf16>, vector<128x128xbf16>, vector<32x128xf32> -> vector<32x128xf32>
    %248 = arith.mulf %247, %247 : vector<32x128xf32>
    %249 = arith.addf %226, %248 : vector<32x128xf32>
    %cst_114 = arith.constant dense<0.000000e+00> : vector<32x128xf32>
    %250 = tpu.matmul %67, %239, %cst_114 {dimension_numbers = #tpu.dot_dimension_numbers<[1], [0], [0], [1], [0, 0, 1, 1], [], []>} : vector<32x48xbf16>, vector<48x128xbf16>, vector<32x128xf32> -> vector<32x128xf32>
    %251 = arith.truncf %250 : vector<32x128xf32> to vector<32x128xbf16>
    %cst_115 = arith.constant dense<0.000000e+00> : vector<32x128xf32>
    %252 = tpu.matmul %251, %73, %cst_115 {dimension_numbers = #tpu.dot_dimension_numbers<[1], [0], [0], [1], [0, 0, 1, 1], [], []>} : vector<32x128xbf16>, vector<128x128xbf16>, vector<32x128xf32> -> vector<32x128xf32>
    %253 = arith.mulf %252, %252 : vector<32x128xf32>
    %254 = arith.addf %231, %253 : vector<32x128xf32>
    %255 = vector.extract_strided_slice %244 {offsets = [8, 0], sizes = [16, 128], strides = [1, 1]} : vector<32x128xf32> to vector<16x128xf32>
    %c126_i32 = arith.constant 126 : i32
    %256 = tpu.dynamic_rotate %249 by %c126_i32 dim 1 : vector<32x128xf32>, i32 -> vector<32x128xf32>
    %257 = vector.extract_strided_slice %256 {offsets = [8, 0], sizes = [16, 128], strides = [1, 1]} : vector<32x128xf32> to vector<16x128xf32>
    %258 = arith.addf %255, %257 : vector<16x128xf32>
    %c30_i32 = arith.constant 30 : i32
    %259 = tpu.dynamic_rotate %249 by %c30_i32 dim 0 : vector<32x128xf32>, i32 -> vector<32x128xf32>
    %260 = vector.extract_strided_slice %259 {offsets = [8, 0], sizes = [16, 128], strides = [1, 1]} : vector<32x128xf32> to vector<16x128xf32>
    %261 = arith.addf %258, %260 : vector<16x128xf32>
    %c2_i32 = arith.constant 2 : i32
    %262 = tpu.dynamic_rotate %249 by %c2_i32 dim 1 : vector<32x128xf32>, i32 -> vector<32x128xf32>
    %263 = vector.extract_strided_slice %262 {offsets = [8, 0], sizes = [16, 128], strides = [1, 1]} : vector<32x128xf32> to vector<16x128xf32>
    %264 = arith.addf %261, %263 : vector<16x128xf32>
    %c2_i32_116 = arith.constant 2 : i32
    %265 = tpu.dynamic_rotate %249 by %c2_i32_116 dim 0 : vector<32x128xf32>, i32 -> vector<32x128xf32>
    %266 = vector.extract_strided_slice %265 {offsets = [8, 0], sizes = [16, 128], strides = [1, 1]} : vector<32x128xf32> to vector<16x128xf32>
    %267 = arith.addf %264, %266 : vector<16x128xf32>
    %c123_i32 = arith.constant 123 : i32
    %268 = tpu.dynamic_rotate %254 by %c123_i32 dim 1 : vector<32x128xf32>, i32 -> vector<32x128xf32>
    %269 = vector.extract_strided_slice %268 {offsets = [8, 0], sizes = [16, 128], strides = [1, 1]} : vector<32x128xf32> to vector<16x128xf32>
    %270 = arith.addf %267, %269 : vector<16x128xf32>
    %c27_i32 = arith.constant 27 : i32
    %271 = tpu.dynamic_rotate %254 by %c27_i32 dim 0 : vector<32x128xf32>, i32 -> vector<32x128xf32>
    %272 = vector.extract_strided_slice %271 {offsets = [8, 0], sizes = [16, 128], strides = [1, 1]} : vector<32x128xf32> to vector<16x128xf32>
    %273 = arith.addf %270, %272 : vector<16x128xf32>
    %c5_i32 = arith.constant 5 : i32
    %274 = tpu.dynamic_rotate %254 by %c5_i32 dim 1 : vector<32x128xf32>, i32 -> vector<32x128xf32>
    %275 = vector.extract_strided_slice %274 {offsets = [8, 0], sizes = [16, 128], strides = [1, 1]} : vector<32x128xf32> to vector<16x128xf32>
    %276 = arith.addf %273, %275 : vector<16x128xf32>
    %c5_i32_117 = arith.constant 5 : i32
    %277 = tpu.dynamic_rotate %254 by %c5_i32_117 dim 0 : vector<32x128xf32>, i32 -> vector<32x128xf32>
    %278 = vector.extract_strided_slice %277 {offsets = [8, 0], sizes = [16, 128], strides = [1, 1]} : vector<32x128xf32> to vector<16x128xf32>
    %279 = arith.addf %276, %278 : vector<16x128xf32>
    %cst_118 = arith.constant 1.000000e-24 : f32
    %280 = vector.broadcast %cst_118 : f32 to vector<16x128xf32>
    %281 = arith.maximumf %279, %280 : vector<16x128xf32>
    %282 = math.rsqrt %281 : vector<16x128xf32>
    %283 = vector.extract_strided_slice %84 {offsets = [8, 0], sizes = [16, 128], strides = [1, 1]} : vector<32x128xf32> to vector<16x128xf32>
    %284 = arith.mulf %283, %282 : vector<16x128xf32>
    %285 = arith.truncf %284 : vector<16x128xf32> to vector<16x128xbf16>
    %c0_119 = arith.constant 0 : index
    %c0_120 = arith.constant 0 : index
    %c0_121 = arith.constant 0 : index
    %c0_122 = arith.constant 0 : index
    %286 = vector.load %arg5[%c0_119, %c0_120, %c0_121, %c0_122] : memref<1x72x16x128xbf16, #tpu.memory_space<vmem>>, vector<1x1x16x128xbf16>
    %287 = vector.shape_cast %286 : vector<1x1x16x128xbf16> to vector<16x128xbf16>
    %288 = vector.shape_cast %285 : vector<16x128xbf16> to vector<1x1x16x128xbf16>
    tpu.vector_store %arg5[%c0_119, %c0_120, %c0_121, %c0_122], %288 {strides = array<i32>} : memref<1x72x16x128xbf16, #tpu.memory_space<vmem>>, vector<1x1x16x128xbf16>,
    %289 = vector.extract_strided_slice %104 {offsets = [8, 0], sizes = [16, 128], strides = [1, 1]} : vector<32x128xf32> to vector<16x128xf32>
    %290 = arith.mulf %289, %282 : vector<16x128xf32>
    %291 = arith.truncf %290 : vector<16x128xf32> to vector<16x128xbf16>
    %c0_123 = arith.constant 0 : index
    %c1_124 = arith.constant 1 : index
    %c0_125 = arith.constant 0 : index
    %c0_126 = arith.constant 0 : index
    %292 = vector.load %arg5[%c0_123, %c1_124, %c0_125, %c0_126] : memref<1x72x16x128xbf16, #tpu.memory_space<vmem>>, vector<1x1x16x128xbf16>
    %293 = vector.shape_cast %292 : vector<1x1x16x128xbf16> to vector<16x128xbf16>
    %294 = vector.shape_cast %291 : vector<16x128xbf16> to vector<1x1x16x128xbf16>
    tpu.vector_store %arg5[%c0_123, %c1_124, %c0_125, %c0_126], %294 {strides = array<i32>} : memref<1x72x16x128xbf16, #tpu.memory_space<vmem>>, vector<1x1x16x128xbf16>,
    %295 = vector.extract_strided_slice %127 {offsets = [8, 0], sizes = [16, 128], strides = [1, 1]} : vector<32x128xf32> to vector<16x128xf32>
    %296 = arith.mulf %295, %282 : vector<16x128xf32>
    %297 = arith.truncf %296 : vector<16x128xf32> to vector<16x128xbf16>
    %c0_127 = arith.constant 0 : index
    %c2_128 = arith.constant 2 : index
    %c0_129 = arith.constant 0 : index
    %c0_130 = arith.constant 0 : index
    %298 = vector.load %arg5[%c0_127, %c2_128, %c0_129, %c0_130] : memref<1x72x16x128xbf16, #tpu.memory_space<vmem>>, vector<1x1x16x128xbf16>
    %299 = vector.shape_cast %298 : vector<1x1x16x128xbf16> to vector<16x128xbf16>
    %300 = vector.shape_cast %297 : vector<16x128xbf16> to vector<1x1x16x128xbf16>
    tpu.vector_store %arg5[%c0_127, %c2_128, %c0_129, %c0_130], %300 {strides = array<i32>} : memref<1x72x16x128xbf16, #tpu.memory_space<vmem>>, vector<1x1x16x128xbf16>,
    %301 = vector.extract_strided_slice %150 {offsets = [8, 0], sizes = [16, 128], strides = [1, 1]} : vector<32x128xf32> to vector<16x128xf32>
    %302 = arith.mulf %301, %282 : vector<16x128xf32>
    %303 = arith.truncf %302 : vector<16x128xf32> to vector<16x128xbf16>
    %c0_131 = arith.constant 0 : index
    %c3 = arith.constant 3 : index
    %c0_132 = arith.constant 0 : index
    %c0_133 = arith.constant 0 : index
    %304 = vector.load %arg5[%c0_131, %c3, %c0_132, %c0_133] : memref<1x72x16x128xbf16, #tpu.memory_space<vmem>>, vector<1x1x16x128xbf16>
    %305 = vector.shape_cast %304 : vector<1x1x16x128xbf16> to vector<16x128xbf16>
    %306 = vector.shape_cast %303 : vector<16x128xbf16> to vector<1x1x16x128xbf16>
    tpu.vector_store %arg5[%c0_131, %c3, %c0_132, %c0_133], %306 {strides = array<i32>} : memref<1x72x16x128xbf16, #tpu.memory_space<vmem>>, vector<1x1x16x128xbf16>,
    %307 = vector.extract_strided_slice %173 {offsets = [8, 0], sizes = [16, 128], strides = [1, 1]} : vector<32x128xf32> to vector<16x128xf32>
    %308 = arith.mulf %307, %282 : vector<16x128xf32>
    %309 = arith.truncf %308 : vector<16x128xf32> to vector<16x128xbf16>
    %c0_134 = arith.constant 0 : index
    %c4 = arith.constant 4 : index
    %c0_135 = arith.constant 0 : index
    %c0_136 = arith.constant 0 : index
    %310 = vector.load %arg5[%c0_134, %c4, %c0_135, %c0_136] : memref<1x72x16x128xbf16, #tpu.memory_space<vmem>>, vector<1x1x16x128xbf16>
    %311 = vector.shape_cast %310 : vector<1x1x16x128xbf16> to vector<16x128xbf16>
    %312 = vector.shape_cast %309 : vector<16x128xbf16> to vector<1x1x16x128xbf16>
    tpu.vector_store %arg5[%c0_134, %c4, %c0_135, %c0_136], %312 {strides = array<i32>} : memref<1x72x16x128xbf16, #tpu.memory_space<vmem>>, vector<1x1x16x128xbf16>,
    %313 = vector.extract_strided_slice %196 {offsets = [8, 0], sizes = [16, 128], strides = [1, 1]} : vector<32x128xf32> to vector<16x128xf32>
    %314 = arith.mulf %313, %282 : vector<16x128xf32>
    %315 = arith.truncf %314 : vector<16x128xf32> to vector<16x128xbf16>
    %c0_137 = arith.constant 0 : index
    %c5 = arith.constant 5 : index
    %c0_138 = arith.constant 0 : index
    %c0_139 = arith.constant 0 : index
    %316 = vector.load %arg5[%c0_137, %c5, %c0_138, %c0_139] : memref<1x72x16x128xbf16, #tpu.memory_space<vmem>>, vector<1x1x16x128xbf16>
    %317 = vector.shape_cast %316 : vector<1x1x16x128xbf16> to vector<16x128xbf16>
    %318 = vector.shape_cast %315 : vector<16x128xbf16> to vector<1x1x16x128xbf16>
    tpu.vector_store %arg5[%c0_137, %c5, %c0_138, %c0_139], %318 {strides = array<i32>} : memref<1x72x16x128xbf16, #tpu.memory_space<vmem>>, vector<1x1x16x128xbf16>,
    %319 = vector.extract_strided_slice %219 {offsets = [8, 0], sizes = [16, 128], strides = [1, 1]} : vector<32x128xf32> to vector<16x128xf32>
    %320 = arith.mulf %319, %282 : vector<16x128xf32>
    %321 = arith.truncf %320 : vector<16x128xf32> to vector<16x128xbf16>
    %c0_140 = arith.constant 0 : index
    %c6 = arith.constant 6 : index
    %c0_141 = arith.constant 0 : index
    %c0_142 = arith.constant 0 : index
    %322 = vector.load %arg5[%c0_140, %c6, %c0_141, %c0_142] : memref<1x72x16x128xbf16, #tpu.memory_space<vmem>>, vector<1x1x16x128xbf16>
    %323 = vector.shape_cast %322 : vector<1x1x16x128xbf16> to vector<16x128xbf16>
    %324 = vector.shape_cast %321 : vector<16x128xbf16> to vector<1x1x16x128xbf16>
    tpu.vector_store %arg5[%c0_140, %c6, %c0_141, %c0_142], %324 {strides = array<i32>} : memref<1x72x16x128xbf16, #tpu.memory_space<vmem>>, vector<1x1x16x128xbf16>,
    %325 = vector.extract_strided_slice %242 {offsets = [8, 0], sizes = [16, 128], strides = [1, 1]} : vector<32x128xf32> to vector<16x128xf32>
    %326 = arith.mulf %325, %282 : vector<16x128xf32>
    %327 = arith.truncf %326 : vector<16x128xf32> to vector<16x128xbf16>
    %c0_143 = arith.constant 0 : index
    %c7 = arith.constant 7 : index
    %c0_144 = arith.constant 0 : index
    %c0_145 = arith.constant 0 : index
    %328 = vector.load %arg5[%c0_143, %c7, %c0_144, %c0_145] : memref<1x72x16x128xbf16, #tpu.memory_space<vmem>>, vector<1x1x16x128xbf16>
    %329 = vector.shape_cast %328 : vector<1x1x16x128xbf16> to vector<16x128xbf16>
    %330 = vector.shape_cast %327 : vector<16x128xbf16> to vector<1x1x16x128xbf16>
    tpu.vector_store %arg5[%c0_143, %c7, %c0_144, %c0_145], %330 {strides = array<i32>} : memref<1x72x16x128xbf16, #tpu.memory_space<vmem>>, vector<1x1x16x128xbf16>,
    %c126_i32_146 = arith.constant 126 : i32
    %331 = tpu.dynamic_rotate %88 by %c126_i32_146 dim 1 : vector<32x128xf32>, i32 -> vector<32x128xf32>
    %332 = vector.extract_strided_slice %331 {offsets = [8, 0], sizes = [16, 128], strides = [1, 1]} : vector<32x128xf32> to vector<16x128xf32>
    %333 = arith.mulf %332, %282 : vector<16x128xf32>
    %334 = arith.truncf %333 : vector<16x128xf32> to vector<16x128xbf16>
    %c0_147 = arith.constant 0 : index
    %c8 = arith.constant 8 : index
    %c0_148 = arith.constant 0 : index
    %c0_149 = arith.constant 0 : index
    %335 = vector.load %arg5[%c0_147, %c8, %c0_148, %c0_149] : memref<1x72x16x128xbf16, #tpu.memory_space<vmem>>, vector<1x1x16x128xbf16>
    %336 = vector.shape_cast %335 : vector<1x1x16x128xbf16> to vector<16x128xbf16>
    %337 = vector.shape_cast %334 : vector<16x128xbf16> to vector<1x1x16x128xbf16>
    tpu.vector_store %arg5[%c0_147, %c8, %c0_148, %c0_149], %337 {strides = array<i32>} : memref<1x72x16x128xbf16, #tpu.memory_space<vmem>>, vector<1x1x16x128xbf16>,
    %c126_i32_150 = arith.constant 126 : i32
    %338 = tpu.dynamic_rotate %109 by %c126_i32_150 dim 1 : vector<32x128xf32>, i32 -> vector<32x128xf32>
    %339 = vector.extract_strided_slice %338 {offsets = [8, 0], sizes = [16, 128], strides = [1, 1]} : vector<32x128xf32> to vector<16x128xf32>
    %340 = arith.mulf %339, %282 : vector<16x128xf32>
    %341 = arith.truncf %340 : vector<16x128xf32> to vector<16x128xbf16>
    %c0_151 = arith.constant 0 : index
    %c9 = arith.constant 9 : index
    %c0_152 = arith.constant 0 : index
    %c0_153 = arith.constant 0 : index
    %342 = vector.load %arg5[%c0_151, %c9, %c0_152, %c0_153] : memref<1x72x16x128xbf16, #tpu.memory_space<vmem>>, vector<1x1x16x128xbf16>
    %343 = vector.shape_cast %342 : vector<1x1x16x128xbf16> to vector<16x128xbf16>
    %344 = vector.shape_cast %341 : vector<16x128xbf16> to vector<1x1x16x128xbf16>
    tpu.vector_store %arg5[%c0_151, %c9, %c0_152, %c0_153], %344 {strides = array<i32>} : memref<1x72x16x128xbf16, #tpu.memory_space<vmem>>, vector<1x1x16x128xbf16>,
    %c126_i32_154 = arith.constant 126 : i32
    %345 = tpu.dynamic_rotate %132 by %c126_i32_154 dim 1 : vector<32x128xf32>, i32 -> vector<32x128xf32>
    %346 = vector.extract_strided_slice %345 {offsets = [8, 0], sizes = [16, 128], strides = [1, 1]} : vector<32x128xf32> to vector<16x128xf32>
    %347 = arith.mulf %346, %282 : vector<16x128xf32>
    %348 = arith.truncf %347 : vector<16x128xf32> to vector<16x128xbf16>
    %c0_155 = arith.constant 0 : index
    %c10 = arith.constant 10 : index
    %c0_156 = arith.constant 0 : index
    %c0_157 = arith.constant 0 : index
    %349 = vector.load %arg5[%c0_155, %c10, %c0_156, %c0_157] : memref<1x72x16x128xbf16, #tpu.memory_space<vmem>>, vector<1x1x16x128xbf16>
    %350 = vector.shape_cast %349 : vector<1x1x16x128xbf16> to vector<16x128xbf16>
    %351 = vector.shape_cast %348 : vector<16x128xbf16> to vector<1x1x16x128xbf16>
    tpu.vector_store %arg5[%c0_155, %c10, %c0_156, %c0_157], %351 {strides = array<i32>} : memref<1x72x16x128xbf16, #tpu.memory_space<vmem>>, vector<1x1x16x128xbf16>,
    %c126_i32_158 = arith.constant 126 : i32
    %352 = tpu.dynamic_rotate %155 by %c126_i32_158 dim 1 : vector<32x128xf32>, i32 -> vector<32x128xf32>
    %353 = vector.extract_strided_slice %352 {offsets = [8, 0], sizes = [16, 128], strides = [1, 1]} : vector<32x128xf32> to vector<16x128xf32>
    %354 = arith.mulf %353, %282 : vector<16x128xf32>
    %355 = arith.truncf %354 : vector<16x128xf32> to vector<16x128xbf16>
    %c0_159 = arith.constant 0 : index
    %c11 = arith.constant 11 : index
    %c0_160 = arith.constant 0 : index
    %c0_161 = arith.constant 0 : index
    %356 = vector.load %arg5[%c0_159, %c11, %c0_160, %c0_161] : memref<1x72x16x128xbf16, #tpu.memory_space<vmem>>, vector<1x1x16x128xbf16>
    %357 = vector.shape_cast %356 : vector<1x1x16x128xbf16> to vector<16x128xbf16>
    %358 = vector.shape_cast %355 : vector<16x128xbf16> to vector<1x1x16x128xbf16>
    tpu.vector_store %arg5[%c0_159, %c11, %c0_160, %c0_161], %358 {strides = array<i32>} : memref<1x72x16x128xbf16, #tpu.memory_space<vmem>>, vector<1x1x16x128xbf16>,
    %c126_i32_162 = arith.constant 126 : i32
    %359 = tpu.dynamic_rotate %178 by %c126_i32_162 dim 1 : vector<32x128xf32>, i32 -> vector<32x128xf32>
    %360 = vector.extract_strided_slice %359 {offsets = [8, 0], sizes = [16, 128], strides = [1, 1]} : vector<32x128xf32> to vector<16x128xf32>
    %361 = arith.mulf %360, %282 : vector<16x128xf32>
    %362 = arith.truncf %361 : vector<16x128xf32> to vector<16x128xbf16>
    %c0_163 = arith.constant 0 : index
    %c12 = arith.constant 12 : index
    %c0_164 = arith.constant 0 : index
    %c0_165 = arith.constant 0 : index
    %363 = vector.load %arg5[%c0_163, %c12, %c0_164, %c0_165] : memref<1x72x16x128xbf16, #tpu.memory_space<vmem>>, vector<1x1x16x128xbf16>
    %364 = vector.shape_cast %363 : vector<1x1x16x128xbf16> to vector<16x128xbf16>
    %365 = vector.shape_cast %362 : vector<16x128xbf16> to vector<1x1x16x128xbf16>
    tpu.vector_store %arg5[%c0_163, %c12, %c0_164, %c0_165], %365 {strides = array<i32>} : memref<1x72x16x128xbf16, #tpu.memory_space<vmem>>, vector<1x1x16x128xbf16>,
    %c126_i32_166 = arith.constant 126 : i32
    %366 = tpu.dynamic_rotate %201 by %c126_i32_166 dim 1 : vector<32x128xf32>, i32 -> vector<32x128xf32>
    %367 = vector.extract_strided_slice %366 {offsets = [8, 0], sizes = [16, 128], strides = [1, 1]} : vector<32x128xf32> to vector<16x128xf32>
    %368 = arith.mulf %367, %282 : vector<16x128xf32>
    %369 = arith.truncf %368 : vector<16x128xf32> to vector<16x128xbf16>
    %c0_167 = arith.constant 0 : index
    %c13 = arith.constant 13 : index
    %c0_168 = arith.constant 0 : index
    %c0_169 = arith.constant 0 : index
    %370 = vector.load %arg5[%c0_167, %c13, %c0_168, %c0_169] : memref<1x72x16x128xbf16, #tpu.memory_space<vmem>>, vector<1x1x16x128xbf16>
    %371 = vector.shape_cast %370 : vector<1x1x16x128xbf16> to vector<16x128xbf16>
    %372 = vector.shape_cast %369 : vector<16x128xbf16> to vector<1x1x16x128xbf16>
    tpu.vector_store %arg5[%c0_167, %c13, %c0_168, %c0_169], %372 {strides = array<i32>} : memref<1x72x16x128xbf16, #tpu.memory_space<vmem>>, vector<1x1x16x128xbf16>,
    %c126_i32_170 = arith.constant 126 : i32
    %373 = tpu.dynamic_rotate %224 by %c126_i32_170 dim 1 : vector<32x128xf32>, i32 -> vector<32x128xf32>
    %374 = vector.extract_strided_slice %373 {offsets = [8, 0], sizes = [16, 128], strides = [1, 1]} : vector<32x128xf32> to vector<16x128xf32>
    %375 = arith.mulf %374, %282 : vector<16x128xf32>
    %376 = arith.truncf %375 : vector<16x128xf32> to vector<16x128xbf16>
    %c0_171 = arith.constant 0 : index
    %c14 = arith.constant 14 : index
    %c0_172 = arith.constant 0 : index
    %c0_173 = arith.constant 0 : index
    %377 = vector.load %arg5[%c0_171, %c14, %c0_172, %c0_173] : memref<1x72x16x128xbf16, #tpu.memory_space<vmem>>, vector<1x1x16x128xbf16>
    %378 = vector.shape_cast %377 : vector<1x1x16x128xbf16> to vector<16x128xbf16>
    %379 = vector.shape_cast %376 : vector<16x128xbf16> to vector<1x1x16x128xbf16>
    tpu.vector_store %arg5[%c0_171, %c14, %c0_172, %c0_173], %379 {strides = array<i32>} : memref<1x72x16x128xbf16, #tpu.memory_space<vmem>>, vector<1x1x16x128xbf16>,
    %c126_i32_174 = arith.constant 126 : i32
    %380 = tpu.dynamic_rotate %247 by %c126_i32_174 dim 1 : vector<32x128xf32>, i32 -> vector<32x128xf32>
    %381 = vector.extract_strided_slice %380 {offsets = [8, 0], sizes = [16, 128], strides = [1, 1]} : vector<32x128xf32> to vector<16x128xf32>
    %382 = arith.mulf %381, %282 : vector<16x128xf32>
    %383 = arith.truncf %382 : vector<16x128xf32> to vector<16x128xbf16>
    %c0_175 = arith.constant 0 : index
    %c15 = arith.constant 15 : index
    %c0_176 = arith.constant 0 : index
    %c0_177 = arith.constant 0 : index
    %384 = vector.load %arg5[%c0_175, %c15, %c0_176, %c0_177] : memref<1x72x16x128xbf16, #tpu.memory_space<vmem>>, vector<1x1x16x128xbf16>
    %385 = vector.shape_cast %384 : vector<1x1x16x128xbf16> to vector<16x128xbf16>
    %386 = vector.shape_cast %383 : vector<16x128xbf16> to vector<1x1x16x128xbf16>
    tpu.vector_store %arg5[%c0_175, %c15, %c0_176, %c0_177], %386 {strides = array<i32>} : memref<1x72x16x128xbf16, #tpu.memory_space<vmem>>, vector<1x1x16x128xbf16>,
    %c30_i32_178 = arith.constant 30 : i32
    %387 = tpu.dynamic_rotate %88 by %c30_i32_178 dim 0 : vector<32x128xf32>, i32 -> vector<32x128xf32>
    %388 = vector.extract_strided_slice %387 {offsets = [8, 0], sizes = [16, 128], strides = [1, 1]} : vector<32x128xf32> to vector<16x128xf32>
    %389 = arith.mulf %388, %282 : vector<16x128xf32>
    %390 = arith.truncf %389 : vector<16x128xf32> to vector<16x128xbf16>
    %c0_179 = arith.constant 0 : index
    %c16 = arith.constant 16 : index
    %c0_180 = arith.constant 0 : index
    %c0_181 = arith.constant 0 : index
    %391 = vector.load %arg5[%c0_179, %c16, %c0_180, %c0_181] : memref<1x72x16x128xbf16, #tpu.memory_space<vmem>>, vector<1x1x16x128xbf16>
    %392 = vector.shape_cast %391 : vector<1x1x16x128xbf16> to vector<16x128xbf16>
    %393 = vector.shape_cast %390 : vector<16x128xbf16> to vector<1x1x16x128xbf16>
    tpu.vector_store %arg5[%c0_179, %c16, %c0_180, %c0_181], %393 {strides = array<i32>} : memref<1x72x16x128xbf16, #tpu.memory_space<vmem>>, vector<1x1x16x128xbf16>,
    %c30_i32_182 = arith.constant 30 : i32
    %394 = tpu.dynamic_rotate %109 by %c30_i32_182 dim 0 : vector<32x128xf32>, i32 -> vector<32x128xf32>
    %395 = vector.extract_strided_slice %394 {offsets = [8, 0], sizes = [16, 128], strides = [1, 1]} : vector<32x128xf32> to vector<16x128xf32>
    %396 = arith.mulf %395, %282 : vector<16x128xf32>
    %397 = arith.truncf %396 : vector<16x128xf32> to vector<16x128xbf16>
    %c0_183 = arith.constant 0 : index
    %c17 = arith.constant 17 : index
    %c0_184 = arith.constant 0 : index
    %c0_185 = arith.constant 0 : index
    %398 = vector.load %arg5[%c0_183, %c17, %c0_184, %c0_185] : memref<1x72x16x128xbf16, #tpu.memory_space<vmem>>, vector<1x1x16x128xbf16>
    %399 = vector.shape_cast %398 : vector<1x1x16x128xbf16> to vector<16x128xbf16>
    %400 = vector.shape_cast %397 : vector<16x128xbf16> to vector<1x1x16x128xbf16>
    tpu.vector_store %arg5[%c0_183, %c17, %c0_184, %c0_185], %400 {strides = array<i32>} : memref<1x72x16x128xbf16, #tpu.memory_space<vmem>>, vector<1x1x16x128xbf16>,
    %c30_i32_186 = arith.constant 30 : i32
    %401 = tpu.dynamic_rotate %132 by %c30_i32_186 dim 0 : vector<32x128xf32>, i32 -> vector<32x128xf32>
    %402 = vector.extract_strided_slice %401 {offsets = [8, 0], sizes = [16, 128], strides = [1, 1]} : vector<32x128xf32> to vector<16x128xf32>
    %403 = arith.mulf %402, %282 : vector<16x128xf32>
    %404 = arith.truncf %403 : vector<16x128xf32> to vector<16x128xbf16>
    %c0_187 = arith.constant 0 : index
    %c18 = arith.constant 18 : index
    %c0_188 = arith.constant 0 : index
    %c0_189 = arith.constant 0 : index
    %405 = vector.load %arg5[%c0_187, %c18, %c0_188, %c0_189] : memref<1x72x16x128xbf16, #tpu.memory_space<vmem>>, vector<1x1x16x128xbf16>
    %406 = vector.shape_cast %405 : vector<1x1x16x128xbf16> to vector<16x128xbf16>
    %407 = vector.shape_cast %404 : vector<16x128xbf16> to vector<1x1x16x128xbf16>
    tpu.vector_store %arg5[%c0_187, %c18, %c0_188, %c0_189], %407 {strides = array<i32>} : memref<1x72x16x128xbf16, #tpu.memory_space<vmem>>, vector<1x1x16x128xbf16>,
    %c30_i32_190 = arith.constant 30 : i32
    %408 = tpu.dynamic_rotate %155 by %c30_i32_190 dim 0 : vector<32x128xf32>, i32 -> vector<32x128xf32>
    %409 = vector.extract_strided_slice %408 {offsets = [8, 0], sizes = [16, 128], strides = [1, 1]} : vector<32x128xf32> to vector<16x128xf32>
    %410 = arith.mulf %409, %282 : vector<16x128xf32>
    %411 = arith.truncf %410 : vector<16x128xf32> to vector<16x128xbf16>
    %c0_191 = arith.constant 0 : index
    %c19 = arith.constant 19 : index
    %c0_192 = arith.constant 0 : index
    %c0_193 = arith.constant 0 : index
    %412 = vector.load %arg5[%c0_191, %c19, %c0_192, %c0_193] : memref<1x72x16x128xbf16, #tpu.memory_space<vmem>>, vector<1x1x16x128xbf16>
    %413 = vector.shape_cast %412 : vector<1x1x16x128xbf16> to vector<16x128xbf16>
    %414 = vector.shape_cast %411 : vector<16x128xbf16> to vector<1x1x16x128xbf16>
    tpu.vector_store %arg5[%c0_191, %c19, %c0_192, %c0_193], %414 {strides = array<i32>} : memref<1x72x16x128xbf16, #tpu.memory_space<vmem>>, vector<1x1x16x128xbf16>,
    %c30_i32_194 = arith.constant 30 : i32
    %415 = tpu.dynamic_rotate %178 by %c30_i32_194 dim 0 : vector<32x128xf32>, i32 -> vector<32x128xf32>
    %416 = vector.extract_strided_slice %415 {offsets = [8, 0], sizes = [16, 128], strides = [1, 1]} : vector<32x128xf32> to vector<16x128xf32>
    %417 = arith.mulf %416, %282 : vector<16x128xf32>
    %418 = arith.truncf %417 : vector<16x128xf32> to vector<16x128xbf16>
    %c0_195 = arith.constant 0 : index
    %c20 = arith.constant 20 : index
    %c0_196 = arith.constant 0 : index
    %c0_197 = arith.constant 0 : index
    %419 = vector.load %arg5[%c0_195, %c20, %c0_196, %c0_197] : memref<1x72x16x128xbf16, #tpu.memory_space<vmem>>, vector<1x1x16x128xbf16>
    %420 = vector.shape_cast %419 : vector<1x1x16x128xbf16> to vector<16x128xbf16>
    %421 = vector.shape_cast %418 : vector<16x128xbf16> to vector<1x1x16x128xbf16>
    tpu.vector_store %arg5[%c0_195, %c20, %c0_196, %c0_197], %421 {strides = array<i32>} : memref<1x72x16x128xbf16, #tpu.memory_space<vmem>>, vector<1x1x16x128xbf16>,
    %c30_i32_198 = arith.constant 30 : i32
    %422 = tpu.dynamic_rotate %201 by %c30_i32_198 dim 0 : vector<32x128xf32>, i32 -> vector<32x128xf32>
    %423 = vector.extract_strided_slice %422 {offsets = [8, 0], sizes = [16, 128], strides = [1, 1]} : vector<32x128xf32> to vector<16x128xf32>
    %424 = arith.mulf %423, %282 : vector<16x128xf32>
    %425 = arith.truncf %424 : vector<16x128xf32> to vector<16x128xbf16>
    %c0_199 = arith.constant 0 : index
    %c21 = arith.constant 21 : index
    %c0_200 = arith.constant 0 : index
    %c0_201 = arith.constant 0 : index
    %426 = vector.load %arg5[%c0_199, %c21, %c0_200, %c0_201] : memref<1x72x16x128xbf16, #tpu.memory_space<vmem>>, vector<1x1x16x128xbf16>
    %427 = vector.shape_cast %426 : vector<1x1x16x128xbf16> to vector<16x128xbf16>
    %428 = vector.shape_cast %425 : vector<16x128xbf16> to vector<1x1x16x128xbf16>
    tpu.vector_store %arg5[%c0_199, %c21, %c0_200, %c0_201], %428 {strides = array<i32>} : memref<1x72x16x128xbf16, #tpu.memory_space<vmem>>, vector<1x1x16x128xbf16>,
    %c30_i32_202 = arith.constant 30 : i32
    %429 = tpu.dynamic_rotate %224 by %c30_i32_202 dim 0 : vector<32x128xf32>, i32 -> vector<32x128xf32>
    %430 = vector.extract_strided_slice %429 {offsets = [8, 0], sizes = [16, 128], strides = [1, 1]} : vector<32x128xf32> to vector<16x128xf32>
    %431 = arith.mulf %430, %282 : vector<16x128xf32>
    %432 = arith.truncf %431 : vector<16x128xf32> to vector<16x128xbf16>
    %c0_203 = arith.constant 0 : index
    %c22 = arith.constant 22 : index
    %c0_204 = arith.constant 0 : index
    %c0_205 = arith.constant 0 : index
    %433 = vector.load %arg5[%c0_203, %c22, %c0_204, %c0_205] : memref<1x72x16x128xbf16, #tpu.memory_space<vmem>>, vector<1x1x16x128xbf16>
    %434 = vector.shape_cast %433 : vector<1x1x16x128xbf16> to vector<16x128xbf16>
    %435 = vector.shape_cast %432 : vector<16x128xbf16> to vector<1x1x16x128xbf16>
    tpu.vector_store %arg5[%c0_203, %c22, %c0_204, %c0_205], %435 {strides = array<i32>} : memref<1x72x16x128xbf16, #tpu.memory_space<vmem>>, vector<1x1x16x128xbf16>,
    %c30_i32_206 = arith.constant 30 : i32
    %436 = tpu.dynamic_rotate %247 by %c30_i32_206 dim 0 : vector<32x128xf32>, i32 -> vector<32x128xf32>
    %437 = vector.extract_strided_slice %436 {offsets = [8, 0], sizes = [16, 128], strides = [1, 1]} : vector<32x128xf32> to vector<16x128xf32>
    %438 = arith.mulf %437, %282 : vector<16x128xf32>
    %439 = arith.truncf %438 : vector<16x128xf32> to vector<16x128xbf16>
    %c0_207 = arith.constant 0 : index
    %c23 = arith.constant 23 : index
    %c0_208 = arith.constant 0 : index
    %c0_209 = arith.constant 0 : index
    %440 = vector.load %arg5[%c0_207, %c23, %c0_208, %c0_209] : memref<1x72x16x128xbf16, #tpu.memory_space<vmem>>, vector<1x1x16x128xbf16>
    %441 = vector.shape_cast %440 : vector<1x1x16x128xbf16> to vector<16x128xbf16>
    %442 = vector.shape_cast %439 : vector<16x128xbf16> to vector<1x1x16x128xbf16>
    tpu.vector_store %arg5[%c0_207, %c23, %c0_208, %c0_209], %442 {strides = array<i32>} : memref<1x72x16x128xbf16, #tpu.memory_space<vmem>>, vector<1x1x16x128xbf16>,
    %c2_i32_210 = arith.constant 2 : i32
    %443 = tpu.dynamic_rotate %88 by %c2_i32_210 dim 1 : vector<32x128xf32>, i32 -> vector<32x128xf32>
    %444 = vector.extract_strided_slice %443 {offsets = [8, 0], sizes = [16, 128], strides = [1, 1]} : vector<32x128xf32> to vector<16x128xf32>
    %445 = arith.mulf %444, %282 : vector<16x128xf32>
    %446 = arith.truncf %445 : vector<16x128xf32> to vector<16x128xbf16>
    %c0_211 = arith.constant 0 : index
    %c24 = arith.constant 24 : index
    %c0_212 = arith.constant 0 : index
    %c0_213 = arith.constant 0 : index
    %447 = vector.load %arg5[%c0_211, %c24, %c0_212, %c0_213] : memref<1x72x16x128xbf16, #tpu.memory_space<vmem>>, vector<1x1x16x128xbf16>
    %448 = vector.shape_cast %447 : vector<1x1x16x128xbf16> to vector<16x128xbf16>
    %449 = vector.shape_cast %446 : vector<16x128xbf16> to vector<1x1x16x128xbf16>
    tpu.vector_store %arg5[%c0_211, %c24, %c0_212, %c0_213], %449 {strides = array<i32>} : memref<1x72x16x128xbf16, #tpu.memory_space<vmem>>, vector<1x1x16x128xbf16>,
    %c2_i32_214 = arith.constant 2 : i32
    %450 = tpu.dynamic_rotate %109 by %c2_i32_214 dim 1 : vector<32x128xf32>, i32 -> vector<32x128xf32>
    %451 = vector.extract_strided_slice %450 {offsets = [8, 0], sizes = [16, 128], strides = [1, 1]} : vector<32x128xf32> to vector<16x128xf32>
    %452 = arith.mulf %451, %282 : vector<16x128xf32>
    %453 = arith.truncf %452 : vector<16x128xf32> to vector<16x128xbf16>
    %c0_215 = arith.constant 0 : index
    %c25 = arith.constant 25 : index
    %c0_216 = arith.constant 0 : index
    %c0_217 = arith.constant 0 : index
    %454 = vector.load %arg5[%c0_215, %c25, %c0_216, %c0_217] : memref<1x72x16x128xbf16, #tpu.memory_space<vmem>>, vector<1x1x16x128xbf16>
    %455 = vector.shape_cast %454 : vector<1x1x16x128xbf16> to vector<16x128xbf16>
    %456 = vector.shape_cast %453 : vector<16x128xbf16> to vector<1x1x16x128xbf16>
    tpu.vector_store %arg5[%c0_215, %c25, %c0_216, %c0_217], %456 {strides = array<i32>} : memref<1x72x16x128xbf16, #tpu.memory_space<vmem>>, vector<1x1x16x128xbf16>,
    %c2_i32_218 = arith.constant 2 : i32
    %457 = tpu.dynamic_rotate %132 by %c2_i32_218 dim 1 : vector<32x128xf32>, i32 -> vector<32x128xf32>
    %458 = vector.extract_strided_slice %457 {offsets = [8, 0], sizes = [16, 128], strides = [1, 1]} : vector<32x128xf32> to vector<16x128xf32>
    %459 = arith.mulf %458, %282 : vector<16x128xf32>
    %460 = arith.truncf %459 : vector<16x128xf32> to vector<16x128xbf16>
    %c0_219 = arith.constant 0 : index
    %c26 = arith.constant 26 : index
    %c0_220 = arith.constant 0 : index
    %c0_221 = arith.constant 0 : index
    %461 = vector.load %arg5[%c0_219, %c26, %c0_220, %c0_221] : memref<1x72x16x128xbf16, #tpu.memory_space<vmem>>, vector<1x1x16x128xbf16>
    %462 = vector.shape_cast %461 : vector<1x1x16x128xbf16> to vector<16x128xbf16>
    %463 = vector.shape_cast %460 : vector<16x128xbf16> to vector<1x1x16x128xbf16>
    tpu.vector_store %arg5[%c0_219, %c26, %c0_220, %c0_221], %463 {strides = array<i32>} : memref<1x72x16x128xbf16, #tpu.memory_space<vmem>>, vector<1x1x16x128xbf16>,
    %c2_i32_222 = arith.constant 2 : i32
    %464 = tpu.dynamic_rotate %155 by %c2_i32_222 dim 1 : vector<32x128xf32>, i32 -> vector<32x128xf32>
    %465 = vector.extract_strided_slice %464 {offsets = [8, 0], sizes = [16, 128], strides = [1, 1]} : vector<32x128xf32> to vector<16x128xf32>
    %466 = arith.mulf %465, %282 : vector<16x128xf32>
    %467 = arith.truncf %466 : vector<16x128xf32> to vector<16x128xbf16>
    %c0_223 = arith.constant 0 : index
    %c27 = arith.constant 27 : index
    %c0_224 = arith.constant 0 : index
    %c0_225 = arith.constant 0 : index
    %468 = vector.load %arg5[%c0_223, %c27, %c0_224, %c0_225] : memref<1x72x16x128xbf16, #tpu.memory_space<vmem>>, vector<1x1x16x128xbf16>
    %469 = vector.shape_cast %468 : vector<1x1x16x128xbf16> to vector<16x128xbf16>
    %470 = vector.shape_cast %467 : vector<16x128xbf16> to vector<1x1x16x128xbf16>
    tpu.vector_store %arg5[%c0_223, %c27, %c0_224, %c0_225], %470 {strides = array<i32>} : memref<1x72x16x128xbf16, #tpu.memory_space<vmem>>, vector<1x1x16x128xbf16>,
    %c2_i32_226 = arith.constant 2 : i32
    %471 = tpu.dynamic_rotate %178 by %c2_i32_226 dim 1 : vector<32x128xf32>, i32 -> vector<32x128xf32>
    %472 = vector.extract_strided_slice %471 {offsets = [8, 0], sizes = [16, 128], strides = [1, 1]} : vector<32x128xf32> to vector<16x128xf32>
    %473 = arith.mulf %472, %282 : vector<16x128xf32>
    %474 = arith.truncf %473 : vector<16x128xf32> to vector<16x128xbf16>
    %c0_227 = arith.constant 0 : index
    %c28 = arith.constant 28 : index
    %c0_228 = arith.constant 0 : index
    %c0_229 = arith.constant 0 : index
    %475 = vector.load %arg5[%c0_227, %c28, %c0_228, %c0_229] : memref<1x72x16x128xbf16, #tpu.memory_space<vmem>>, vector<1x1x16x128xbf16>
    %476 = vector.shape_cast %475 : vector<1x1x16x128xbf16> to vector<16x128xbf16>
    %477 = vector.shape_cast %474 : vector<16x128xbf16> to vector<1x1x16x128xbf16>
    tpu.vector_store %arg5[%c0_227, %c28, %c0_228, %c0_229], %477 {strides = array<i32>} : memref<1x72x16x128xbf16, #tpu.memory_space<vmem>>, vector<1x1x16x128xbf16>,
    %c2_i32_230 = arith.constant 2 : i32
    %478 = tpu.dynamic_rotate %201 by %c2_i32_230 dim 1 : vector<32x128xf32>, i32 -> vector<32x128xf32>
    %479 = vector.extract_strided_slice %478 {offsets = [8, 0], sizes = [16, 128], strides = [1, 1]} : vector<32x128xf32> to vector<16x128xf32>
    %480 = arith.mulf %479, %282 : vector<16x128xf32>
    %481 = arith.truncf %480 : vector<16x128xf32> to vector<16x128xbf16>
    %c0_231 = arith.constant 0 : index
    %c29 = arith.constant 29 : index
    %c0_232 = arith.constant 0 : index
    %c0_233 = arith.constant 0 : index
    %482 = vector.load %arg5[%c0_231, %c29, %c0_232, %c0_233] : memref<1x72x16x128xbf16, #tpu.memory_space<vmem>>, vector<1x1x16x128xbf16>
    %483 = vector.shape_cast %482 : vector<1x1x16x128xbf16> to vector<16x128xbf16>
    %484 = vector.shape_cast %481 : vector<16x128xbf16> to vector<1x1x16x128xbf16>
    tpu.vector_store %arg5[%c0_231, %c29, %c0_232, %c0_233], %484 {strides = array<i32>} : memref<1x72x16x128xbf16, #tpu.memory_space<vmem>>, vector<1x1x16x128xbf16>,
    %c2_i32_234 = arith.constant 2 : i32
    %485 = tpu.dynamic_rotate %224 by %c2_i32_234 dim 1 : vector<32x128xf32>, i32 -> vector<32x128xf32>
    %486 = vector.extract_strided_slice %485 {offsets = [8, 0], sizes = [16, 128], strides = [1, 1]} : vector<32x128xf32> to vector<16x128xf32>
    %487 = arith.mulf %486, %282 : vector<16x128xf32>
    %488 = arith.truncf %487 : vector<16x128xf32> to vector<16x128xbf16>
    %c0_235 = arith.constant 0 : index
    %c30 = arith.constant 30 : index
    %c0_236 = arith.constant 0 : index
    %c0_237 = arith.constant 0 : index
    %489 = vector.load %arg5[%c0_235, %c30, %c0_236, %c0_237] : memref<1x72x16x128xbf16, #tpu.memory_space<vmem>>, vector<1x1x16x128xbf16>
    %490 = vector.shape_cast %489 : vector<1x1x16x128xbf16> to vector<16x128xbf16>
    %491 = vector.shape_cast %488 : vector<16x128xbf16> to vector<1x1x16x128xbf16>
    tpu.vector_store %arg5[%c0_235, %c30, %c0_236, %c0_237], %491 {strides = array<i32>} : memref<1x72x16x128xbf16, #tpu.memory_space<vmem>>, vector<1x1x16x128xbf16>,
    %c2_i32_238 = arith.constant 2 : i32
    %492 = tpu.dynamic_rotate %247 by %c2_i32_238 dim 1 : vector<32x128xf32>, i32 -> vector<32x128xf32>
    %493 = vector.extract_strided_slice %492 {offsets = [8, 0], sizes = [16, 128], strides = [1, 1]} : vector<32x128xf32> to vector<16x128xf32>
    %494 = arith.mulf %493, %282 : vector<16x128xf32>
    %495 = arith.truncf %494 : vector<16x128xf32> to vector<16x128xbf16>
    %c0_239 = arith.constant 0 : index
    %c31 = arith.constant 31 : index
    %c0_240 = arith.constant 0 : index
    %c0_241 = arith.constant 0 : index
    %496 = vector.load %arg5[%c0_239, %c31, %c0_240, %c0_241] : memref<1x72x16x128xbf16, #tpu.memory_space<vmem>>, vector<1x1x16x128xbf16>
    %497 = vector.shape_cast %496 : vector<1x1x16x128xbf16> to vector<16x128xbf16>
    %498 = vector.shape_cast %495 : vector<16x128xbf16> to vector<1x1x16x128xbf16>
    tpu.vector_store %arg5[%c0_239, %c31, %c0_240, %c0_241], %498 {strides = array<i32>} : memref<1x72x16x128xbf16, #tpu.memory_space<vmem>>, vector<1x1x16x128xbf16>,
    %c2_i32_242 = arith.constant 2 : i32
    %499 = tpu.dynamic_rotate %88 by %c2_i32_242 dim 0 : vector<32x128xf32>, i32 -> vector<32x128xf32>
    %500 = vector.extract_strided_slice %499 {offsets = [8, 0], sizes = [16, 128], strides = [1, 1]} : vector<32x128xf32> to vector<16x128xf32>
    %501 = arith.mulf %500, %282 : vector<16x128xf32>
    %502 = arith.truncf %501 : vector<16x128xf32> to vector<16x128xbf16>
    %c0_243 = arith.constant 0 : index
    %c32 = arith.constant 32 : index
    %c0_244 = arith.constant 0 : index
    %c0_245 = arith.constant 0 : index
    %503 = vector.load %arg5[%c0_243, %c32, %c0_244, %c0_245] : memref<1x72x16x128xbf16, #tpu.memory_space<vmem>>, vector<1x1x16x128xbf16>
    %504 = vector.shape_cast %503 : vector<1x1x16x128xbf16> to vector<16x128xbf16>
    %505 = vector.shape_cast %502 : vector<16x128xbf16> to vector<1x1x16x128xbf16>
    tpu.vector_store %arg5[%c0_243, %c32, %c0_244, %c0_245], %505 {strides = array<i32>} : memref<1x72x16x128xbf16, #tpu.memory_space<vmem>>, vector<1x1x16x128xbf16>,
    %c2_i32_246 = arith.constant 2 : i32
    %506 = tpu.dynamic_rotate %109 by %c2_i32_246 dim 0 : vector<32x128xf32>, i32 -> vector<32x128xf32>
    %507 = vector.extract_strided_slice %506 {offsets = [8, 0], sizes = [16, 128], strides = [1, 1]} : vector<32x128xf32> to vector<16x128xf32>
    %508 = arith.mulf %507, %282 : vector<16x128xf32>
    %509 = arith.truncf %508 : vector<16x128xf32> to vector<16x128xbf16>
    %c0_247 = arith.constant 0 : index
    %c33 = arith.constant 33 : index
    %c0_248 = arith.constant 0 : index
    %c0_249 = arith.constant 0 : index
    %510 = vector.load %arg5[%c0_247, %c33, %c0_248, %c0_249] : memref<1x72x16x128xbf16, #tpu.memory_space<vmem>>, vector<1x1x16x128xbf16>
    %511 = vector.shape_cast %510 : vector<1x1x16x128xbf16> to vector<16x128xbf16>
    %512 = vector.shape_cast %509 : vector<16x128xbf16> to vector<1x1x16x128xbf16>
    tpu.vector_store %arg5[%c0_247, %c33, %c0_248, %c0_249], %512 {strides = array<i32>} : memref<1x72x16x128xbf16, #tpu.memory_space<vmem>>, vector<1x1x16x128xbf16>,
    %c2_i32_250 = arith.constant 2 : i32
    %513 = tpu.dynamic_rotate %132 by %c2_i32_250 dim 0 : vector<32x128xf32>, i32 -> vector<32x128xf32>
    %514 = vector.extract_strided_slice %513 {offsets = [8, 0], sizes = [16, 128], strides = [1, 1]} : vector<32x128xf32> to vector<16x128xf32>
    %515 = arith.mulf %514, %282 : vector<16x128xf32>
    %516 = arith.truncf %515 : vector<16x128xf32> to vector<16x128xbf16>
    %c0_251 = arith.constant 0 : index
    %c34 = arith.constant 34 : index
    %c0_252 = arith.constant 0 : index
    %c0_253 = arith.constant 0 : index
    %517 = vector.load %arg5[%c0_251, %c34, %c0_252, %c0_253] : memref<1x72x16x128xbf16, #tpu.memory_space<vmem>>, vector<1x1x16x128xbf16>
    %518 = vector.shape_cast %517 : vector<1x1x16x128xbf16> to vector<16x128xbf16>
    %519 = vector.shape_cast %516 : vector<16x128xbf16> to vector<1x1x16x128xbf16>
    tpu.vector_store %arg5[%c0_251, %c34, %c0_252, %c0_253], %519 {strides = array<i32>} : memref<1x72x16x128xbf16, #tpu.memory_space<vmem>>, vector<1x1x16x128xbf16>,
    %c2_i32_254 = arith.constant 2 : i32
    %520 = tpu.dynamic_rotate %155 by %c2_i32_254 dim 0 : vector<32x128xf32>, i32 -> vector<32x128xf32>
    %521 = vector.extract_strided_slice %520 {offsets = [8, 0], sizes = [16, 128], strides = [1, 1]} : vector<32x128xf32> to vector<16x128xf32>
    %522 = arith.mulf %521, %282 : vector<16x128xf32>
    %523 = arith.truncf %522 : vector<16x128xf32> to vector<16x128xbf16>
    %c0_255 = arith.constant 0 : index
    %c35 = arith.constant 35 : index
    %c0_256 = arith.constant 0 : index
    %c0_257 = arith.constant 0 : index
    %524 = vector.load %arg5[%c0_255, %c35, %c0_256, %c0_257] : memref<1x72x16x128xbf16, #tpu.memory_space<vmem>>, vector<1x1x16x128xbf16>
    %525 = vector.shape_cast %524 : vector<1x1x16x128xbf16> to vector<16x128xbf16>
    %526 = vector.shape_cast %523 : vector<16x128xbf16> to vector<1x1x16x128xbf16>
    tpu.vector_store %arg5[%c0_255, %c35, %c0_256, %c0_257], %526 {strides = array<i32>} : memref<1x72x16x128xbf16, #tpu.memory_space<vmem>>, vector<1x1x16x128xbf16>,
    %c2_i32_258 = arith.constant 2 : i32
    %527 = tpu.dynamic_rotate %178 by %c2_i32_258 dim 0 : vector<32x128xf32>, i32 -> vector<32x128xf32>
    %528 = vector.extract_strided_slice %527 {offsets = [8, 0], sizes = [16, 128], strides = [1, 1]} : vector<32x128xf32> to vector<16x128xf32>
    %529 = arith.mulf %528, %282 : vector<16x128xf32>
    %530 = arith.truncf %529 : vector<16x128xf32> to vector<16x128xbf16>
    %c0_259 = arith.constant 0 : index
    %c36 = arith.constant 36 : index
    %c0_260 = arith.constant 0 : index
    %c0_261 = arith.constant 0 : index
    %531 = vector.load %arg5[%c0_259, %c36, %c0_260, %c0_261] : memref<1x72x16x128xbf16, #tpu.memory_space<vmem>>, vector<1x1x16x128xbf16>
    %532 = vector.shape_cast %531 : vector<1x1x16x128xbf16> to vector<16x128xbf16>
    %533 = vector.shape_cast %530 : vector<16x128xbf16> to vector<1x1x16x128xbf16>
    tpu.vector_store %arg5[%c0_259, %c36, %c0_260, %c0_261], %533 {strides = array<i32>} : memref<1x72x16x128xbf16, #tpu.memory_space<vmem>>, vector<1x1x16x128xbf16>,
    %c2_i32_262 = arith.constant 2 : i32
    %534 = tpu.dynamic_rotate %201 by %c2_i32_262 dim 0 : vector<32x128xf32>, i32 -> vector<32x128xf32>
    %535 = vector.extract_strided_slice %534 {offsets = [8, 0], sizes = [16, 128], strides = [1, 1]} : vector<32x128xf32> to vector<16x128xf32>
    %536 = arith.mulf %535, %282 : vector<16x128xf32>
    %537 = arith.truncf %536 : vector<16x128xf32> to vector<16x128xbf16>
    %c0_263 = arith.constant 0 : index
    %c37 = arith.constant 37 : index
    %c0_264 = arith.constant 0 : index
    %c0_265 = arith.constant 0 : index
    %538 = vector.load %arg5[%c0_263, %c37, %c0_264, %c0_265] : memref<1x72x16x128xbf16, #tpu.memory_space<vmem>>, vector<1x1x16x128xbf16>
    %539 = vector.shape_cast %538 : vector<1x1x16x128xbf16> to vector<16x128xbf16>
    %540 = vector.shape_cast %537 : vector<16x128xbf16> to vector<1x1x16x128xbf16>
    tpu.vector_store %arg5[%c0_263, %c37, %c0_264, %c0_265], %540 {strides = array<i32>} : memref<1x72x16x128xbf16, #tpu.memory_space<vmem>>, vector<1x1x16x128xbf16>,
    %c2_i32_266 = arith.constant 2 : i32
    %541 = tpu.dynamic_rotate %224 by %c2_i32_266 dim 0 : vector<32x128xf32>, i32 -> vector<32x128xf32>
    %542 = vector.extract_strided_slice %541 {offsets = [8, 0], sizes = [16, 128], strides = [1, 1]} : vector<32x128xf32> to vector<16x128xf32>
    %543 = arith.mulf %542, %282 : vector<16x128xf32>
    %544 = arith.truncf %543 : vector<16x128xf32> to vector<16x128xbf16>
    %c0_267 = arith.constant 0 : index
    %c38 = arith.constant 38 : index
    %c0_268 = arith.constant 0 : index
    %c0_269 = arith.constant 0 : index
    %545 = vector.load %arg5[%c0_267, %c38, %c0_268, %c0_269] : memref<1x72x16x128xbf16, #tpu.memory_space<vmem>>, vector<1x1x16x128xbf16>
    %546 = vector.shape_cast %545 : vector<1x1x16x128xbf16> to vector<16x128xbf16>
    %547 = vector.shape_cast %544 : vector<16x128xbf16> to vector<1x1x16x128xbf16>
    tpu.vector_store %arg5[%c0_267, %c38, %c0_268, %c0_269], %547 {strides = array<i32>} : memref<1x72x16x128xbf16, #tpu.memory_space<vmem>>, vector<1x1x16x128xbf16>,
    %c2_i32_270 = arith.constant 2 : i32
    %548 = tpu.dynamic_rotate %247 by %c2_i32_270 dim 0 : vector<32x128xf32>, i32 -> vector<32x128xf32>
    %549 = vector.extract_strided_slice %548 {offsets = [8, 0], sizes = [16, 128], strides = [1, 1]} : vector<32x128xf32> to vector<16x128xf32>
    %550 = arith.mulf %549, %282 : vector<16x128xf32>
    %551 = arith.truncf %550 : vector<16x128xf32> to vector<16x128xbf16>
    %c0_271 = arith.constant 0 : index
    %c39 = arith.constant 39 : index
    %c0_272 = arith.constant 0 : index
    %c0_273 = arith.constant 0 : index
    %552 = vector.load %arg5[%c0_271, %c39, %c0_272, %c0_273] : memref<1x72x16x128xbf16, #tpu.memory_space<vmem>>, vector<1x1x16x128xbf16>
    %553 = vector.shape_cast %552 : vector<1x1x16x128xbf16> to vector<16x128xbf16>
    %554 = vector.shape_cast %551 : vector<16x128xbf16> to vector<1x1x16x128xbf16>
    tpu.vector_store %arg5[%c0_271, %c39, %c0_272, %c0_273], %554 {strides = array<i32>} : memref<1x72x16x128xbf16, #tpu.memory_space<vmem>>, vector<1x1x16x128xbf16>,
    %c123_i32_274 = arith.constant 123 : i32
    %555 = tpu.dynamic_rotate %92 by %c123_i32_274 dim 1 : vector<32x128xf32>, i32 -> vector<32x128xf32>
    %556 = vector.extract_strided_slice %555 {offsets = [8, 0], sizes = [16, 128], strides = [1, 1]} : vector<32x128xf32> to vector<16x128xf32>
    %557 = arith.mulf %556, %282 : vector<16x128xf32>
    %558 = arith.truncf %557 : vector<16x128xf32> to vector<16x128xbf16>
    %c0_275 = arith.constant 0 : index
    %c40 = arith.constant 40 : index
    %c0_276 = arith.constant 0 : index
    %c0_277 = arith.constant 0 : index
    %559 = vector.load %arg5[%c0_275, %c40, %c0_276, %c0_277] : memref<1x72x16x128xbf16, #tpu.memory_space<vmem>>, vector<1x1x16x128xbf16>
    %560 = vector.shape_cast %559 : vector<1x1x16x128xbf16> to vector<16x128xbf16>
    %561 = vector.shape_cast %558 : vector<16x128xbf16> to vector<1x1x16x128xbf16>
    tpu.vector_store %arg5[%c0_275, %c40, %c0_276, %c0_277], %561 {strides = array<i32>} : memref<1x72x16x128xbf16, #tpu.memory_space<vmem>>, vector<1x1x16x128xbf16>,
    %c123_i32_278 = arith.constant 123 : i32
    %562 = tpu.dynamic_rotate %114 by %c123_i32_278 dim 1 : vector<32x128xf32>, i32 -> vector<32x128xf32>
    %563 = vector.extract_strided_slice %562 {offsets = [8, 0], sizes = [16, 128], strides = [1, 1]} : vector<32x128xf32> to vector<16x128xf32>
    %564 = arith.mulf %563, %282 : vector<16x128xf32>
    %565 = arith.truncf %564 : vector<16x128xf32> to vector<16x128xbf16>
    %c0_279 = arith.constant 0 : index
    %c41 = arith.constant 41 : index
    %c0_280 = arith.constant 0 : index
    %c0_281 = arith.constant 0 : index
    %566 = vector.load %arg5[%c0_279, %c41, %c0_280, %c0_281] : memref<1x72x16x128xbf16, #tpu.memory_space<vmem>>, vector<1x1x16x128xbf16>
    %567 = vector.shape_cast %566 : vector<1x1x16x128xbf16> to vector<16x128xbf16>
    %568 = vector.shape_cast %565 : vector<16x128xbf16> to vector<1x1x16x128xbf16>
    tpu.vector_store %arg5[%c0_279, %c41, %c0_280, %c0_281], %568 {strides = array<i32>} : memref<1x72x16x128xbf16, #tpu.memory_space<vmem>>, vector<1x1x16x128xbf16>,
    %c123_i32_282 = arith.constant 123 : i32
    %569 = tpu.dynamic_rotate %137 by %c123_i32_282 dim 1 : vector<32x128xf32>, i32 -> vector<32x128xf32>
    %570 = vector.extract_strided_slice %569 {offsets = [8, 0], sizes = [16, 128], strides = [1, 1]} : vector<32x128xf32> to vector<16x128xf32>
    %571 = arith.mulf %570, %282 : vector<16x128xf32>
    %572 = arith.truncf %571 : vector<16x128xf32> to vector<16x128xbf16>
    %c0_283 = arith.constant 0 : index
    %c42 = arith.constant 42 : index
    %c0_284 = arith.constant 0 : index
    %c0_285 = arith.constant 0 : index
    %573 = vector.load %arg5[%c0_283, %c42, %c0_284, %c0_285] : memref<1x72x16x128xbf16, #tpu.memory_space<vmem>>, vector<1x1x16x128xbf16>
    %574 = vector.shape_cast %573 : vector<1x1x16x128xbf16> to vector<16x128xbf16>
    %575 = vector.shape_cast %572 : vector<16x128xbf16> to vector<1x1x16x128xbf16>
    tpu.vector_store %arg5[%c0_283, %c42, %c0_284, %c0_285], %575 {strides = array<i32>} : memref<1x72x16x128xbf16, #tpu.memory_space<vmem>>, vector<1x1x16x128xbf16>,
    %c123_i32_286 = arith.constant 123 : i32
    %576 = tpu.dynamic_rotate %160 by %c123_i32_286 dim 1 : vector<32x128xf32>, i32 -> vector<32x128xf32>
    %577 = vector.extract_strided_slice %576 {offsets = [8, 0], sizes = [16, 128], strides = [1, 1]} : vector<32x128xf32> to vector<16x128xf32>
    %578 = arith.mulf %577, %282 : vector<16x128xf32>
    %579 = arith.truncf %578 : vector<16x128xf32> to vector<16x128xbf16>
    %c0_287 = arith.constant 0 : index
    %c43 = arith.constant 43 : index
    %c0_288 = arith.constant 0 : index
    %c0_289 = arith.constant 0 : index
    %580 = vector.load %arg5[%c0_287, %c43, %c0_288, %c0_289] : memref<1x72x16x128xbf16, #tpu.memory_space<vmem>>, vector<1x1x16x128xbf16>
    %581 = vector.shape_cast %580 : vector<1x1x16x128xbf16> to vector<16x128xbf16>
    %582 = vector.shape_cast %579 : vector<16x128xbf16> to vector<1x1x16x128xbf16>
    tpu.vector_store %arg5[%c0_287, %c43, %c0_288, %c0_289], %582 {strides = array<i32>} : memref<1x72x16x128xbf16, #tpu.memory_space<vmem>>, vector<1x1x16x128xbf16>,
    %c123_i32_290 = arith.constant 123 : i32
    %583 = tpu.dynamic_rotate %183 by %c123_i32_290 dim 1 : vector<32x128xf32>, i32 -> vector<32x128xf32>
    %584 = vector.extract_strided_slice %583 {offsets = [8, 0], sizes = [16, 128], strides = [1, 1]} : vector<32x128xf32> to vector<16x128xf32>
    %585 = arith.mulf %584, %282 : vector<16x128xf32>
    %586 = arith.truncf %585 : vector<16x128xf32> to vector<16x128xbf16>
    %c0_291 = arith.constant 0 : index
    %c44 = arith.constant 44 : index
    %c0_292 = arith.constant 0 : index
    %c0_293 = arith.constant 0 : index
    %587 = vector.load %arg5[%c0_291, %c44, %c0_292, %c0_293] : memref<1x72x16x128xbf16, #tpu.memory_space<vmem>>, vector<1x1x16x128xbf16>
    %588 = vector.shape_cast %587 : vector<1x1x16x128xbf16> to vector<16x128xbf16>
    %589 = vector.shape_cast %586 : vector<16x128xbf16> to vector<1x1x16x128xbf16>
    tpu.vector_store %arg5[%c0_291, %c44, %c0_292, %c0_293], %589 {strides = array<i32>} : memref<1x72x16x128xbf16, #tpu.memory_space<vmem>>, vector<1x1x16x128xbf16>,
    %c123_i32_294 = arith.constant 123 : i32
    %590 = tpu.dynamic_rotate %206 by %c123_i32_294 dim 1 : vector<32x128xf32>, i32 -> vector<32x128xf32>
    %591 = vector.extract_strided_slice %590 {offsets = [8, 0], sizes = [16, 128], strides = [1, 1]} : vector<32x128xf32> to vector<16x128xf32>
    %592 = arith.mulf %591, %282 : vector<16x128xf32>
    %593 = arith.truncf %592 : vector<16x128xf32> to vector<16x128xbf16>
    %c0_295 = arith.constant 0 : index
    %c45 = arith.constant 45 : index
    %c0_296 = arith.constant 0 : index
    %c0_297 = arith.constant 0 : index
    %594 = vector.load %arg5[%c0_295, %c45, %c0_296, %c0_297] : memref<1x72x16x128xbf16, #tpu.memory_space<vmem>>, vector<1x1x16x128xbf16>
    %595 = vector.shape_cast %594 : vector<1x1x16x128xbf16> to vector<16x128xbf16>
    %596 = vector.shape_cast %593 : vector<16x128xbf16> to vector<1x1x16x128xbf16>
    tpu.vector_store %arg5[%c0_295, %c45, %c0_296, %c0_297], %596 {strides = array<i32>} : memref<1x72x16x128xbf16, #tpu.memory_space<vmem>>, vector<1x1x16x128xbf16>,
    %c123_i32_298 = arith.constant 123 : i32
    %597 = tpu.dynamic_rotate %229 by %c123_i32_298 dim 1 : vector<32x128xf32>, i32 -> vector<32x128xf32>
    %598 = vector.extract_strided_slice %597 {offsets = [8, 0], sizes = [16, 128], strides = [1, 1]} : vector<32x128xf32> to vector<16x128xf32>
    %599 = arith.mulf %598, %282 : vector<16x128xf32>
    %600 = arith.truncf %599 : vector<16x128xf32> to vector<16x128xbf16>
    %c0_299 = arith.constant 0 : index
    %c46 = arith.constant 46 : index
    %c0_300 = arith.constant 0 : index
    %c0_301 = arith.constant 0 : index
    %601 = vector.load %arg5[%c0_299, %c46, %c0_300, %c0_301] : memref<1x72x16x128xbf16, #tpu.memory_space<vmem>>, vector<1x1x16x128xbf16>
    %602 = vector.shape_cast %601 : vector<1x1x16x128xbf16> to vector<16x128xbf16>
    %603 = vector.shape_cast %600 : vector<16x128xbf16> to vector<1x1x16x128xbf16>
    tpu.vector_store %arg5[%c0_299, %c46, %c0_300, %c0_301], %603 {strides = array<i32>} : memref<1x72x16x128xbf16, #tpu.memory_space<vmem>>, vector<1x1x16x128xbf16>,
    %c123_i32_302 = arith.constant 123 : i32
    %604 = tpu.dynamic_rotate %252 by %c123_i32_302 dim 1 : vector<32x128xf32>, i32 -> vector<32x128xf32>
    %605 = vector.extract_strided_slice %604 {offsets = [8, 0], sizes = [16, 128], strides = [1, 1]} : vector<32x128xf32> to vector<16x128xf32>
    %606 = arith.mulf %605, %282 : vector<16x128xf32>
    %607 = arith.truncf %606 : vector<16x128xf32> to vector<16x128xbf16>
    %c0_303 = arith.constant 0 : index
    %c47 = arith.constant 47 : index
    %c0_304 = arith.constant 0 : index
    %c0_305 = arith.constant 0 : index
    %608 = vector.load %arg5[%c0_303, %c47, %c0_304, %c0_305] : memref<1x72x16x128xbf16, #tpu.memory_space<vmem>>, vector<1x1x16x128xbf16>
    %609 = vector.shape_cast %608 : vector<1x1x16x128xbf16> to vector<16x128xbf16>
    %610 = vector.shape_cast %607 : vector<16x128xbf16> to vector<1x1x16x128xbf16>
    tpu.vector_store %arg5[%c0_303, %c47, %c0_304, %c0_305], %610 {strides = array<i32>} : memref<1x72x16x128xbf16, #tpu.memory_space<vmem>>, vector<1x1x16x128xbf16>,
    %c27_i32_306 = arith.constant 27 : i32
    %611 = tpu.dynamic_rotate %92 by %c27_i32_306 dim 0 : vector<32x128xf32>, i32 -> vector<32x128xf32>
    %612 = vector.extract_strided_slice %611 {offsets = [8, 0], sizes = [16, 128], strides = [1, 1]} : vector<32x128xf32> to vector<16x128xf32>
    %613 = arith.mulf %612, %282 : vector<16x128xf32>
    %614 = arith.truncf %613 : vector<16x128xf32> to vector<16x128xbf16>
    %c0_307 = arith.constant 0 : index
    %c48 = arith.constant 48 : index
    %c0_308 = arith.constant 0 : index
    %c0_309 = arith.constant 0 : index
    %615 = vector.load %arg5[%c0_307, %c48, %c0_308, %c0_309] : memref<1x72x16x128xbf16, #tpu.memory_space<vmem>>, vector<1x1x16x128xbf16>
    %616 = vector.shape_cast %615 : vector<1x1x16x128xbf16> to vector<16x128xbf16>
    %617 = vector.shape_cast %614 : vector<16x128xbf16> to vector<1x1x16x128xbf16>
    tpu.vector_store %arg5[%c0_307, %c48, %c0_308, %c0_309], %617 {strides = array<i32>} : memref<1x72x16x128xbf16, #tpu.memory_space<vmem>>, vector<1x1x16x128xbf16>,
    %c27_i32_310 = arith.constant 27 : i32
    %618 = tpu.dynamic_rotate %114 by %c27_i32_310 dim 0 : vector<32x128xf32>, i32 -> vector<32x128xf32>
    %619 = vector.extract_strided_slice %618 {offsets = [8, 0], sizes = [16, 128], strides = [1, 1]} : vector<32x128xf32> to vector<16x128xf32>
    %620 = arith.mulf %619, %282 : vector<16x128xf32>
    %621 = arith.truncf %620 : vector<16x128xf32> to vector<16x128xbf16>
    %c0_311 = arith.constant 0 : index
    %c49 = arith.constant 49 : index
    %c0_312 = arith.constant 0 : index
    %c0_313 = arith.constant 0 : index
    %622 = vector.load %arg5[%c0_311, %c49, %c0_312, %c0_313] : memref<1x72x16x128xbf16, #tpu.memory_space<vmem>>, vector<1x1x16x128xbf16>
    %623 = vector.shape_cast %622 : vector<1x1x16x128xbf16> to vector<16x128xbf16>
    %624 = vector.shape_cast %621 : vector<16x128xbf16> to vector<1x1x16x128xbf16>
    tpu.vector_store %arg5[%c0_311, %c49, %c0_312, %c0_313], %624 {strides = array<i32>} : memref<1x72x16x128xbf16, #tpu.memory_space<vmem>>, vector<1x1x16x128xbf16>,
    %c27_i32_314 = arith.constant 27 : i32
    %625 = tpu.dynamic_rotate %137 by %c27_i32_314 dim 0 : vector<32x128xf32>, i32 -> vector<32x128xf32>
    %626 = vector.extract_strided_slice %625 {offsets = [8, 0], sizes = [16, 128], strides = [1, 1]} : vector<32x128xf32> to vector<16x128xf32>
    %627 = arith.mulf %626, %282 : vector<16x128xf32>
    %628 = arith.truncf %627 : vector<16x128xf32> to vector<16x128xbf16>
    %c0_315 = arith.constant 0 : index
    %c50 = arith.constant 50 : index
    %c0_316 = arith.constant 0 : index
    %c0_317 = arith.constant 0 : index
    %629 = vector.load %arg5[%c0_315, %c50, %c0_316, %c0_317] : memref<1x72x16x128xbf16, #tpu.memory_space<vmem>>, vector<1x1x16x128xbf16>
    %630 = vector.shape_cast %629 : vector<1x1x16x128xbf16> to vector<16x128xbf16>
    %631 = vector.shape_cast %628 : vector<16x128xbf16> to vector<1x1x16x128xbf16>
    tpu.vector_store %arg5[%c0_315, %c50, %c0_316, %c0_317], %631 {strides = array<i32>} : memref<1x72x16x128xbf16, #tpu.memory_space<vmem>>, vector<1x1x16x128xbf16>,
    %c27_i32_318 = arith.constant 27 : i32
    %632 = tpu.dynamic_rotate %160 by %c27_i32_318 dim 0 : vector<32x128xf32>, i32 -> vector<32x128xf32>
    %633 = vector.extract_strided_slice %632 {offsets = [8, 0], sizes = [16, 128], strides = [1, 1]} : vector<32x128xf32> to vector<16x128xf32>
    %634 = arith.mulf %633, %282 : vector<16x128xf32>
    %635 = arith.truncf %634 : vector<16x128xf32> to vector<16x128xbf16>
    %c0_319 = arith.constant 0 : index
    %c51 = arith.constant 51 : index
    %c0_320 = arith.constant 0 : index
    %c0_321 = arith.constant 0 : index
    %636 = vector.load %arg5[%c0_319, %c51, %c0_320, %c0_321] : memref<1x72x16x128xbf16, #tpu.memory_space<vmem>>, vector<1x1x16x128xbf16>
    %637 = vector.shape_cast %636 : vector<1x1x16x128xbf16> to vector<16x128xbf16>
    %638 = vector.shape_cast %635 : vector<16x128xbf16> to vector<1x1x16x128xbf16>
    tpu.vector_store %arg5[%c0_319, %c51, %c0_320, %c0_321], %638 {strides = array<i32>} : memref<1x72x16x128xbf16, #tpu.memory_space<vmem>>, vector<1x1x16x128xbf16>,
    %c27_i32_322 = arith.constant 27 : i32
    %639 = tpu.dynamic_rotate %183 by %c27_i32_322 dim 0 : vector<32x128xf32>, i32 -> vector<32x128xf32>
    %640 = vector.extract_strided_slice %639 {offsets = [8, 0], sizes = [16, 128], strides = [1, 1]} : vector<32x128xf32> to vector<16x128xf32>
    %641 = arith.mulf %640, %282 : vector<16x128xf32>
    %642 = arith.truncf %641 : vector<16x128xf32> to vector<16x128xbf16>
    %c0_323 = arith.constant 0 : index
    %c52 = arith.constant 52 : index
    %c0_324 = arith.constant 0 : index
    %c0_325 = arith.constant 0 : index
    %643 = vector.load %arg5[%c0_323, %c52, %c0_324, %c0_325] : memref<1x72x16x128xbf16, #tpu.memory_space<vmem>>, vector<1x1x16x128xbf16>
    %644 = vector.shape_cast %643 : vector<1x1x16x128xbf16> to vector<16x128xbf16>
    %645 = vector.shape_cast %642 : vector<16x128xbf16> to vector<1x1x16x128xbf16>
    tpu.vector_store %arg5[%c0_323, %c52, %c0_324, %c0_325], %645 {strides = array<i32>} : memref<1x72x16x128xbf16, #tpu.memory_space<vmem>>, vector<1x1x16x128xbf16>,
    %c27_i32_326 = arith.constant 27 : i32
    %646 = tpu.dynamic_rotate %206 by %c27_i32_326 dim 0 : vector<32x128xf32>, i32 -> vector<32x128xf32>
    %647 = vector.extract_strided_slice %646 {offsets = [8, 0], sizes = [16, 128], strides = [1, 1]} : vector<32x128xf32> to vector<16x128xf32>
    %648 = arith.mulf %647, %282 : vector<16x128xf32>
    %649 = arith.truncf %648 : vector<16x128xf32> to vector<16x128xbf16>
    %c0_327 = arith.constant 0 : index
    %c53 = arith.constant 53 : index
    %c0_328 = arith.constant 0 : index
    %c0_329 = arith.constant 0 : index
    %650 = vector.load %arg5[%c0_327, %c53, %c0_328, %c0_329] : memref<1x72x16x128xbf16, #tpu.memory_space<vmem>>, vector<1x1x16x128xbf16>
    %651 = vector.shape_cast %650 : vector<1x1x16x128xbf16> to vector<16x128xbf16>
    %652 = vector.shape_cast %649 : vector<16x128xbf16> to vector<1x1x16x128xbf16>
    tpu.vector_store %arg5[%c0_327, %c53, %c0_328, %c0_329], %652 {strides = array<i32>} : memref<1x72x16x128xbf16, #tpu.memory_space<vmem>>, vector<1x1x16x128xbf16>,
    %c27_i32_330 = arith.constant 27 : i32
    %653 = tpu.dynamic_rotate %229 by %c27_i32_330 dim 0 : vector<32x128xf32>, i32 -> vector<32x128xf32>
    %654 = vector.extract_strided_slice %653 {offsets = [8, 0], sizes = [16, 128], strides = [1, 1]} : vector<32x128xf32> to vector<16x128xf32>
    %655 = arith.mulf %654, %282 : vector<16x128xf32>
    %656 = arith.truncf %655 : vector<16x128xf32> to vector<16x128xbf16>
    %c0_331 = arith.constant 0 : index
    %c54 = arith.constant 54 : index
    %c0_332 = arith.constant 0 : index
    %c0_333 = arith.constant 0 : index
    %657 = vector.load %arg5[%c0_331, %c54, %c0_332, %c0_333] : memref<1x72x16x128xbf16, #tpu.memory_space<vmem>>, vector<1x1x16x128xbf16>
    %658 = vector.shape_cast %657 : vector<1x1x16x128xbf16> to vector<16x128xbf16>
    %659 = vector.shape_cast %656 : vector<16x128xbf16> to vector<1x1x16x128xbf16>
    tpu.vector_store %arg5[%c0_331, %c54, %c0_332, %c0_333], %659 {strides = array<i32>} : memref<1x72x16x128xbf16, #tpu.memory_space<vmem>>, vector<1x1x16x128xbf16>,
    %c27_i32_334 = arith.constant 27 : i32
    %660 = tpu.dynamic_rotate %252 by %c27_i32_334 dim 0 : vector<32x128xf32>, i32 -> vector<32x128xf32>
    %661 = vector.extract_strided_slice %660 {offsets = [8, 0], sizes = [16, 128], strides = [1, 1]} : vector<32x128xf32> to vector<16x128xf32>
    %662 = arith.mulf %661, %282 : vector<16x128xf32>
    %663 = arith.truncf %662 : vector<16x128xf32> to vector<16x128xbf16>
    %c0_335 = arith.constant 0 : index
    %c55 = arith.constant 55 : index
    %c0_336 = arith.constant 0 : index
    %c0_337 = arith.constant 0 : index
    %664 = vector.load %arg5[%c0_335, %c55, %c0_336, %c0_337] : memref<1x72x16x128xbf16, #tpu.memory_space<vmem>>, vector<1x1x16x128xbf16>
    %665 = vector.shape_cast %664 : vector<1x1x16x128xbf16> to vector<16x128xbf16>
    %666 = vector.shape_cast %663 : vector<16x128xbf16> to vector<1x1x16x128xbf16>
    tpu.vector_store %arg5[%c0_335, %c55, %c0_336, %c0_337], %666 {strides = array<i32>} : memref<1x72x16x128xbf16, #tpu.memory_space<vmem>>, vector<1x1x16x128xbf16>,
    %c5_i32_338 = arith.constant 5 : i32
    %667 = tpu.dynamic_rotate %92 by %c5_i32_338 dim 1 : vector<32x128xf32>, i32 -> vector<32x128xf32>
    %668 = vector.extract_strided_slice %667 {offsets = [8, 0], sizes = [16, 128], strides = [1, 1]} : vector<32x128xf32> to vector<16x128xf32>
    %669 = arith.mulf %668, %282 : vector<16x128xf32>
    %670 = arith.truncf %669 : vector<16x128xf32> to vector<16x128xbf16>
    %c0_339 = arith.constant 0 : index
    %c56 = arith.constant 56 : index
    %c0_340 = arith.constant 0 : index
    %c0_341 = arith.constant 0 : index
    %671 = vector.load %arg5[%c0_339, %c56, %c0_340, %c0_341] : memref<1x72x16x128xbf16, #tpu.memory_space<vmem>>, vector<1x1x16x128xbf16>
    %672 = vector.shape_cast %671 : vector<1x1x16x128xbf16> to vector<16x128xbf16>
    %673 = vector.shape_cast %670 : vector<16x128xbf16> to vector<1x1x16x128xbf16>
    tpu.vector_store %arg5[%c0_339, %c56, %c0_340, %c0_341], %673 {strides = array<i32>} : memref<1x72x16x128xbf16, #tpu.memory_space<vmem>>, vector<1x1x16x128xbf16>,
    %c5_i32_342 = arith.constant 5 : i32
    %674 = tpu.dynamic_rotate %114 by %c5_i32_342 dim 1 : vector<32x128xf32>, i32 -> vector<32x128xf32>
    %675 = vector.extract_strided_slice %674 {offsets = [8, 0], sizes = [16, 128], strides = [1, 1]} : vector<32x128xf32> to vector<16x128xf32>
    %676 = arith.mulf %675, %282 : vector<16x128xf32>
    %677 = arith.truncf %676 : vector<16x128xf32> to vector<16x128xbf16>
    %c0_343 = arith.constant 0 : index
    %c57 = arith.constant 57 : index
    %c0_344 = arith.constant 0 : index
    %c0_345 = arith.constant 0 : index
    %678 = vector.load %arg5[%c0_343, %c57, %c0_344, %c0_345] : memref<1x72x16x128xbf16, #tpu.memory_space<vmem>>, vector<1x1x16x128xbf16>
    %679 = vector.shape_cast %678 : vector<1x1x16x128xbf16> to vector<16x128xbf16>
    %680 = vector.shape_cast %677 : vector<16x128xbf16> to vector<1x1x16x128xbf16>
    tpu.vector_store %arg5[%c0_343, %c57, %c0_344, %c0_345], %680 {strides = array<i32>} : memref<1x72x16x128xbf16, #tpu.memory_space<vmem>>, vector<1x1x16x128xbf16>,
    %c5_i32_346 = arith.constant 5 : i32
    %681 = tpu.dynamic_rotate %137 by %c5_i32_346 dim 1 : vector<32x128xf32>, i32 -> vector<32x128xf32>
    %682 = vector.extract_strided_slice %681 {offsets = [8, 0], sizes = [16, 128], strides = [1, 1]} : vector<32x128xf32> to vector<16x128xf32>
    %683 = arith.mulf %682, %282 : vector<16x128xf32>
    %684 = arith.truncf %683 : vector<16x128xf32> to vector<16x128xbf16>
    %c0_347 = arith.constant 0 : index
    %c58 = arith.constant 58 : index
    %c0_348 = arith.constant 0 : index
    %c0_349 = arith.constant 0 : index
    %685 = vector.load %arg5[%c0_347, %c58, %c0_348, %c0_349] : memref<1x72x16x128xbf16, #tpu.memory_space<vmem>>, vector<1x1x16x128xbf16>
    %686 = vector.shape_cast %685 : vector<1x1x16x128xbf16> to vector<16x128xbf16>
    %687 = vector.shape_cast %684 : vector<16x128xbf16> to vector<1x1x16x128xbf16>
    tpu.vector_store %arg5[%c0_347, %c58, %c0_348, %c0_349], %687 {strides = array<i32>} : memref<1x72x16x128xbf16, #tpu.memory_space<vmem>>, vector<1x1x16x128xbf16>,
    %c5_i32_350 = arith.constant 5 : i32
    %688 = tpu.dynamic_rotate %160 by %c5_i32_350 dim 1 : vector<32x128xf32>, i32 -> vector<32x128xf32>
    %689 = vector.extract_strided_slice %688 {offsets = [8, 0], sizes = [16, 128], strides = [1, 1]} : vector<32x128xf32> to vector<16x128xf32>
    %690 = arith.mulf %689, %282 : vector<16x128xf32>
    %691 = arith.truncf %690 : vector<16x128xf32> to vector<16x128xbf16>
    %c0_351 = arith.constant 0 : index
    %c59 = arith.constant 59 : index
    %c0_352 = arith.constant 0 : index
    %c0_353 = arith.constant 0 : index
    %692 = vector.load %arg5[%c0_351, %c59, %c0_352, %c0_353] : memref<1x72x16x128xbf16, #tpu.memory_space<vmem>>, vector<1x1x16x128xbf16>
    %693 = vector.shape_cast %692 : vector<1x1x16x128xbf16> to vector<16x128xbf16>
    %694 = vector.shape_cast %691 : vector<16x128xbf16> to vector<1x1x16x128xbf16>
    tpu.vector_store %arg5[%c0_351, %c59, %c0_352, %c0_353], %694 {strides = array<i32>} : memref<1x72x16x128xbf16, #tpu.memory_space<vmem>>, vector<1x1x16x128xbf16>,
    %c5_i32_354 = arith.constant 5 : i32
    %695 = tpu.dynamic_rotate %183 by %c5_i32_354 dim 1 : vector<32x128xf32>, i32 -> vector<32x128xf32>
    %696 = vector.extract_strided_slice %695 {offsets = [8, 0], sizes = [16, 128], strides = [1, 1]} : vector<32x128xf32> to vector<16x128xf32>
    %697 = arith.mulf %696, %282 : vector<16x128xf32>
    %698 = arith.truncf %697 : vector<16x128xf32> to vector<16x128xbf16>
    %c0_355 = arith.constant 0 : index
    %c60 = arith.constant 60 : index
    %c0_356 = arith.constant 0 : index
    %c0_357 = arith.constant 0 : index
    %699 = vector.load %arg5[%c0_355, %c60, %c0_356, %c0_357] : memref<1x72x16x128xbf16, #tpu.memory_space<vmem>>, vector<1x1x16x128xbf16>
    %700 = vector.shape_cast %699 : vector<1x1x16x128xbf16> to vector<16x128xbf16>
    %701 = vector.shape_cast %698 : vector<16x128xbf16> to vector<1x1x16x128xbf16>
    tpu.vector_store %arg5[%c0_355, %c60, %c0_356, %c0_357], %701 {strides = array<i32>} : memref<1x72x16x128xbf16, #tpu.memory_space<vmem>>, vector<1x1x16x128xbf16>,
    %c5_i32_358 = arith.constant 5 : i32
    %702 = tpu.dynamic_rotate %206 by %c5_i32_358 dim 1 : vector<32x128xf32>, i32 -> vector<32x128xf32>
    %703 = vector.extract_strided_slice %702 {offsets = [8, 0], sizes = [16, 128], strides = [1, 1]} : vector<32x128xf32> to vector<16x128xf32>
    %704 = arith.mulf %703, %282 : vector<16x128xf32>
    %705 = arith.truncf %704 : vector<16x128xf32> to vector<16x128xbf16>
    %c0_359 = arith.constant 0 : index
    %c61 = arith.constant 61 : index
    %c0_360 = arith.constant 0 : index
    %c0_361 = arith.constant 0 : index
    %706 = vector.load %arg5[%c0_359, %c61, %c0_360, %c0_361] : memref<1x72x16x128xbf16, #tpu.memory_space<vmem>>, vector<1x1x16x128xbf16>
    %707 = vector.shape_cast %706 : vector<1x1x16x128xbf16> to vector<16x128xbf16>
    %708 = vector.shape_cast %705 : vector<16x128xbf16> to vector<1x1x16x128xbf16>
    tpu.vector_store %arg5[%c0_359, %c61, %c0_360, %c0_361], %708 {strides = array<i32>} : memref<1x72x16x128xbf16, #tpu.memory_space<vmem>>, vector<1x1x16x128xbf16>,
    %c5_i32_362 = arith.constant 5 : i32
    %709 = tpu.dynamic_rotate %229 by %c5_i32_362 dim 1 : vector<32x128xf32>, i32 -> vector<32x128xf32>
    %710 = vector.extract_strided_slice %709 {offsets = [8, 0], sizes = [16, 128], strides = [1, 1]} : vector<32x128xf32> to vector<16x128xf32>
    %711 = arith.mulf %710, %282 : vector<16x128xf32>
    %712 = arith.truncf %711 : vector<16x128xf32> to vector<16x128xbf16>
    %c0_363 = arith.constant 0 : index
    %c62 = arith.constant 62 : index
    %c0_364 = arith.constant 0 : index
    %c0_365 = arith.constant 0 : index
    %713 = vector.load %arg5[%c0_363, %c62, %c0_364, %c0_365] : memref<1x72x16x128xbf16, #tpu.memory_space<vmem>>, vector<1x1x16x128xbf16>
    %714 = vector.shape_cast %713 : vector<1x1x16x128xbf16> to vector<16x128xbf16>
    %715 = vector.shape_cast %712 : vector<16x128xbf16> to vector<1x1x16x128xbf16>
    tpu.vector_store %arg5[%c0_363, %c62, %c0_364, %c0_365], %715 {strides = array<i32>} : memref<1x72x16x128xbf16, #tpu.memory_space<vmem>>, vector<1x1x16x128xbf16>,
    %c5_i32_366 = arith.constant 5 : i32
    %716 = tpu.dynamic_rotate %252 by %c5_i32_366 dim 1 : vector<32x128xf32>, i32 -> vector<32x128xf32>
    %717 = vector.extract_strided_slice %716 {offsets = [8, 0], sizes = [16, 128], strides = [1, 1]} : vector<32x128xf32> to vector<16x128xf32>
    %718 = arith.mulf %717, %282 : vector<16x128xf32>
    %719 = arith.truncf %718 : vector<16x128xf32> to vector<16x128xbf16>
    %c0_367 = arith.constant 0 : index
    %c63 = arith.constant 63 : index
    %c0_368 = arith.constant 0 : index
    %c0_369 = arith.constant 0 : index
    %720 = vector.load %arg5[%c0_367, %c63, %c0_368, %c0_369] : memref<1x72x16x128xbf16, #tpu.memory_space<vmem>>, vector<1x1x16x128xbf16>
    %721 = vector.shape_cast %720 : vector<1x1x16x128xbf16> to vector<16x128xbf16>
    %722 = vector.shape_cast %719 : vector<16x128xbf16> to vector<1x1x16x128xbf16>
    tpu.vector_store %arg5[%c0_367, %c63, %c0_368, %c0_369], %722 {strides = array<i32>} : memref<1x72x16x128xbf16, #tpu.memory_space<vmem>>, vector<1x1x16x128xbf16>,
    %c5_i32_370 = arith.constant 5 : i32
    %723 = tpu.dynamic_rotate %92 by %c5_i32_370 dim 0 : vector<32x128xf32>, i32 -> vector<32x128xf32>
    %724 = vector.extract_strided_slice %723 {offsets = [8, 0], sizes = [16, 128], strides = [1, 1]} : vector<32x128xf32> to vector<16x128xf32>
    %725 = arith.mulf %724, %282 : vector<16x128xf32>
    %726 = arith.truncf %725 : vector<16x128xf32> to vector<16x128xbf16>
    %c0_371 = arith.constant 0 : index
    %c64 = arith.constant 64 : index
    %c0_372 = arith.constant 0 : index
    %c0_373 = arith.constant 0 : index
    %727 = vector.load %arg5[%c0_371, %c64, %c0_372, %c0_373] : memref<1x72x16x128xbf16, #tpu.memory_space<vmem>>, vector<1x1x16x128xbf16>
    %728 = vector.shape_cast %727 : vector<1x1x16x128xbf16> to vector<16x128xbf16>
    %729 = vector.shape_cast %726 : vector<16x128xbf16> to vector<1x1x16x128xbf16>
    tpu.vector_store %arg5[%c0_371, %c64, %c0_372, %c0_373], %729 {strides = array<i32>} : memref<1x72x16x128xbf16, #tpu.memory_space<vmem>>, vector<1x1x16x128xbf16>,
    %c5_i32_374 = arith.constant 5 : i32
    %730 = tpu.dynamic_rotate %114 by %c5_i32_374 dim 0 : vector<32x128xf32>, i32 -> vector<32x128xf32>
    %731 = vector.extract_strided_slice %730 {offsets = [8, 0], sizes = [16, 128], strides = [1, 1]} : vector<32x128xf32> to vector<16x128xf32>
    %732 = arith.mulf %731, %282 : vector<16x128xf32>
    %733 = arith.truncf %732 : vector<16x128xf32> to vector<16x128xbf16>
    %c0_375 = arith.constant 0 : index
    %c65 = arith.constant 65 : index
    %c0_376 = arith.constant 0 : index
    %c0_377 = arith.constant 0 : index
    %734 = vector.load %arg5[%c0_375, %c65, %c0_376, %c0_377] : memref<1x72x16x128xbf16, #tpu.memory_space<vmem>>, vector<1x1x16x128xbf16>
    %735 = vector.shape_cast %734 : vector<1x1x16x128xbf16> to vector<16x128xbf16>
    %736 = vector.shape_cast %733 : vector<16x128xbf16> to vector<1x1x16x128xbf16>
    tpu.vector_store %arg5[%c0_375, %c65, %c0_376, %c0_377], %736 {strides = array<i32>} : memref<1x72x16x128xbf16, #tpu.memory_space<vmem>>, vector<1x1x16x128xbf16>,
    %c5_i32_378 = arith.constant 5 : i32
    %737 = tpu.dynamic_rotate %137 by %c5_i32_378 dim 0 : vector<32x128xf32>, i32 -> vector<32x128xf32>
    %738 = vector.extract_strided_slice %737 {offsets = [8, 0], sizes = [16, 128], strides = [1, 1]} : vector<32x128xf32> to vector<16x128xf32>
    %739 = arith.mulf %738, %282 : vector<16x128xf32>
    %740 = arith.truncf %739 : vector<16x128xf32> to vector<16x128xbf16>
    %c0_379 = arith.constant 0 : index
    %c66 = arith.constant 66 : index
    %c0_380 = arith.constant 0 : index
    %c0_381 = arith.constant 0 : index
    %741 = vector.load %arg5[%c0_379, %c66, %c0_380, %c0_381] : memref<1x72x16x128xbf16, #tpu.memory_space<vmem>>, vector<1x1x16x128xbf16>
    %742 = vector.shape_cast %741 : vector<1x1x16x128xbf16> to vector<16x128xbf16>
    %743 = vector.shape_cast %740 : vector<16x128xbf16> to vector<1x1x16x128xbf16>
    tpu.vector_store %arg5[%c0_379, %c66, %c0_380, %c0_381], %743 {strides = array<i32>} : memref<1x72x16x128xbf16, #tpu.memory_space<vmem>>, vector<1x1x16x128xbf16>,
    %c5_i32_382 = arith.constant 5 : i32
    %744 = tpu.dynamic_rotate %160 by %c5_i32_382 dim 0 : vector<32x128xf32>, i32 -> vector<32x128xf32>
    %745 = vector.extract_strided_slice %744 {offsets = [8, 0], sizes = [16, 128], strides = [1, 1]} : vector<32x128xf32> to vector<16x128xf32>
    %746 = arith.mulf %745, %282 : vector<16x128xf32>
    %747 = arith.truncf %746 : vector<16x128xf32> to vector<16x128xbf16>
    %c0_383 = arith.constant 0 : index
    %c67 = arith.constant 67 : index
    %c0_384 = arith.constant 0 : index
    %c0_385 = arith.constant 0 : index
    %748 = vector.load %arg5[%c0_383, %c67, %c0_384, %c0_385] : memref<1x72x16x128xbf16, #tpu.memory_space<vmem>>, vector<1x1x16x128xbf16>
    %749 = vector.shape_cast %748 : vector<1x1x16x128xbf16> to vector<16x128xbf16>
    %750 = vector.shape_cast %747 : vector<16x128xbf16> to vector<1x1x16x128xbf16>
    tpu.vector_store %arg5[%c0_383, %c67, %c0_384, %c0_385], %750 {strides = array<i32>} : memref<1x72x16x128xbf16, #tpu.memory_space<vmem>>, vector<1x1x16x128xbf16>,
    %c5_i32_386 = arith.constant 5 : i32
    %751 = tpu.dynamic_rotate %183 by %c5_i32_386 dim 0 : vector<32x128xf32>, i32 -> vector<32x128xf32>
    %752 = vector.extract_strided_slice %751 {offsets = [8, 0], sizes = [16, 128], strides = [1, 1]} : vector<32x128xf32> to vector<16x128xf32>
    %753 = arith.mulf %752, %282 : vector<16x128xf32>
    %754 = arith.truncf %753 : vector<16x128xf32> to vector<16x128xbf16>
    %c0_387 = arith.constant 0 : index
    %c68 = arith.constant 68 : index
    %c0_388 = arith.constant 0 : index
    %c0_389 = arith.constant 0 : index
    %755 = vector.load %arg5[%c0_387, %c68, %c0_388, %c0_389] : memref<1x72x16x128xbf16, #tpu.memory_space<vmem>>, vector<1x1x16x128xbf16>
    %756 = vector.shape_cast %755 : vector<1x1x16x128xbf16> to vector<16x128xbf16>
    %757 = vector.shape_cast %754 : vector<16x128xbf16> to vector<1x1x16x128xbf16>
    tpu.vector_store %arg5[%c0_387, %c68, %c0_388, %c0_389], %757 {strides = array<i32>} : memref<1x72x16x128xbf16, #tpu.memory_space<vmem>>, vector<1x1x16x128xbf16>,
    %c5_i32_390 = arith.constant 5 : i32
    %758 = tpu.dynamic_rotate %206 by %c5_i32_390 dim 0 : vector<32x128xf32>, i32 -> vector<32x128xf32>
    %759 = vector.extract_strided_slice %758 {offsets = [8, 0], sizes = [16, 128], strides = [1, 1]} : vector<32x128xf32> to vector<16x128xf32>
    %760 = arith.mulf %759, %282 : vector<16x128xf32>
    %761 = arith.truncf %760 : vector<16x128xf32> to vector<16x128xbf16>
    %c0_391 = arith.constant 0 : index
    %c69 = arith.constant 69 : index
    %c0_392 = arith.constant 0 : index
    %c0_393 = arith.constant 0 : index
    %762 = vector.load %arg5[%c0_391, %c69, %c0_392, %c0_393] : memref<1x72x16x128xbf16, #tpu.memory_space<vmem>>, vector<1x1x16x128xbf16>
    %763 = vector.shape_cast %762 : vector<1x1x16x128xbf16> to vector<16x128xbf16>
    %764 = vector.shape_cast %761 : vector<16x128xbf16> to vector<1x1x16x128xbf16>
    tpu.vector_store %arg5[%c0_391, %c69, %c0_392, %c0_393], %764 {strides = array<i32>} : memref<1x72x16x128xbf16, #tpu.memory_space<vmem>>, vector<1x1x16x128xbf16>,
    %c5_i32_394 = arith.constant 5 : i32
    %765 = tpu.dynamic_rotate %229 by %c5_i32_394 dim 0 : vector<32x128xf32>, i32 -> vector<32x128xf32>
    %766 = vector.extract_strided_slice %765 {offsets = [8, 0], sizes = [16, 128], strides = [1, 1]} : vector<32x128xf32> to vector<16x128xf32>
    %767 = arith.mulf %766, %282 : vector<16x128xf32>
    %768 = arith.truncf %767 : vector<16x128xf32> to vector<16x128xbf16>
    %c0_395 = arith.constant 0 : index
    %c70 = arith.constant 70 : index
    %c0_396 = arith.constant 0 : index
    %c0_397 = arith.constant 0 : index
    %769 = vector.load %arg5[%c0_395, %c70, %c0_396, %c0_397] : memref<1x72x16x128xbf16, #tpu.memory_space<vmem>>, vector<1x1x16x128xbf16>
    %770 = vector.shape_cast %769 : vector<1x1x16x128xbf16> to vector<16x128xbf16>
    %771 = vector.shape_cast %768 : vector<16x128xbf16> to vector<1x1x16x128xbf16>
    tpu.vector_store %arg5[%c0_395, %c70, %c0_396, %c0_397], %771 {strides = array<i32>} : memref<1x72x16x128xbf16, #tpu.memory_space<vmem>>, vector<1x1x16x128xbf16>,
    %c5_i32_398 = arith.constant 5 : i32
    %772 = tpu.dynamic_rotate %252 by %c5_i32_398 dim 0 : vector<32x128xf32>, i32 -> vector<32x128xf32>
    %773 = vector.extract_strided_slice %772 {offsets = [8, 0], sizes = [16, 128], strides = [1, 1]} : vector<32x128xf32> to vector<16x128xf32>
    %774 = arith.mulf %773, %282 : vector<16x128xf32>
    %775 = arith.truncf %774 : vector<16x128xf32> to vector<16x128xbf16>
    %c0_399 = arith.constant 0 : index
    %c71 = arith.constant 71 : index
    %c0_400 = arith.constant 0 : index
    %c0_401 = arith.constant 0 : index
    %776 = vector.load %arg5[%c0_399, %c71, %c0_400, %c0_401] : memref<1x72x16x128xbf16, #tpu.memory_space<vmem>>, vector<1x1x16x128xbf16>
    %777 = vector.shape_cast %776 : vector<1x1x16x128xbf16> to vector<16x128xbf16>
    %778 = vector.shape_cast %775 : vector<16x128xbf16> to vector<1x1x16x128xbf16>
    tpu.vector_store %arg5[%c0_399, %c71, %c0_400, %c0_401], %778 {strides = array<i32>} : memref<1x72x16x128xbf16, #tpu.memory_space<vmem>>, vector<1x1x16x128xbf16>,
    return
  }
  func.func @transform_0(%arg0: i32, %arg1: i32) -> (i32, i32, i32, i32) {
    %c0_i32 = arith.constant 0 : i32
    %c0_i32_0 = arith.constant 0 : i32
    %c0_i32_1 = arith.constant 0 : i32
    %c0_i32_2 = arith.constant 0 : i32
    return %arg0, %c0_i32, %c0_i32_0, %c0_i32_1 : i32, i32, i32, i32
  }
  func.func @transform_1(%arg0: i32, %arg1: i32) -> (i32, i32, i32) {
    %c0_i32 = arith.constant 0 : i32
    %c0_i32_0 = arith.constant 0 : i32
    %c0_i32_1 = arith.constant 0 : i32
    %c0_i32_2 = arith.constant 0 : i32
    return %c0_i32, %c0_i32_0, %c0_i32_1 : i32, i32, i32
  }
  func.func @transform_2(%arg0: i32, %arg1: i32) -> (i32, i32, i32) {
    %c0_i32 = arith.constant 0 : i32
    %c0_i32_0 = arith.constant 0 : i32
    %c0_i32_1 = arith.constant 0 : i32
    %c0_i32_2 = arith.constant 0 : i32
    return %c0_i32, %c0_i32_0, %c0_i32_1 : i32, i32, i32
  }
  func.func @transform_3(%arg0: i32, %arg1: i32) -> (i32, i32, i32, i32) {
    %c0_i32 = arith.constant 0 : i32
    %c0_i32_0 = arith.constant 0 : i32
    %c0_i32_1 = arith.constant 0 : i32
    return %arg0, %c0_i32, %arg1, %c0_i32_0 : i32, i32, i32, i32
  }
}

</mosaic_0001>

<bundles_post_ra>
// kernel: daisy_forward.3
= control target key start
LH: loop header
LB: loop body
LE: loop exit
PB: predicated region body
PF: predicated region fallthrough
CT: control target
= control target key end

     0   :  { %s3880_s12 = smov 0   ;;  %s3882_s13 = smov 0   ;;  %s6461_s0 = inlined_call_operand.vmem [shape: f32[2,3,48,128], index: 0, kind: input, shape index: {}]   ;;  %s6462_s1 = inlined_call_operand.vmem [shape: bf16[3,32,48], index: 1, kind: input, shape index: {}]   ;;  %s6463_s2 = inlined_call_operand.vmem [shape: bf16[3,128,128], index: 2, kind: input, shape index: {}]   ;;  %s6464_s3 = inlined_call_operand.vmem [shape: bf16[2,72,16,128], index: 3, kind: output, shape index: {}]  }
   0x1   :  { %s3884_s14 = smov 0  }
   0x2 LB: > { %s25_s15 = sadd.s32 1, %s3848_s13  ;;  %p2926_p0 = scmp.ge.s32.totalorder %s3852_s14, 1  ;;  %s3852_s14 = sphi %s3884_s14, %s13_s14   ;;  %s3848_s13 = sphi %s3882_s13, %s6889_s13   ;;  %s3844_s12 = sphi %s3880_s12, %s6888_s12  }
   0x3   : > { %p27_p1 = scmp.ge.s32.totalorder %s25_s15, 2  ;;  %p151_p2 = scmp.lt.s32.totalorder %s3852_s14, 3 }
   0x5   : > { %s6891_s15 = smov (%p27_p1, %s25_s15), 0  ;;  %p152_p3 = pnand %p2926_p0, %p151_p2 }
   0x7   : > { %155 = sbr.rel (%p152_p3) target bundleno = 1240 (0x4d8), region = 32 }
   0xc   : > { %p179_p4 = scmp.lt.s32.totalorder %s3844_s12, 1  ;;  %v399_v0 = vlaneseq  ;;  %s3854_s20 = smov 1   ;;  %vm528_vm2 = vcmask 392192  }
   0xd   : > { %s3855_s21 = smov 127   ;;  %s3856_s11 = smov 2  }
   0xe   : > { %s6893_s12 = smov (!%p179_p4, %s3844_s12), 1  ;;  %v3912_v11 = vshrl.u32 %v399_v0, 7  ;;  %s3858_s4 = smov 5  }
   0xf   : > { %s3770_s16 = smul.u32 144, %s6893_s12  ;;  %s3859_s5 = smov 123  }
  0x10   : > { %6531 = vst [vmem:[#allocation2_spill] sm:$0xff] %v3912_v11  ;;  %vm401_vm0 = vcmp.lt.s32.totalorder %v3912_v11, 7  ;;  %vm414_vm1 = vcmp.lt.s32.totalorder %v3912_v11, 1 }
  0x11   : > { %s3904_s19 = scalar_lea.vmem %s6461_s0, %s3770_s16  ;;  %s3857_s16 = smov 126  }
  0x12   : > { %v201_v1 = vld [vmem:[%s3904_s19 + $0x20] sm:$0xff]  ;;  %v2933_v2 = vld [vmem:[%s3904_s19 + $0x50] sm:$0xff]  ;;  %v202_v7 = vld [vmem:[%s3904_s19 + $0x28] sm:$0xff] }
  0x13   : > { %v2939_v3 = vld [vmem:[%s3904_s19 + $0x80] sm:$0xff]  ;;  %v207_v4 = vmul.f32 58.395, %v201_v1  ;;  %v257_v5 = vmul.f32 57.12, %v2933_v2  ;;  %v2934_v9 = vld [vmem:[%s3904_s19 + $0x58] sm:$0xff] }
  0x14   : > { %v313_v6 = vmul.f32 57.375, %v2939_v3  ;;  %v208_v8 = vmul.f32 58.395, %v202_v7  ;;  %v2940_v10 = vld [vmem:[%s3904_s19 + $0x88] sm:$0xff]  ;;  %v200_v12 = vld [vmem:[%s3904_s19 + $0x18] sm:$0xff]  ;;  %v199_v53 = vld [vmem:[%s3904_s19 + $0x10] sm:$0xff] }
  0x15   : > { %v213_v13 = vadd.f32 123.675, %v207_v4  ;;  %v263_v14 = vadd.f32 116.28, %v257_v5  ;;  %v258_v17 = vmul.f32 57.12, %v2934_v9 }
  0x16   : > { %v319_v15 = vadd.f32 103.53, %v313_v6  ;;  %v214_v16 = vadd.f32 123.675, %v208_v8  ;;  %v314_v18 = vmul.f32 57.375, %v2940_v10  ;;  %v2932_v19 = vld [vmem:[%s3904_s19 + $0x48] sm:$0xff] }
  0x17   : > { %v219_v20 = vmax.f32 %v213_v13, 0.0  ;;  %v269_v21 = vmax.f32 %v263_v14, 0.0  ;;  %v206_v23 = vmul.f32 58.395, %v200_v12  ;;  %v2938_v24 = vld [vmem:[%s3904_s19 + $0x78] sm:$0xff]  ;;  %v2931_v54 = vld [vmem:[%s3904_s19 + $0x40] sm:$0xff] }
  0x18   : > { %v325_v22 = vmax.f32 %v319_v15, 0.0  ;;  %v220_v25 = vmax.f32 %v214_v16, 0.0  ;;  %v264_v26 = vadd.f32 116.28, %v258_v17  ;;  %v320_v27 = vadd.f32 103.53, %v314_v18 }
  0x19   : > { %v312_v28 = vmul.f32 57.375, %v2938_v24  ;;  %v225_v29 = vmin.f32 %v219_v20, 255.0  ;;  %v275_v30 = vmin.f32 %v269_v21, 255.0  ;;  %v212_v32 = vadd.f32 123.675, %v206_v23  ;;  %v2937_v2 = vld [vmem:[%s3904_s19 + $0x70] sm:$0xff] }
  0x1a   : > { %v331_v31 = vmin.f32 %v325_v22, 255.0  ;;  %v226_v33 = vmin.f32 %v220_v25, 255.0  ;;  %v270_v34 = vmax.f32 %v264_v26, 0.0  ;;  %v326_v35 = vmax.f32 %v320_v27, 0.0  ;;  %v198_v12 = vld [vmem:[%s3904_s19 + $0x8] sm:$0xff] }
  0x1b   : > { %v256_v36 = vmul.f32 57.12, %v2932_v19  ;;  %v231_v37 = vadd.f32 0.5, %v225_v29  ;;  %v281_v38 = vadd.f32 0.5, %v275_v30  ;;  %v218_v40 = vmax.f32 %v212_v32, 0.0  ;;  %v2936_v17 = vld [vmem:[%s3904_s19 + $0x68] sm:$0xff] }
  0x1c   : > { %v337_v39 = vadd.f32 0.5, %v331_v31  ;;  %v232_v41 = vadd.f32 0.5, %v226_v33  ;;  %v276_v42 = vmin.f32 %v270_v34, 255.0  ;;  %v332_v43 = vmin.f32 %v326_v35, 255.0  ;;  %v2930_v34 = vld [vmem:[%s3904_s19 + $0x38] sm:$0xff] }
  0x1d   : > { %v262_v44 = vadd.f32 116.28, %v256_v36  ;;  %v237_v45 = vfloor.f32 %v231_v37  ;;  %v287_v46 = vfloor.f32 %v281_v38  ;;  %v224_v48 = vmin.f32 %v218_v40, 255.0 }
  0x1e   : > { %v343_v47 = vfloor.f32 %v337_v39  ;;  %v238_v49 = vfloor.f32 %v232_v41  ;;  %v282_v50 = vadd.f32 0.5, %v276_v42  ;;  %v338_v51 = vadd.f32 0.5, %v332_v43  ;;  %v197_v39 = vld [vmem:[%s3904_s19] sm:$0xff] }
  0x1f   : > { %v268_v52 = vmax.f32 %v262_v44, 0.0  ;;  %v243_v55 = vmul.f32 0.299, %v237_v45  ;;  %v293_v56 = vmul.f32 0.587, %v287_v46  ;;  %v230_v61 = vadd.f32 0.5, %v224_v48 }
  0x20   : > { %v349_v57 = vmul.f32 0.114, %v343_v47  ;;  %v244_v58 = vmul.f32 0.299, %v238_v49  ;;  %v288_v59 = vfloor.f32 %v282_v50  ;;  %v344_v60 = vfloor.f32 %v338_v51  ;;  %v2935_v44 = vld [vmem:[%s3904_s19 + $0x60] sm:$0xff] }
  0x21   : > { %v299_v62 = vadd.f32 %v293_v56, %v243_v55  ;;  %v274_v63 = vmin.f32 %v268_v52, 255.0  ;;  %v318_v0 = vadd.f32 103.53, %v312_v28  ;;  %v205_v1 = vmul.f32 58.395, %v199_v53 }
  0x22   : > { %v294_v3 = vmul.f32 0.587, %v288_v59  ;;  %v350_v4 = vmul.f32 0.114, %v344_v60  ;;  %v236_v5 = vfloor.f32 %v230_v61  ;;  %v255_v6 = vmul.f32 57.12, %v2931_v54 }
  0x23   : > { %v3922_v7 = vadd.f32 %v349_v57, %v299_v62  ;;  %v280_v8 = vadd.f32 0.5, %v274_v63  ;;  %v324_v9 = vmax.f32 %v318_v0, 0.0  ;;  %v211_v10 = vadd.f32 123.675, %v205_v1  ;;  %v3962_v1 = vld [vmem:[%s6463_s2 + $0x38] sm:$0xff] }
  0x24   : > { %v300_v13 = vadd.f32 %v294_v3, %v244_v58  ;;  %v242_v14 = vmul.f32 0.299, %v236_v5  ;;  %v261_v15 = vadd.f32 116.28, %v255_v6  ;;  %v311_v16 = vmul.f32 57.375, %v2937_v2  ;;  %v2929_v6 = vld [vmem:[%s3904_s19 + $0x30] sm:$0xff]  ;;  %3754 = vmatpush.bf16.msra.mxu1 %v3962_v1 }
  0x25   : > { %377 = vrot.lane.b32.xlu1 %v3922_v7, %s3854_s20  ;;  %v397_v18 = vrot.slane %v3922_v7, 1  ;;  %v412_v19 = vrot.slane %v3922_v7, 7  ;;  %365 = vrot.lane.b32.xlu0 %v3922_v7, %s3855_s21  ;;  %v286_v20 = vfloor.f32 %v280_v8  ;;  %v330_v21 = vmin.f32 %v324_v9, 255.0 }
  0x26   : > { %v3932_v22 = vadd.f32 %v350_v4, %v300_v13  ;;  %v217_v23 = vmax.f32 %v211_v10, 0.0  ;;  %v267_v24 = vmax.f32 %v261_v15, 0.0  ;;  %v317_v25 = vadd.f32 103.53, %v311_v16  ;;  %v3979_v16 = vld [vmem:[%s6463_s2 + $0x30] sm:$0xff] }
  0x27   : > { %v292_v26 = vmul.f32 0.587, %v286_v20  ;;  %v336_v27 = vadd.f32 0.5, %v330_v21  ;;  %v204_v28 = vmul.f32 58.395, %v198_v12  ;;  %v310_v29 = vmul.f32 57.375, %v2936_v17 }
  0x28   : > { %v398_v30 = vrot.slane %v3932_v22, 1  ;;  %v413_v31 = vrot.slane %v3932_v22, 7  ;;  %v223_v32 = vmin.f32 %v217_v23, 255.0  ;;  %v273_v33 = vmin.f32 %v267_v24, 255.0  ;;  %3755 = vmatpush.bf16.msra.mxu1 %v3979_v16 }
  0x29   : > { %v298_v35 = vadd.f32 %v292_v26, %v242_v14  ;;  %v342_v36 = vfloor.f32 %v336_v27  ;;  %v323_v37 = vmax.f32 %v317_v25, 0.0  ;;  %v210_v38 = vadd.f32 123.675, %v204_v28 }
  0x2a   : > { %v3942_v40 = vsel %vm401_vm0, %v397_v18, %v398_v30  ;;  %v3948_v41 = vsel %vm414_vm1, %v412_v19, %v413_v31  ;;  %v229_v42 = vadd.f32 0.5, %v223_v32  ;;  %v279_v43 = vadd.f32 0.5, %v273_v33  ;;  %v3989_v33 = vld [vmem:[%s6463_s2 + $0x28] sm:$0xff] }
  0x2b   : > { %v348_v45 = vmul.f32 0.114, %v342_v36  ;;  %v329_v46 = vmin.f32 %v323_v37, 255.0  ;;  %v216_v47 = vmax.f32 %v210_v38, 0.0  ;;  %v254_v48 = vmul.f32 57.12, %v2930_v34 }
  0x2c   : > { %v235_v49 = vfloor.f32 %v229_v42  ;;  %v285_v50 = vfloor.f32 %v279_v43  ;;  %v316_v51 = vadd.f32 103.53, %v310_v29  ;;  %v203_v52 = vmul.f32 58.395, %v197_v39  ;;  %3756 = vmatpush.bf16.msra.mxu1 %v3989_v33 }
  0x2d   : > { %379 = vrot.lane.b32.xlu1 %v3932_v22, %s3854_s20  ;;  %367 = vrot.lane.b32.xlu0 %v3932_v22, %s3855_s21  ;;  %v3955_v53 = vadd.f32 %v348_v45, %v298_v35  ;;  %v335_v54 = vadd.f32 0.5, %v329_v46  ;;  %v222_v55 = vmin.f32 %v216_v47, 255.0  ;;  %v260_v56 = vadd.f32 116.28, %v254_v48  ;;  %v4029_v22 = vld [vmem:[%s6463_s2 + $0x18] sm:$0xff] }
  0x2e   : > { %v241_v57 = vmul.f32 0.299, %v235_v49  ;;  %v291_v58 = vmul.f32 0.587, %v285_v50  ;;  %v322_v59 = vmax.f32 %v316_v51, 0.0  ;;  %v309_v60 = vmul.f32 57.375, %v2935_v44 }
  0x2f   : > { %v396_v61 = vrot.slane %v3955_v53, 1  ;;  %v411_v62 = vrot.slane %v3955_v53, 7  ;;  %v341_v63 = vfloor.f32 %v335_v54  ;;  %v228_v0 = vadd.f32 0.5, %v222_v55  ;;  %6533 = vst [vmem:[#allocation4_spill] sm:$0xff] %v4029_v22 }
  0x30   : > { %v297_v2 = vadd.f32 %v291_v58, %v241_v57  ;;  %v266_v3 = vmax.f32 %v260_v56, 0.0  ;;  %v328_v4 = vmin.f32 %v322_v59, 255.0  ;;  %v209_v5 = vadd.f32 123.675, %v203_v52 }
  0x31   : > { %v3967_v7 = vsel %vm401_vm0, %v396_v61, %v397_v18  ;;  %v3971_v8 = vsel %vm414_vm1, %v411_v62, %v412_v19  ;;  %v347_v9 = vmul.f32 0.114, %v341_v63  ;;  %v234_v10 = vfloor.f32 %v228_v0 }
  0x32   : > { %v425_v12 = vsub.f32 %v3942_v40, %v3971_v8  ;;  %v272_v13 = vmin.f32 %v266_v3, 255.0  ;;  %v334_v14 = vadd.f32 0.5, %v328_v4  ;;  %v215_v15 = vmax.f32 %v209_v5, 0.0 }
  0x33   : > { %v353_v17 = vadd.f32 %v347_v9, %v297_v2  ;;  %v253_v18 = vmul.f32 57.12, %v2929_v6  ;;  %v315_v20 = vadd.f32 103.53, %v309_v60  ;;  %v240_v28 = vmul.f32 0.299, %v234_v10 }
  0x34   : > { %v278_v19 = vadd.f32 0.5, %v272_v13  ;;  %v340_v21 = vfloor.f32 %v334_v14  ;;  %v221_v23 = vmin.f32 %v215_v15, 255.0  ;;  %v431_v10 = vmul.f32 0.5, %v425_v12 }
  0x35   : > { %375 = vrot.lane.b32.xlu1 %v3955_v53, %s3854_s20  ;;  %373 = vrot.lane.b32.xlu0 %v353_v17, %s3854_s20  ;;  %v395_v24 = vrot.slane %v353_v17, 1  ;;  %v410_v25 = vrot.slane %v353_v17, 7  ;;  %v259_v26 = vadd.f32 116.28, %v253_v18  ;;  %v321_v27 = vmax.f32 %v315_v20, 0.0 }
  0x36   : > { %361 = vrot.lane.b32.xlu2 %v353_v17, %s3855_s21  ;;  %v284_v29 = vfloor.f32 %v278_v19  ;;  %v227_v32 = vadd.f32 0.5, %v221_v23  ;;  %v346_v42 = vmul.f32 0.114, %v340_v21  ;;  %v501_v21 = vmul.f32 0.0, %v431_v10 }
  0x37   : > { %v404_v34 = vsel %vm401_vm0, %v395_v24, %v396_v61  ;;  %v417_v35 = vsel %vm414_vm1, %v410_v25, %v411_v62  ;;  %v265_v36 = vmax.f32 %v259_v26, 0.0  ;;  %v327_v37 = vmin.f32 %v321_v27, 255.0 }
  0x38   : > { %v424_v38 = vsub.f32 %v3967_v7, %v417_v35  ;;  %v290_v39 = vmul.f32 0.587, %v284_v29  ;;  %v233_v43 = vfloor.f32 %v227_v32  ;;  %v4023_v7 = vld [vmem:[%s6463_s2 + $0x20] sm:$0xff]  ;;  %v849_v23 = vmul.f32 0.70710677, %v431_v10 }
  0x39   : > { %v271_v44 = vmin.f32 %v265_v36, 255.0  ;;  %v333_v45 = vadd.f32 0.5, %v327_v37  ;;  %6532 = vst [vmem:[#allocation3_spill] sm:$0xff] %v4023_v7  ;;  %3757 = vmatpush.bf16.msra.mxu1 %v4023_v7  ;;  %v1491_v40 = vmul.f32 -0.70710677, %v431_v10  ;;  %v1656_v8 = vmul.f32 -1.0, %v431_v10 }
  0x3a   : > { %v296_v46 = vadd.f32 %v290_v39, %v240_v28  ;;  %v239_v50 = vmul.f32 0.299, %v233_v43  ;;  %v4057_v14 = vmul.f32 0.5, %v424_v38 }
  0x3b   : > { %v277_v47 = vadd.f32 0.5, %v271_v44  ;;  %v339_v48 = vfloor.f32 %v333_v45 }
  0x3c   : > { %v352_v49 = vadd.f32 %v346_v42, %v296_v46  ;;  %v4080_v36 = vmul.f32 0.0, %v4057_v14  ;;  %v4086_v38 = vmul.f32 0.70710677, %v4057_v14  ;;  %v4092_v42 = vmul.f32 1.2246469e-16, %v4057_v14 }
  0x3d   : > { %v283_v51 = vfloor.f32 %v277_v47  ;;  %v345_v56 = vmul.f32 0.114, %v339_v48  ;;  %3758 = vmatpush.bf16.msra.mxu1 %v4029_v22  ;;  %v4098_v45 = vmul.f32 -0.70710677, %v4057_v14 }
  0x3e   : > { %359 = vrot.lane.b32.xlu0 %v352_v49, %s3855_s21  ;;  %v394_v52 = vrot.slane %v352_v49, 1  ;;  %v409_v54 = vrot.slane %v352_v49, 7  ;;  %363 = vrot.lane.b32.xlu2 %v3955_v53, %s3855_s21 }
  0x3f   : > { %v289_v55 = vmul.f32 0.587, %v283_v51 }
  0x40   : > { %v405_v57 = vsel %vm401_vm0, %v394_v52, %v395_v24  ;;  %v418_v58 = vsel %vm414_vm1, %v409_v54, %v410_v25  ;;  %v1332_v24 = vmul.f32 1.2246469e-16, %v431_v10 }
  0x41   : > { %v423_v59 = vsub.f32 %v404_v34, %v418_v58  ;;  %v295_v60 = vadd.f32 %v289_v55, %v239_v50 }
  0x43   : > { %v351_v61 = vadd.f32 %v345_v56, %v295_v60  ;;  %v4059_v15 = vmul.f32 0.5, %v423_v59 }
  0x45   : > { %369 = vrot.lane.b32.xlu1 %v351_v61, %s3854_s20  ;;  %v393_v62 = vrot.slane %v351_v61, 1  ;;  %v408_v63 = vrot.slane %v351_v61, 7  ;;  %v4077_v35 = vmul.f32 0.0, %v4059_v15  ;;  %v4083_v37 = vmul.f32 0.70710677, %v4059_v15 }
  0x46   : > { %357 = vrot.lane.b32.xlu2 %v351_v61, %s3855_s21  ;;  %v4089_v39 = vmul.f32 1.2246469e-16, %v4059_v15  ;;  %v4095_v44 = vmul.f32 -0.70710677, %v4059_v15 }
  0x47   : > { %v406_v53 = vsel %vm401_vm0, %v393_v62, %v394_v52  ;;  %v407_v0 = vsel %vm401_vm0, %v398_v30, %v393_v62  ;;  %v419_v2 = vsel %vm414_vm1, %v408_v63, %v409_v54  ;;  %v420_v3 = vsel %vm414_vm1, %v413_v31, %v408_v63  ;;  %v4035_v30 = vld [vmem:[%s6463_s2 + $0x10] sm:$0xff]  ;;  %v4041_v31 = vld [vmem:[%s6463_s2 + $0x8] sm:$0xff] }
  0x48   : > { %v421_v4 = vsub.f32 %v406_v53, %v420_v3  ;;  %v422_v5 = vsub.f32 %v405_v57, %v419_v2  ;;  %v426_v6 = vsub.f32 %v407_v0, %v3948_v41  ;;  %6534 = vst [vmem:[#allocation5_spill] sm:$0xff] %v4035_v30  ;;  %3759 = vmatpush.bf16.msra.mxu1 %v4035_v30  ;;  %v4047_v41 = vld [vmem:[%s6463_s2] sm:$0xff]  ;;  %v4116_v53 = vmul.f32 -1.0, %v4059_v15 }
  0x49   : > { %6535 = vst [vmem:[#allocation6_spill] sm:$0xff] %v4041_v31 }
  0x4a   : > { %6536 = vst [vmem:[#allocation7_spill] sm:$0xff] %v4047_v41  ;;  %v4055_v13 = vmul.f32 0.5, %v426_v6  ;;  %v4061_v17 = vmul.f32 0.5, %v421_v4  ;;  %v4063_v18 = vmul.f32 0.5, %v422_v5 }
  0x4c   : > { %3760 = vmatpush.bf16.msra.mxu1 %v4041_v31  ;;  %v4066_v26 = vmul.f32 0.70710677, %v4055_v13  ;;  %v502_v12 = vmul.f32 0.0, %v4055_v13  ;;  %v1333_v27 = vmul.f32 1.2246469e-16, %v4055_v13  ;;  %v1657_v29 = vmul.f32 -1.0, %v4055_v13 }
  0x4d   : > { %v4071_v28 = vmul.f32 -0.70710677, %v4055_v13  ;;  %v4101_v51 = vmul.f32 0.0, %v4061_v17  ;;  %v4104_v52 = vmul.f32 0.0, %v4063_v18  ;;  %v4107_v54 = vmul.f32 0.70710677, %v4061_v17 }
  0x4e   : > { %371 = vrot.lane.b32.xlu2 %v352_v49, %s3854_s20  ;;  %v4110_v62 = vmul.f32 0.70710677, %v4063_v18  ;;  %v4113_v63 = vmul.f32 1.2246469e-16, %v4061_v17  ;;  %v4119_v3 = vmul.f32 1.2246469e-16, %v4063_v18 }
  0x4f   : > { %v4122_v4 = vmul.f32 -0.70710677, %v4061_v17  ;;  %v4125_v6 = vmul.f32 -0.70710677, %v4063_v18 }
  0x50   : > { %3761 = vmatpush.bf16.msra.mxu1 %v4047_v41 }
  0x90   : > { %v4050_v9 = vpop.permute.xlu2 %361 }
  0x97   : > { %v378_v20 = vpop.permute.xlu1 %377  ;;  %v366_v19 = vpop.permute.xlu0 %365 }
  0x98   : > { %v385_v25 = vsub.f32 %v366_v19, %v378_v20  ;;  %v4074_v34 = vpop.permute.xlu2 %363 }
  0x9a   : > { %v391_v32 = vmul.f32 0.5, %v385_v25 }
  0x9c   : > { %v843_v43 = vmul.f32 0.70710677, %v391_v32  ;;  %v507_v46 = vadd.f32 %v501_v21, %v391_v32  ;;  %v1008_v47 = vmul.f32 6.123234e-17, %v391_v32  ;;  %v1167_v48 = vmul.f32 -0.70710677, %v391_v32 }
  0x9d   : > { %v1326_v49 = vmul.f32 -1.0, %v391_v32 }
  0x9e   : > { %v855_v50 = vadd.f32 %v849_v23, %v843_v43  ;;  %v1014_v57 = vadd.f32 %v1008_v47, %v431_v10  ;;  %v1173_v58 = vadd.f32 %v1167_v48, %v849_v23  ;;  %v1497_v60 = vadd.f32 %v1491_v40, %v1167_v48 }
  0x9f   : > { %v380_v55 = vpop.permute.xlu1 %379  ;;  %v368_v56 = vpop.permute.xlu0 %367  ;;  %v1338_v59 = vadd.f32 %v1332_v24, %v1326_v49  ;;  %v513_v0 = vmax.f32 %v507_v46, 0.0  ;;  %v1650_v10 = vmul.f32 -1.8369701e-16, %v391_v32  ;;  %v4127_v20 = vadd.f32 %v1491_v40, %v843_v43 }
  0xa0   : > { %v386_v61 = vsub.f32 %v368_v56, %v380_v55  ;;  %v861_v2 = vmax.f32 %v855_v50, 0.0  ;;  %v1020_v19 = vmax.f32 %v1014_v57, 0.0  ;;  %v1179_v21 = vmax.f32 %v1173_v58, 0.0  ;;  %v4129_v25 = vpop.permute.xlu2 %357 }
  0xa1   : > { %v1344_v23 = vmax.f32 %v1338_v59, 0.0  ;;  %v1503_v24 = vmax.f32 %v1497_v60, 0.0  ;;  %v4132_v49 = vmul.f32 -1.0, %v4057_v14  ;;  %v4139_v57 = vmul.f32 -1.0, %v4061_v17 }
  0xa2   : > { %v392_v5 = vmul.f32 0.5, %v386_v61  ;;  %v4134_v61 = vadd.f32 %v1656_v8, %v1650_v10 }
  0xa4   : > { %v508_v46 = vadd.f32 %v502_v12, %v392_v5  ;;  %v844_v47 = vmul.f32 0.70710677, %v392_v5  ;;  %v1009_v48 = vmul.f32 6.123234e-17, %v392_v5  ;;  %v1168_v50 = vmul.f32 -0.70710677, %v392_v5 }
  0xa5   : > { %v1327_v55 = vmul.f32 -1.0, %v392_v5  ;;  %v1651_v56 = vmul.f32 -1.8369701e-16, %v392_v5 }
  0xa6   : > { %v514_v32 = vmax.f32 %v508_v46, 0.0  ;;  %v856_v40 = vadd.f32 %v4066_v26, %v844_v47  ;;  %v1015_v43 = vadd.f32 %v1009_v48, %v4055_v13  ;;  %v1174_v59 = vadd.f32 %v1168_v50, %v4066_v26 }
  0xa7   : > { %v376_v58 = vpop.permute.xlu1 %375  ;;  %v374_v12 = vpop.permute.xlu0 %373  ;;  %v1339_v60 = vadd.f32 %v1333_v27, %v1327_v55  ;;  %v1498_v11 = vadd.f32 %v4071_v28, %v1168_v50  ;;  %v4143_v41 = vadd.f32 %v1657_v29, %v1651_v56  ;;  %v1668_v27 = vmax.f32 %v4134_v61, 0.0 }
  0xa8   : > { %v384_v8 = vsub.f32 %v4074_v34, %v376_v58  ;;  %v383_v5 = vsub.f32 %v4050_v9, %v374_v12  ;;  %v4147_v10 = vpack.c.bf16 %v514_v32, %v513_v0  ;;  %v862_v46 = vmax.f32 %v856_v40, 0.0 }
  0xa9   : > { %v1021_v13 = vmax.f32 %v1015_v43, 0.0  ;;  %v1180_v48 = vmax.f32 %v1174_v59, 0.0  ;;  %v1345_v31 = vmax.f32 %v1339_v60, 0.0  ;;  %v1504_v30 = vmax.f32 %v1498_v11, 0.0 }
  0xaa   : > { %v4149_v22 = vmul.f32 0.5, %v384_v8  ;;  %v4151_v7 = vmul.f32 0.5, %v383_v5  ;;  %540 = vmatpush.bf16.msra.mxu0 %v4147_v10  ;;  %644 = vmatpush.bf16.msra.mxu2 %v4147_v10  ;;  %v4155_v26 = vpack.c.bf16 %v862_v46, %v861_v2 }
  0xab   : > { %v4158_v9 = vpack.c.bf16 %v1021_v13, %v1020_v19  ;;  %v4160_v29 = vpack.c.bf16 %v1180_v48, %v1179_v21  ;;  %v4162_v34 = vpack.c.bf16 %v1345_v31, %v1344_v23  ;;  %v4164_v0 = vpack.c.bf16 %v1504_v30, %v1503_v24  ;;  %v372_v24 = vpop.permute.xlu2 %371 }
  0xac   : > { %871 = vmatpush.bf16.msrb.mxu1 %v4155_v26  ;;  %v505_v11 = vadd.f32 %v4077_v35, %v4151_v7  ;;  %v506_v50 = vadd.f32 %v4080_v36, %v4149_v22  ;;  %v4172_v2 = vmul.f32 0.70710677, %v4151_v7  ;;  %v4175_v19 = vmul.f32 0.70710677, %v4149_v22 }
  0xad   : > { %v1006_v21 = vmul.f32 6.123234e-17, %v4151_v7  ;;  %v1007_v31 = vmul.f32 6.123234e-17, %v4149_v22  ;;  %v1165_v30 = vmul.f32 -0.70710677, %v4151_v7  ;;  %v4181_v23 = vadd.f32 %v4071_v28, %v844_v47 }
  0xae   : > { %v511_v35 = vmax.f32 %v505_v11, 0.0  ;;  %v512_v55 = vmax.f32 %v506_v50, 0.0  ;;  %v853_v36 = vadd.f32 %v4083_v37, %v4172_v2  ;;  %v854_v56 = vadd.f32 %v4086_v38, %v4175_v19 }
  0xaf   : > { %v1012_v32 = vadd.f32 %v1006_v21, %v4059_v15  ;;  %v1013_v40 = vadd.f32 %v1007_v31, %v4057_v14  ;;  %v1166_v43 = vmul.f32 -0.70710677, %v4149_v22  ;;  %v1171_v58 = vadd.f32 %v1165_v30, %v4083_v37 }
  0xb0   : > { %v360_v12 = vpop.permute.xlu0 %359  ;;  %v4191_v28 = vpack.c.bf16 %v512_v55, %v511_v35  ;;  %v859_v47 = vmax.f32 %v853_v36, 0.0  ;;  %v860_v59 = vmax.f32 %v854_v56, 0.0  ;;  %v1324_v60 = vmul.f32 -1.0, %v4151_v7 }
  0xb1   : > { %v382_v8 = vsub.f32 %v360_v12, %v372_v24  ;;  %v1018_v5 = vmax.f32 %v1012_v32, 0.0  ;;  %v1019_v46 = vmax.f32 %v1013_v40, 0.0  ;;  %v1172_v13 = vadd.f32 %v1166_v43, %v4086_v38 }
  0xb2   : > { %541 = vmatpush.bf16.msra.mxu0 %v4191_v28  ;;  %645 = vmatpush.bf16.msra.mxu2 %v4191_v28  ;;  %v4197_v14 = vpack.c.bf16 %v860_v59, %v859_v47  ;;  %v1177_v15 = vmax.f32 %v1171_v58, 0.0  ;;  %v1325_v37 = vmul.f32 -1.0, %v4149_v22  ;;  %v1336_v48 = vadd.f32 %v4089_v39, %v1324_v60 }
  0xb3   : > { %v4201_v11 = vmul.f32 0.5, %v382_v8  ;;  %v4203_v50 = vpack.c.bf16 %v1019_v46, %v1018_v5  ;;  %v1178_v21 = vmax.f32 %v1172_v13, 0.0  ;;  %v1495_v31 = vadd.f32 %v4095_v44, %v1165_v30 }
  0xb4   : > { %872 = vmatpush.bf16.msrb.mxu1 %v4197_v14  ;;  %v1337_v38 = vadd.f32 %v4092_v42, %v1325_v37  ;;  %v1342_v24 = vmax.f32 %v1336_v48, 0.0  ;;  %v1496_v35 = vadd.f32 %v4098_v45, %v1166_v43  ;;  %v1669_v55 = vmax.f32 %v4143_v41, 0.0 }
  0xb5   : > { %v504_v36 = vadd.f32 %v4104_v52, %v4201_v11  ;;  %v4213_v39 = vmul.f32 0.70710677, %v4201_v11  ;;  %v1005_v56 = vmul.f32 6.123234e-17, %v4201_v11  ;;  %v4216_v32 = vpack.c.bf16 %v1178_v21, %v1177_v15 }
  0xb6   : > { %v1164_v30 = vmul.f32 -0.70710677, %v4201_v11  ;;  %v1343_v40 = vmax.f32 %v1337_v38, 0.0  ;;  %v1323_v42 = vmul.f32 -1.0, %v4201_v11  ;;  %v1501_v58 = vmax.f32 %v1495_v31, 0.0 }
  0xb7   : > { %v370_v12 = vpop.permute.xlu1 %369  ;;  %v510_v43 = vmax.f32 %v504_v36, 0.0  ;;  %v852_v41 = vadd.f32 %v4110_v62, %v4213_v39  ;;  %v1011_v52 = vadd.f32 %v1005_v56, %v4063_v18  ;;  %v1502_v47 = vmax.f32 %v1496_v35, 0.0 }
  0xb8   : > { %v381_v59 = vsub.f32 %v4129_v25, %v370_v12  ;;  %v1170_v60 = vadd.f32 %v1164_v30, %v4110_v62  ;;  %v4225_v8 = vpack.c.bf16 %v1343_v40, %v1342_v24  ;;  %v1335_v5 = vadd.f32 %v4119_v3, %v1323_v42 }
  0xb9   : > { %v858_v46 = vmax.f32 %v852_v41, 0.0  ;;  %v1017_v13 = vmax.f32 %v1011_v52, 0.0  ;;  %v4228_v15 = vpack.c.bf16 %v1502_v47, %v1501_v58  ;;  %v1494_v37 = vadd.f32 %v4125_v6, %v1164_v30 }
  0xba   : > { %v387_v48 = vmul.f32 0.5, %v381_v59  ;;  %v1176_v21 = vmax.f32 %v1170_v60, 0.0  ;;  %v1341_v31 = vmax.f32 %v1335_v5, 0.0  ;;  %v4233_v38 = vpack.c.bf16 %v1669_v55, %v1668_v27 }
  0xbb   : > { %v1500_v25 = vmax.f32 %v1494_v37, 0.0  ;;  %v1648_v62 = vmul.f32 -1.8369701e-16, %v4151_v7  ;;  %v1649_v24 = vmul.f32 -1.8369701e-16, %v4149_v22  ;;  %v1653_v3 = vmul.f32 -1.0, %v4063_v18 }
  0xbc   : > { %v503_v35 = vadd.f32 %v4101_v51, %v387_v48  ;;  %v839_v36 = vmul.f32 0.70710677, %v387_v48  ;;  %v1004_v56 = vmul.f32 6.123234e-17, %v387_v48  ;;  %v1163_v30 = vmul.f32 -0.70710677, %v387_v48 }
  0xbd   : > { %v1322_v40 = vmul.f32 -1.0, %v387_v48  ;;  %v1660_v42 = vadd.f32 %v4116_v53, %v1648_v62  ;;  %v1661_v58 = vadd.f32 %v4132_v49, %v1649_v24  ;;  %v1646_v61 = vmul.f32 -1.8369701e-16, %v387_v48  ;;  %v4249_v49 = vld [vmem:[%s6462_s1] sm:$0xff] }
  0xbe   : > { %v509_v27 = vmax.f32 %v503_v35, 0.0  ;;  %v851_v55 = vadd.f32 %v4107_v54, %v839_v36  ;;  %v1010_v7 = vadd.f32 %v1004_v56, %v4061_v17  ;;  %v1169_v22 = vadd.f32 %v1163_v30, %v4107_v54 }
  0xbf   : > { %v1334_v18 = vadd.f32 %v4113_v63, %v1322_v40  ;;  %v1493_v51 = vadd.f32 %v4122_v4, %v1163_v30  ;;  %v1666_v12 = vmax.f32 %v1660_v42, 0.0  ;;  %v1667_v41 = vmax.f32 %v1661_v58, 0.0  ;;  %v6539_v40 = vld [vmem:[#allocation5_spill] sm:$0xff]  ;;  %v6540_v42 = vld [vmem:[#allocation6_spill] sm:$0xff]  ;;  %v6541_v58 = vld [vmem:[#allocation7_spill] sm:$0xff] }
  0xc0   : > { %v515_v52 = vpack.c.bf16 %v510_v43, %v509_v27  ;;  %v857_v47 = vmax.f32 %v851_v55, 0.0  ;;  %v1016_v59 = vmax.f32 %v1010_v7, 0.0  ;;  %v1175_v53 = vmax.f32 %v1169_v22, 0.0 }
  0xc1   : > { %v1340_v60 = vmax.f32 %v1334_v18, 0.0  ;;  %v1499_v5 = vmax.f32 %v1493_v51, 0.0  ;;  %v4251_v17 = vpack.c.bf16 %v1667_v41, %v1666_v12  ;;  %v1647_v54 = vmul.f32 -1.8369701e-16, %v4201_v11  ;;  %v4330_v51 = vld [vmem:[%s6462_s1 + $0x28] sm:$0xff]  ;;  %v4384_v12 = vld [vmem:[%s6463_s2 + $0x58] sm:$0xff] }
  0xc2   : > { %542 = vmatpush.bf16.msra.mxu0 %v515_v52  ;;  %646 = vmatpush.bf16.msra.mxu2 %v515_v52  ;;  %v863_v63 = vpack.c.bf16 %v858_v46, %v857_v47  ;;  %v4254_v37 = vpack.c.bf16 %v1017_v13, %v1016_v59  ;;  %v4256_v43 = vpack.c.bf16 %v1176_v21, %v1175_v53  ;;  %v1821_v48 = vmax.f32 %v4127_v20, 0.0  ;;  %v4391_v41 = vld [vmem:[%s6463_s2 + $0x50] sm:$0xff]  ;;  %v4398_v47 = vld [vmem:[%s6463_s2 + $0x48] sm:$0xff]  ;;  %v4403_v59 = vld [vmem:[%s6463_s2 + $0xb8] sm:$0xff] }
  0xc3   : > { %v4260_v62 = vpack.c.bf16 %v1341_v31, %v1340_v60  ;;  %v4262_v24 = vpack.c.bf16 %v1500_v25, %v1499_v5  ;;  %v1658_v35 = vadd.f32 %v4139_v57, %v1646_v61  ;;  %v1659_v56 = vadd.f32 %v1653_v3, %v1647_v54  ;;  %v4309_v61 = vld [vmem:[%s6462_s1 + $0x18] sm:$0xff]  ;;  %v4411_v53 = vld [vmem:[%s6463_s2 + $0x40] sm:$0xff]  ;;  %v4416_v60 = vld [vmem:[%s6463_s2 + $0xb0] sm:$0xff] }
  0xc4   : > { %873 = vmatpush.bf16.msrb.mxu1 %v863_v63  ;;  %v1822_v11 = vmax.f32 %v4181_v23, 0.0  ;;  %v1813_v46 = vadd.f32 %v4095_v44, %v4172_v2  ;;  %v1814_v13 = vadd.f32 %v4098_v45, %v4175_v19  ;;  %v1811_v20 = vadd.f32 %v4122_v4, %v839_v36  ;;  %v4283_v4 = vld [vmem:[%s6462_s1 + $0x10] sm:$0xff] }
  0xc5   : > { %2989 = vmatmul.msk.bf16.vlgmr.msra.gmra.mxu0 %vm528_vm2, %v4249_v49  ;;  %v1664_v21 = vmax.f32 %v1658_v35, 0.0  ;;  %v1665_v31 = vmax.f32 %v1659_v56, 0.0  ;;  %v1812_v57 = vadd.f32 %v4125_v6, %v4213_v39  ;;  %3031 = vmatmul.msk.bf16.vlgmr.msra.gmra.mxu2 %vm528_vm2, %v4283_v4  ;;  %v6537_v6 = vld [vmem:[#allocation3_spill] sm:$0xff]  ;;  %v6538_v36 = vld [vmem:[#allocation4_spill] sm:$0xff] }
  0xc6   : > { %604 = vmatpush.bf16.msrb.mxu0 %v3962_v1  ;;  %v4275_v25 = vpack.c.bf16 %v1822_v11, %v1821_v48  ;;  %v1819_v3 = vmax.f32 %v1813_v46, 0.0  ;;  %v1820_v23 = vmax.f32 %v1814_v13, 0.0  ;;  %v1817_v30 = vmax.f32 %v1811_v20, 0.0  ;;  %v4296_v39 = vld [vmem:[%s6462_s1 + $0x8] sm:$0xff]  ;;  %816 = vmatpush.bf16.msrb.mxu2 %v4403_v59  ;;  %v4471_v11 = vld [vmem:[%s6463_s2 + $0x80] sm:$0xff] }
  0xc7   : > { %v4278_v44 = vpack.c.bf16 %v1665_v31, %v1664_v21  ;;  %v1818_v45 = vmax.f32 %v1812_v57, 0.0 }
  0xc8   : > { %v4285_v2 = vpack.c.bf16 %v1820_v23, %v1819_v3 }
  0xc9   : > { %v4287_v19 = vpack.c.bf16 %v1818_v45, %v1817_v30 }
  0xca   : > { %605 = vmatpush.bf16.msrb.mxu0 %v3979_v16  ;;  %817 = vmatpush.bf16.msrb.mxu2 %v4416_v60 }
  0xce   : > { %606 = vmatpush.bf16.msrb.mxu0 %v3989_v33 }
  0xd2   : > { %607 = vmatpush.bf16.msrb.mxu0 %v6537_v6 }
  0xd5   : > { %2990 = vmatmul.msk.bf16.gmra.mxu0 %vm528_vm2, %v4296_v39  ;;  %3032 = vmatmul.msk.bf16.gmra.mxu2 %vm528_vm2, %v4309_v61 }
  0xd6   : > { %608 = vmatpush.bf16.msrb.mxu0 %v6538_v36 }
  0xda   : > { %609 = vmatpush.bf16.msrb.mxu0 %v6539_v40 }
  0xde   : > { %610 = vmatpush.bf16.msrb.mxu0 %v6540_v42 }
  0xe2   : > { %611 = vmatpush.bf16.msrb.mxu0 %v6541_v58 }
  0xe6   : > { %752 = vmatpush.bf16.msra.mxu0 %v4147_v10 }
  0xea   : > { %753 = vmatpush.bf16.msra.mxu0 %v4191_v28  ;;  %v4318_v28 = vld [vmem:[%s6462_s1 + $0x20] sm:$0xff] }
  0xee   : > { %754 = vmatpush.bf16.msra.mxu0 %v515_v52 }
 0x142   : > { %v544_v27 = vpop.f32.mrf.mxu0 }
 0x148   : > { %v648_v52 = vpop.f32.mrf.mxu2 }
 0x14a   : > { %v546_v55 = vpop.f32.mrf.mxu0 }
 0x14b   : > { %v554_v7 = vpack.c.bf16 %v546_v55, %v544_v27 }
 0x14d   : > { %612 = vmatmul.bf16.vlgmr.msrb.gmra.mxu0 %v554_v7 }
 0x14e   : > { %913 = vmatpush.bf16.msrb.mxu0 %v4155_v26 }
 0x150   : > { %v650_v5 = vpop.f32.mrf.mxu2 }
 0x151   : > { %v658_v54 = vpack.c.bf16 %v650_v5, %v648_v52 }
 0x152   : > { %914 = vmatpush.bf16.msrb.mxu0 %v4197_v14  ;;  %v549_v10 = vpop.f32.mrf.mxu0 }
 0x156   : > { %915 = vmatpush.bf16.msrb.mxu0 %v863_v63 }
 0x158   : > { %v653_v48 = vpop.f32.mrf.mxu2 }
 0x15a   : > { %v551_v22 = vpop.f32.mrf.mxu0 }
 0x15b   : > { %v555_v18 = vpack.c.bf16 %v551_v22, %v549_v10 }
 0x15d   : > { %616 = vmatmul.bf16.vlgmr.msra.gmra.mxu1 %v555_v18  ;;  %3073 = vmatmul.msk.bf16.vlgmr.msra.gmra.mxu0 %vm528_vm2, %v4318_v28 }
 0x15e   : > { %961 = vmatpush.bf16.msra.mxu1 %v4155_v26  ;;  %1030 = vmatpush.bf16.msra.mxu0 %v4158_v9  ;;  %v4353_v26 = vld [vmem:[%s6463_s2 + $0x78] sm:$0xff] }
 0x15f   : > { %708 = vmatpush.bf16.msra.mxu3 %v4353_v26 }
 0x160   : > { %v655_v35 = vpop.f32.mrf.mxu2 }
 0x161   : > { %v659_v56 = vpack.c.bf16 %v655_v35, %v653_v48 }
 0x162   : > { %962 = vmatpush.bf16.msra.mxu1 %v4197_v14  ;;  %1031 = vmatpush.bf16.msra.mxu0 %v4203_v50  ;;  %v4367_v14 = vld [vmem:[%s6463_s2 + $0x68] sm:$0xff] }
 0x166   : > { %963 = vmatpush.bf16.msra.mxu1 %v863_v63  ;;  %1032 = vmatpush.bf16.msra.mxu0 %v4254_v37  ;;  %v4428_v63 = vld [vmem:[%s6463_s2 + $0xa8] sm:$0xff] }
 0x167   : > { %818 = vmatpush.bf16.msrb.mxu2 %v4428_v63 }
 0x16d   : > { %3074 = vmatmul.msk.bf16.gmra.mxu0 %vm528_vm2, %v4330_v51  ;;  %3107 = vmatmul.msk.bf16.vlgmr.msrb.gmra.mxu1 %vm528_vm2, %v4249_v49 }
 0x16e   : > { %1072 = vmatpush.bf16.msrb.mxu1 %v4158_v9 }
 0x172   : > { %1073 = vmatpush.bf16.msrb.mxu1 %v4203_v50 }
 0x176   : > { %1074 = vmatpush.bf16.msrb.mxu1 %v4254_v37 }
 0x17d   : > { %3108 = vmatmul.msk.bf16.gmra.mxu1 %vm528_vm2, %v4296_v39  ;;  %3109 = vmatmul.msk.bf16.vlgmr.msrb.gmra.mxu0 %vm528_vm2, %v4283_v4 }
 0x17e   : > { %1120 = vmatpush.bf16.msrb.mxu0 %v4158_v9  ;;  %v4360_v9 = vld [vmem:[%s6463_s2 + $0x70] sm:$0xff] }
 0x17f   : > { %709 = vmatpush.bf16.msra.mxu3 %v4360_v9 }
 0x182   : > { %1121 = vmatpush.bf16.msrb.mxu0 %v4203_v50  ;;  %v4374_v50 = vld [vmem:[%s6463_s2 + $0x60] sm:$0xff] }
 0x183   : > { %710 = vmatpush.bf16.msra.mxu3 %v4367_v14 }
 0x186   : > { %1122 = vmatpush.bf16.msrb.mxu0 %v4254_v37  ;;  %v4436_v37 = vld [vmem:[%s6463_s2 + $0xa0] sm:$0xff] }
 0x187   : > { %711 = vmatpush.bf16.msra.mxu3 %v4374_v50  ;;  %819 = vmatpush.bf16.msrb.mxu2 %v4436_v37 }
 0x18b   : > { %712 = vmatpush.bf16.msra.mxu3 %v4384_v12 }
 0x18d   : > { %3110 = vmatmul.msk.bf16.gmra.mxu0 %vm528_vm2, %v4309_v61  ;;  %3111 = vmatmul.msk.bf16.vlgmr.msra.gmra.mxu1 %vm528_vm2, %v4318_v28 }
 0x18e   : > { %1189 = vmatpush.bf16.msra.mxu1 %v4160_v29 }
 0x18f   : > { %713 = vmatpush.bf16.msra.mxu3 %v4391_v41 }
 0x192   : > { %1190 = vmatpush.bf16.msra.mxu1 %v4216_v32 }
 0x193   : > { %714 = vmatpush.bf16.msra.mxu3 %v4398_v47 }
 0x196   : > { %1191 = vmatpush.bf16.msra.mxu1 %v4256_v43 }
 0x197   : > { %715 = vmatpush.bf16.msra.mxu3 %v4411_v53 }
 0x19a   : > { %716 = vmatmul.bf16.vlgmr.msra.gmra.mxu3 %v658_v54 }
 0x19b   : > { %887 = vmatpush.bf16.msrb.mxu3 %v3962_v1 }
 0x19d   : > { %3112 = vmatmul.msk.bf16.gmra.mxu1 %vm528_vm2, %v4330_v51  ;;  %3113 = vmatmul.msk.bf16.vlgmr.msra.gmra.mxu0 %vm528_vm2, %v4249_v49 }
 0x19e   : > { %1231 = vmatpush.bf16.msra.mxu0 %v4160_v29 }
 0x19f   : > { %888 = vmatpush.bf16.msrb.mxu3 %v3979_v16 }
 0x1a2   : > { %1232 = vmatpush.bf16.msra.mxu0 %v4216_v32 }
 0x1a3   : > { %889 = vmatpush.bf16.msrb.mxu3 %v3989_v33 }
 0x1a6   : > { %1233 = vmatpush.bf16.msra.mxu0 %v4256_v43 }
 0x1a7   : > { %890 = vmatpush.bf16.msrb.mxu3 %v6537_v6 }
 0x1aa   : > { %721 = vmatmul.bf16.gmra.mxu3 %v659_v56 }
 0x1ab   : > { %891 = vmatpush.bf16.msrb.mxu3 %v6538_v36 }
 0x1ad   : > { %3114 = vmatmul.msk.bf16.gmra.mxu0 %vm528_vm2, %v4296_v39  ;;  %3115 = vmatmul.msk.bf16.vlgmr.msrb.gmra.mxu1 %vm528_vm2, %v4283_v4 }
 0x1ae   : > { %1279 = vmatpush.bf16.msrb.mxu1 %v4160_v29  ;;  %v4444_v29 = vld [vmem:[%s6463_s2 + $0x98] sm:$0xff] }
 0x1af   : > { %820 = vmatpush.bf16.msrb.mxu2 %v4444_v29  ;;  %892 = vmatpush.bf16.msrb.mxu3 %v6539_v40 }
 0x1b2   : > { %1280 = vmatpush.bf16.msrb.mxu1 %v4216_v32  ;;  %v4452_v32 = vld [vmem:[%s6463_s2 + $0x90] sm:$0xff] }
 0x1b3   : > { %821 = vmatpush.bf16.msrb.mxu2 %v4452_v32  ;;  %893 = vmatpush.bf16.msrb.mxu3 %v6540_v42 }
 0x1b6   : > { %1281 = vmatpush.bf16.msrb.mxu1 %v4256_v43  ;;  %v4463_v43 = vld [vmem:[%s6463_s2 + $0x88] sm:$0xff] }
 0x1b7   : > { %822 = vmatpush.bf16.msrb.mxu2 %v4463_v43  ;;  %894 = vmatpush.bf16.msrb.mxu3 %v6541_v58 }
 0x1bb   : > { %823 = vmatpush.bf16.msrb.mxu2 %v4471_v11  ;;  %977 = vmatpush.bf16.msra.mxu3 %v4403_v59 }
 0x1bd   : > { %3116 = vmatmul.msk.bf16.gmra.mxu1 %vm528_vm2, %v4309_v61  ;;  %3117 = vmatmul.msk.bf16.vlgmr.msrb.gmra.mxu0 %vm528_vm2, %v4318_v28 }
 0x1be   : > { %1354 = vmatpush.bf16.msrb.mxu0 %v4162_v34 }
 0x1bf   : > { %929 = vmatpush.bf16.msra.mxu2 %v4353_v26  ;;  %978 = vmatpush.bf16.msra.mxu3 %v4416_v60 }
 0x1c2   : > { %1355 = vmatpush.bf16.msrb.mxu0 %v4225_v8 }
 0x1c3   : > { %930 = vmatpush.bf16.msra.mxu2 %v4360_v9  ;;  %979 = vmatpush.bf16.msra.mxu3 %v4428_v63 }
 0x1c6   : > { %1356 = vmatpush.bf16.msrb.mxu0 %v4260_v62 }
 0x1c7   : > { %931 = vmatpush.bf16.msra.mxu2 %v4367_v14  ;;  %980 = vmatpush.bf16.msra.mxu3 %v4436_v37 }
 0x1ca   : > { %v613_v46 = vpop.f32.mrf.mxu0 }
 0x1cb   : > { %932 = vmatpush.bf16.msra.mxu2 %v4374_v50  ;;  %981 = vmatpush.bf16.msra.mxu3 %v4444_v29 }
 0x1cd   : > { %3118 = vmatmul.msk.bf16.gmra.mxu0 %vm528_vm2, %v4330_v51  ;;  %3119 = vmatmul.msk.bf16.vlgmr.msra.gmra.mxu1 %vm528_vm2, %v4249_v49 }
 0x1ce   : > { %1396 = vmatpush.bf16.msra.mxu1 %v4162_v34 }
 0x1cf   : > { %933 = vmatpush.bf16.msra.mxu2 %v4384_v12  ;;  %982 = vmatpush.bf16.msra.mxu3 %v4452_v32 }
 0x1d2   : > { %1397 = vmatpush.bf16.msra.mxu1 %v4225_v8  ;;  %v4490_v13 = vpop.f32.mrf.mxu0 }
 0x1d3   : > { %6542 = vst [vmem:[#allocation3_spill] sm:$0xff] %v4490_v13  ;;  %934 = vmatpush.bf16.msra.mxu2 %v4391_v41  ;;  %983 = vmatpush.bf16.msra.mxu3 %v4463_v43 }
 0x1d6   : > { %1398 = vmatpush.bf16.msra.mxu1 %v4260_v62 }
 0x1d7   : > { %935 = vmatpush.bf16.msra.mxu2 %v4398_v47  ;;  %984 = vmatpush.bf16.msra.mxu3 %v4471_v11 }
 0x1da   : > { %v4497_v20 = vpop.f32.mrf.mxu1  ;;  %v756_v21 = vpop.f32.mrf.mxu0 }
 0x1db   : > { %936 = vmatpush.bf16.msra.mxu2 %v4411_v53 }
 0x1dd   : > { %3120 = vmatmul.msk.bf16.gmra.mxu1 %vm528_vm2, %v4296_v39  ;;  %3121 = vmatmul.msk.bf16.vlgmr.msra.gmra.mxu0 %vm528_vm2, %v4283_v4 }
 0x1de   : > { %1444 = vmatpush.bf16.msra.mxu0 %v4162_v34 }
 0x1e2   : > { %1445 = vmatpush.bf16.msra.mxu0 %v4225_v8  ;;  %v619_v31 = vpop.f32.mrf.mxu1  ;;  %v758_v57 = vpop.f32.mrf.mxu0 }
 0x1e3   : > { %v766_v3 = vpack.c.bf16 %v758_v57, %v756_v21 }
 0x1e5   : > { %824 = vmatmul.bf16.vlgmr.msrb.gmra.mxu2 %v766_v3 }
 0x1e6   : > { %1446 = vmatpush.bf16.msra.mxu0 %v4260_v62  ;;  %1046 = vmatpush.bf16.msrb.mxu2 %v3962_v1 }
 0x1ea   : > { %v761_v23 = vpop.f32.mrf.mxu0  ;;  %v875_v34 = vpop.f32.mrf.mxu1  ;;  %1047 = vmatpush.bf16.msrb.mxu2 %v3979_v16 }
 0x1ed   : > { %3122 = vmatmul.msk.bf16.gmra.mxu0 %vm528_vm2, %v4309_v61  ;;  %3123 = vmatmul.msk.bf16.vlgmr.msrb.gmra.mxu1 %vm528_vm2, %v4318_v28 }
 0x1ee   : > { %1513 = vmatpush.bf16.msrb.mxu1 %v4164_v0  ;;  %1048 = vmatpush.bf16.msrb.mxu2 %v3989_v33 }
 0x1f2   : > { %1514 = vmatpush.bf16.msrb.mxu1 %v4228_v15  ;;  %v763_v8 = vpop.f32.mrf.mxu0  ;;  %v877_v1 = vpop.f32.mrf.mxu1  ;;  %1049 = vmatpush.bf16.msrb.mxu2 %v6537_v6 }
 0x1f3   : > { %v885_v62 = vpack.c.bf16 %v877_v1, %v875_v34  ;;  %v767_v30 = vpack.c.bf16 %v763_v8, %v761_v23 }
 0x1f5   : > { %829 = vmatmul.bf16.gmra.mxu2 %v767_v30  ;;  %895 = vmatmul.bf16.vlgmr.msrb.gmra.mxu3 %v885_v62 }
 0x1f6   : > { %1515 = vmatpush.bf16.msrb.mxu1 %v4262_v24  ;;  %1050 = vmatpush.bf16.msrb.mxu2 %v6538_v36 }
 0x1f7   : > { %1088 = vmatpush.bf16.msrb.mxu3 %v4353_v26 }
 0x1fa   : > { %v880_v45 = vpop.f32.mrf.mxu1  ;;  %v917_v27 = vpop.f32.mrf.mxu0  ;;  %1051 = vmatpush.bf16.msrb.mxu2 %v6539_v40 }
 0x1fb   : > { %1089 = vmatpush.bf16.msrb.mxu3 %v4360_v9 }
 0x1fd   : > { %3124 = vmatmul.msk.bf16.gmra.mxu1 %vm528_vm2, %v4330_v51  ;;  %3125 = vmatmul.msk.bf16.vlgmr.msrb.gmra.mxu0 %vm528_vm2, %v4249_v49 }
 0x1fe   : > { %1555 = vmatpush.bf16.msrb.mxu0 %v4164_v0  ;;  %1052 = vmatpush.bf16.msrb.mxu2 %v6540_v42 }
 0x1ff   : > { %1090 = vmatpush.bf16.msrb.mxu3 %v4367_v14 }
 0x202   : > { %1556 = vmatpush.bf16.msrb.mxu0 %v4228_v15  ;;  %v882_v55 = vpop.f32.mrf.mxu1  ;;  %v919_v7 = vpop.f32.mrf.mxu0  ;;  %1053 = vmatpush.bf16.msrb.mxu2 %v6541_v58 }
 0x203   : > { %v927_v10 = vpack.c.bf16 %v919_v7, %v917_v27  ;;  %v886_v22 = vpack.c.bf16 %v882_v55, %v880_v45  ;;  %1091 = vmatpush.bf16.msrb.mxu3 %v4374_v50  ;;  %v4622_v45 = vld [vmem:[%s6463_s2 + $0x30] sm:$0xff]  ;;  %v4642_v7 = vld [vmem:[%s6463_s2 + $0x20] sm:$0xff] }
 0x205   : > { %899 = vmatmul.bf16.gmra.mxu3 %v886_v22  ;;  %937 = vmatmul.bf16.vlgmr.msra.gmra.mxu2 %v927_v10 }
 0x206   : > { %1557 = vmatpush.bf16.msrb.mxu0 %v4262_v24  ;;  %1136 = vmatpush.bf16.msra.mxu2 %v4403_v59 }
 0x207   : > { %1092 = vmatpush.bf16.msrb.mxu3 %v4384_v12 }
 0x20a   : > { %v922_v18 = vpop.f32.mrf.mxu0  ;;  %v965_v52 = vpop.f32.mrf.mxu1  ;;  %1137 = vmatpush.bf16.msra.mxu2 %v4416_v60 }
 0x20b   : > { %1093 = vmatpush.bf16.msrb.mxu3 %v4391_v41 }
 0x20d   : > { %3126 = vmatmul.msk.bf16.gmra.mxu0 %vm528_vm2, %v4296_v39  ;;  %3127 = vmatmul.msk.bf16.vlgmr.msra.gmra.mxu1 %vm528_vm2, %v4283_v4 }
 0x20e   : > { %1603 = vmatpush.bf16.msra.mxu1 %v4164_v0  ;;  %1138 = vmatpush.bf16.msra.mxu2 %v4428_v63  ;;  %v4557_v0 = vld [vmem:[%s6463_s2 + $0x38] sm:$0xff] }
 0x20f   : > { %1094 = vmatpush.bf16.msrb.mxu3 %v4398_v47 }
 0x212   : > { %1604 = vmatpush.bf16.msra.mxu1 %v4228_v15  ;;  %v924_v5 = vpop.f32.mrf.mxu0  ;;  %v967_v54 = vpop.f32.mrf.mxu1  ;;  %1139 = vmatpush.bf16.msra.mxu2 %v4436_v37 }
 0x213   : > { %v975_v48 = vpack.c.bf16 %v967_v54, %v965_v52  ;;  %v928_v35 = vpack.c.bf16 %v924_v5, %v922_v18  ;;  %1095 = vmatpush.bf16.msrb.mxu3 %v4411_v53  ;;  %v4650_v18 = vld [vmem:[%s6463_s2 + $0x18] sm:$0xff]  ;;  %v4657_v54 = vld [vmem:[%s6463_s2 + $0x10] sm:$0xff] }
 0x215   : > { %942 = vmatmul.bf16.gmra.mxu2 %v928_v35  ;;  %985 = vmatmul.bf16.vlgmr.msra.gmra.mxu3 %v975_v48  ;;  %v4669_v48 = vld [vmem:[%s6463_s2 + $0x8] sm:$0xff] }
 0x216   : > { %1605 = vmatpush.bf16.msra.mxu1 %v4262_v24  ;;  %1140 = vmatpush.bf16.msra.mxu2 %v4444_v29 }
 0x217   : > { %1205 = vmatpush.bf16.msra.mxu3 %v4557_v0 }
 0x21a   : > { %v970_v15 = vpop.f32.mrf.mxu1  ;;  %v1034_v56 = vpop.f32.mrf.mxu0  ;;  %1141 = vmatpush.bf16.msra.mxu2 %v4452_v32 }
 0x21b   : > { %1206 = vmatpush.bf16.msra.mxu3 %v3979_v16 }
 0x21d   : > { %3128 = vmatmul.msk.bf16.gmra.mxu1 %vm528_vm2, %v4309_v61  ;;  %3129 = vmatmul.msk.bf16.vlgmr.msra.gmra.mxu0 %vm528_vm2, %v4318_v28 }
 0x21e   : > { %1678 = vmatpush.bf16.msra.mxu0 %v4233_v38  ;;  %1142 = vmatpush.bf16.msra.mxu2 %v4463_v43 }
 0x21f   : > { %1207 = vmatpush.bf16.msra.mxu3 %v3989_v33 }
 0x222   : > { %1679 = vmatpush.bf16.msra.mxu0 %v4251_v17  ;;  %v972_v24 = vpop.f32.mrf.mxu1  ;;  %v1036_v46 = vpop.f32.mrf.mxu0  ;;  %1143 = vmatpush.bf16.msra.mxu2 %v4471_v11 }
 0x223   : > { %v1044_v21 = vpack.c.bf16 %v1036_v46, %v1034_v56  ;;  %v976_v16 = vpack.c.bf16 %v972_v24, %v970_v15  ;;  %1208 = vmatpush.bf16.msra.mxu3 %v6537_v6  ;;  %v4584_v6 = vpop.f32.mrf.mxu3  ;;  %v4677_v56 = vld [vmem:[%s6463_s2] sm:$0xff] }
 0x225   : > { %990 = vmatmul.bf16.gmra.mxu3 %v976_v16  ;;  %1054 = vmatmul.bf16.vlgmr.msrb.gmra.mxu2 %v1044_v21 }
 0x226   : > { %1680 = vmatpush.bf16.msra.mxu0 %v4278_v44  ;;  %1247 = vmatpush.bf16.msrb.mxu2 %v4353_v26 }
 0x227   : > { %1209 = vmatpush.bf16.msra.mxu3 %v6538_v36 }
 0x22a   : > { %v1039_v31 = vpop.f32.mrf.mxu0  ;;  %v1076_v33 = vpop.f32.mrf.mxu1  ;;  %1248 = vmatpush.bf16.msrb.mxu2 %v4360_v9 }
 0x22b   : > { %1210 = vmatpush.bf16.msra.mxu3 %v6539_v40 }
 0x22d   : > { %3130 = vmatmul.msk.bf16.gmra.mxu0 %vm528_vm2, %v4330_v51  ;;  %3131 = vmatmul.msk.bf16.vlgmr.msrb.gmra.mxu1 %vm528_vm2, %v4249_v49 }
 0x22e   : > { %1720 = vmatpush.bf16.msrb.mxu1 %v4233_v38  ;;  %1249 = vmatpush.bf16.msrb.mxu2 %v4367_v14 }
 0x22f   : > { %1211 = vmatpush.bf16.msra.mxu3 %v6540_v42  ;;  %v4592_v42 = vpop.f32.mrf.mxu3 }
 0x230   : > { %2281 = vrot.lane.b32.xlu0 %v4592_v42, %s3856_s11  ;;  %2097 = vrot.lane.b32.xlu2 %v4592_v42, %s3857_s16 }
 0x232   : > { %1721 = vmatpush.bf16.msrb.mxu1 %v4251_v17  ;;  %v1041_v36 = vpop.f32.mrf.mxu0  ;;  %v1078_v57 = vpop.f32.mrf.mxu1  ;;  %1250 = vmatpush.bf16.msrb.mxu2 %v4374_v50 }
 0x233   : > { %v1086_v40 = vpack.c.bf16 %v1078_v57, %v1076_v33  ;;  %v1045_v3 = vpack.c.bf16 %v1041_v36, %v1039_v31  ;;  %1212 = vmatpush.bf16.msra.mxu3 %v6541_v58  ;;  %v6543_v57 = vld [vmem:[#allocation2_spill] sm:$0xff] }
 0x234   : > { %vm2015_vm3 = vcmp.lt.s32.totalorder %v6543_v57, 5  ;;  %vm2001_vm4 = vcmp.lt.s32.totalorder %v6543_v57, 3  ;;  %vm1987_vm5 = vcmp.lt.s32.totalorder %v6543_v57, 2  ;;  %vm1973_vm6 = vcmp.lt.s32.totalorder %v6543_v57, 6 }
 0x235   : > { %1058 = vmatmul.bf16.gmra.mxu2 %v1045_v3  ;;  %1096 = vmatmul.bf16.vlgmr.msrb.gmra.mxu3 %v1086_v40 }
 0x236   : > { %1722 = vmatpush.bf16.msrb.mxu1 %v4278_v44  ;;  %1251 = vmatpush.bf16.msrb.mxu2 %v4384_v12 }
 0x237   : > { %1295 = vmatpush.bf16.msrb.mxu3 %v4403_v59  ;;  %v4607_v58 = vpop.f32.mrf.mxu3 }
 0x238   : > { %2283 = vrot.lane.b32.xlu1 %v4607_v58, %s3856_s11  ;;  %2099 = vrot.lane.b32.xlu0 %v4607_v58, %s3857_s16 }
 0x23a   : > { %v1081_v23 = vpop.f32.mrf.mxu1  ;;  %v1124_v34 = vpop.f32.mrf.mxu0  ;;  %1252 = vmatpush.bf16.msrb.mxu2 %v4391_v41 }
 0x23b   : > { %1296 = vmatpush.bf16.msrb.mxu3 %v4416_v60 }
 0x23d   : > { %3132 = vmatmul.msk.bf16.gmra.mxu1 %vm528_vm2, %v4296_v39  ;;  %3133 = vmatmul.msk.bf16.vlgmr.msrb.gmra.mxu0 %vm528_vm2, %v4283_v4 }
 0x23e   : > { %1768 = vmatpush.bf16.msrb.mxu0 %v4233_v38  ;;  %1253 = vmatpush.bf16.msrb.mxu2 %v4398_v47 }
 0x23f   : > { %1297 = vmatpush.bf16.msrb.mxu3 %v4428_v63  ;;  %v4693_v33 = vpop.f32.mrf.mxu3 }
 0x242   : > { %1769 = vmatpush.bf16.msrb.mxu0 %v4251_v17  ;;  %v1083_v8 = vpop.f32.mrf.mxu1  ;;  %v1126_v1 = vpop.f32.mrf.mxu0  ;;  %1254 = vmatpush.bf16.msrb.mxu2 %v4411_v53 }
 0x243   : > { %v1134_v62 = vpack.c.bf16 %v1126_v1, %v1124_v34  ;;  %v1087_v30 = vpack.c.bf16 %v1083_v8, %v1081_v23  ;;  %1298 = vmatpush.bf16.msrb.mxu3 %v4436_v37 }
 0x245   : > { %1101 = vmatmul.bf16.gmra.mxu3 %v1087_v30  ;;  %1144 = vmatmul.bf16.vlgmr.msra.gmra.mxu2 %v1134_v62 }
 0x246   : > { %1770 = vmatpush.bf16.msrb.mxu0 %v4278_v44  ;;  %1370 = vmatpush.bf16.msra.mxu2 %v4557_v0  ;;  %v4634_v44 = vld [vmem:[%s6463_s2 + $0x28] sm:$0xff] }
 0x247   : > { %1299 = vmatpush.bf16.msrb.mxu3 %v4444_v29 }
 0x24a   : > { %v1129_v38 = vpop.f32.mrf.mxu0  ;;  %v1193_v17 = vpop.f32.mrf.mxu1  ;;  %1371 = vmatpush.bf16.msra.mxu2 %v4622_v45 }
 0x24b   : > { %1300 = vmatpush.bf16.msrb.mxu3 %v4452_v32 }
 0x24d   : > { %3134 = vmatmul.msk.bf16.gmra.mxu0 %vm528_vm2, %v4309_v61  ;;  %3135 = vmatmul.msk.bf16.vlgmr.msra.gmra.mxu1 %vm528_vm2, %v4318_v28 }
 0x24e   : > { %1831 = vmatpush.bf16.msra.mxu1 %v4275_v25  ;;  %1372 = vmatpush.bf16.msra.mxu2 %v4634_v44 }
 0x24f   : > { %1301 = vmatpush.bf16.msrb.mxu3 %v4463_v43 }
 0x252   : > { %1832 = vmatpush.bf16.msra.mxu1 %v4285_v2  ;;  %v1131_v27 = vpop.f32.mrf.mxu0  ;;  %v1195_v55 = vpop.f32.mrf.mxu1  ;;  %1373 = vmatpush.bf16.msra.mxu2 %v4642_v7 }
 0x253   : > { %v1203_v10 = vpack.c.bf16 %v1195_v55, %v1193_v17  ;;  %v1135_v22 = vpack.c.bf16 %v1131_v27, %v1129_v38  ;;  %1302 = vmatpush.bf16.msrb.mxu3 %v4471_v11 }
 0x255   : > { %1149 = vmatmul.bf16.gmra.mxu2 %v1135_v22  ;;  %1213 = vmatmul.bf16.vlgmr.msra.gmra.mxu3 %v1203_v10 }
 0x256   : > { %1833 = vmatpush.bf16.msra.mxu1 %v4287_v19  ;;  %1374 = vmatpush.bf16.msra.mxu2 %v4650_v18 }
 0x257   : > { %1412 = vmatpush.bf16.msra.mxu3 %v4353_v26 }
 0x25a   : > { %v1198_v52 = vpop.f32.mrf.mxu1  ;;  %v1235_v5 = vpop.f32.mrf.mxu0  ;;  %1375 = vmatpush.bf16.msra.mxu2 %v4657_v54 }
 0x25b   : > { %1413 = vmatpush.bf16.msra.mxu3 %v4360_v9 }
 0x25d   : > { %3136 = vmatmul.msk.bf16.gmra.mxu1 %vm528_vm2, %v4330_v51  ;;  %3137 = vmatmul.msk.bf16.vlgmr.msra.gmra.mxu0 %vm528_vm2, %v4249_v49 }
 0x25e   : > { %1873 = vmatpush.bf16.msra.mxu0 %v4275_v25  ;;  %1376 = vmatpush.bf16.msra.mxu2 %v4669_v48 }
 0x25f   : > { %1414 = vmatpush.bf16.msra.mxu3 %v4367_v14 }
 0x262   : > { %1874 = vmatpush.bf16.msra.mxu0 %v4285_v2  ;;  %v1200_v35 = vpop.f32.mrf.mxu1  ;;  %v1237_v15 = vpop.f32.mrf.mxu0  ;;  %1377 = vmatpush.bf16.msra.mxu2 %v4677_v56 }
 0x263   : > { %v1245_v24 = vpack.c.bf16 %v1237_v15, %v1235_v5  ;;  %v1204_v46 = vpack.c.bf16 %v1200_v35, %v1198_v52  ;;  %1415 = vmatpush.bf16.msra.mxu3 %v4374_v50 }
 0x265   : > { %1217 = vmatmul.bf16.gmra.mxu3 %v1204_v46  ;;  %1255 = vmatmul.bf16.vlgmr.msrb.gmra.mxu2 %v1245_v24 }
 0x266   : > { %1875 = vmatpush.bf16.msra.mxu0 %v4287_v19  ;;  %1460 = vmatpush.bf16.msrb.mxu2 %v4403_v59 }
 0x267   : > { %1416 = vmatpush.bf16.msra.mxu3 %v4384_v12 }
 0x268   : > { %v4684_v21 = vpop.f32.mrf.mxu2 }
 0x269   : > { %v2737_v40 = vrot.slane %v4684_v21, 3 }
 0x26a   : > { %v1240_v16 = vpop.f32.mrf.mxu0  ;;  %v1283_v31 = vpop.f32.mrf.mxu1  ;;  %1461 = vmatpush.bf16.msrb.mxu2 %v4416_v60 }
 0x26b   : > { %1417 = vmatpush.bf16.msra.mxu3 %v4391_v41 }
 0x26d   : > { %3138 = vmatmul.msk.bf16.gmra.mxu0 %vm528_vm2, %v4296_v39  ;;  %3139 = vmatmul.msk.bf16.vlgmr.msrb.gmra.mxu1 %vm528_vm2, %v4283_v4 }
 0x26e   : > { %1921 = vmatpush.bf16.msrb.mxu1 %v4275_v25  ;;  %1462 = vmatpush.bf16.msrb.mxu2 %v4428_v63 }
 0x26f   : > { %1418 = vmatpush.bf16.msra.mxu3 %v4398_v47 }
 0x270   : > { %v4697_v36 = vpop.f32.mrf.mxu2 }
 0x271   : > { %v2738_v3 = vrot.slane %v4697_v36, 3  ;;  %2649 = vrot.lane.b32.xlu2 %v4697_v36, %s3858_s4  ;;  %2465 = vrot.lane.b32.xlu1 %v4697_v36, %s3859_s5  ;;  %v2553_v30 = vrot.slane %v4697_v36, 5 }
 0x272   : > { %1922 = vmatpush.bf16.msrb.mxu1 %v4285_v2  ;;  %v1242_v25 = vpop.f32.mrf.mxu0  ;;  %v1285_v23 = vpop.f32.mrf.mxu1  ;;  %1463 = vmatpush.bf16.msrb.mxu2 %v4436_v37 }
 0x273   : > { %v4710_v34 = vsel %vm2015_vm3, %v2737_v40, %v2738_v3  ;;  %v1293_v8 = vpack.c.bf16 %v1285_v23, %v1283_v31  ;;  %v1246_v1 = vpack.c.bf16 %v1242_v25, %v1240_v16  ;;  %1419 = vmatpush.bf16.msra.mxu3 %v4411_v53 }
 0x274   : > { %6544 = vst [vmem:[#allocation4_spill] sm:$0xff] %v4710_v34 }
 0x275   : > { %1260 = vmatmul.bf16.gmra.mxu2 %v1246_v1  ;;  %1303 = vmatmul.bf16.vlgmr.msrb.gmra.mxu3 %v1293_v8 }
 0x276   : > { %1923 = vmatpush.bf16.msrb.mxu1 %v4287_v19  ;;  %1464 = vmatpush.bf16.msrb.mxu2 %v4444_v29 }
 0x277   : > { %1529 = vmatpush.bf16.msrb.mxu3 %v4557_v0 }
 0x278   : > { %v4716_v2 = vpop.f32.mrf.mxu2  ;;  %v896_v62 = vpop.f32.mrf.mxu3 }
 0x279   : > { %v2554_v38 = vrot.slane %v4716_v2, 5  ;;  %v2739_v17 = vrot.slane %v4716_v2, 3  ;;  %2651 = vrot.lane.b32.xlu0 %v4716_v2, %s3858_s4  ;;  %2467 = vrot.lane.b32.xlu2 %v4716_v2, %s3859_s5 }
 0x27a   : > { %v1288_v19 = vpop.f32.mrf.mxu1  ;;  %v1358_v27 = vpop.f32.mrf.mxu0  ;;  %1465 = vmatpush.bf16.msrb.mxu2 %v4452_v32 }
 0x27b   : > { %v4729_v55 = vsel %vm2001_vm4, %v2553_v30, %v2554_v38  ;;  %v4733_v10 = vsel %vm2015_vm3, %v2738_v3, %v2739_v17  ;;  %1530 = vmatpush.bf16.msrb.mxu3 %v4622_v45  ;;  %v727_v3 = vmul.f32 %v4584_v6, %v4584_v6 }
 0x27c   : > { %6545 = vst [vmem:[#allocation5_spill] sm:$0xff] %v4729_v55 }
 0x27d   : > { %6546 = vst [vmem:[#allocation6_spill] sm:$0xff] %v4733_v10  ;;  %3140 = vmatmul.msk.bf16.gmra.mxu1 %vm528_vm2, %v4309_v61  ;;  %3141 = vmatmul.msk.bf16.vlgmr.msrb.gmra.mxu0 %vm528_vm2, %v4318_v28 }
 0x27e   : > { %1466 = vmatpush.bf16.msrb.mxu2 %v4463_v43 }
 0x27f   : > { %1531 = vmatpush.bf16.msrb.mxu3 %v4634_v44 }
 0x280   : > { %v4742_v22 = vpop.f32.mrf.mxu2  ;;  %v4744_v52 = vpop.f32.mrf.mxu3 }
 0x281   : > { %6547 = vst [vmem:[#allocation7_spill] sm:$0xff] %v4744_v52  ;;  %v2555_v5 = vrot.slane %v4742_v22, 5 }
 0x282   : > { %v1290_v35 = vpop.f32.mrf.mxu1  ;;  %v1360_v15 = vpop.f32.mrf.mxu0  ;;  %1467 = vmatpush.bf16.msrb.mxu2 %v4471_v11 }
 0x283   : > { %v4750_v24 = vsel %vm2001_vm4, %v2554_v38, %v2555_v5  ;;  %v1368_v46 = vpack.c.bf16 %v1360_v15, %v1358_v27  ;;  %v1294_v16 = vpack.c.bf16 %v1290_v35, %v1288_v19  ;;  %1532 = vmatpush.bf16.msrb.mxu3 %v4642_v7  ;;  %v729_v15 = vmul.f32 %v4607_v58, %v4607_v58 }
 0x284   : > { %6548 = vst [vmem:[#allocation2_spill] sm:$0xff] %v4750_v24 }
 0x285   : > { %1308 = vmatmul.bf16.gmra.mxu3 %v1294_v16  ;;  %1378 = vmatmul.bf16.vlgmr.msra.gmra.mxu2 %v1368_v46  ;;  %v835_v46 = vmul.f32 %v4684_v21, %v4684_v21 }
 0x286   : > { %1571 = vmatpush.bf16.msra.mxu2 %v4353_v26 }
 0x287   : > { %1533 = vmatpush.bf16.msrb.mxu3 %v4650_v18 }
 0x288   : > { %v4755_v31 = vpop.f32.mrf.mxu3  ;;  %v938_v40 = vpop.f32.mrf.mxu2 }
 0x289   : > { %v948_v25 = vmul.f32 %v938_v40, %v938_v40  ;;  %v2381_v38 = vrot.slane %v938_v40, 6 }
 0x28a   : > { %v1363_v23 = vpop.f32.mrf.mxu0  ;;  %v1400_v8 = vpop.f32.mrf.mxu1  ;;  %1572 = vmatpush.bf16.msra.mxu2 %v4360_v9 }
 0x28b   : > { %v4760_v1 = vadd.f32 %v948_v25, %v727_v3  ;;  %1534 = vmatpush.bf16.msrb.mxu3 %v4657_v54 }
 0x28d   : > { %3142 = vmatmul.msk.bf16.gmra.mxu0 %vm528_vm2, %v4330_v51  ;;  %3143 = vmatmul.msk.bf16.vlgmr.msra.gmra.mxu1 %vm528_vm2, %v4249_v49 }
 0x28e   : > { %1573 = vmatpush.bf16.msra.mxu2 %v4367_v14 }
 0x28f   : > { %1535 = vmatpush.bf16.msrb.mxu3 %v4669_v48 }
 0x290   : > { %v902_v62 = vpop.f32.mrf.mxu3  ;;  %v4769_v30 = vpop.f32.mrf.mxu2 }
 0x291   : > { %v2382_v17 = vrot.slane %v4769_v30, 6  ;;  %2292 = vrot.lane.b32.xlu2 %v4769_v30, %s3856_s11  ;;  %2108 = vrot.lane.b32.xlu1 %v4769_v30, %s3857_s16  ;;  %v2197_v16 = vrot.slane %v4769_v30, 2 }
 0x292   : > { %v1365_v19 = vpop.f32.mrf.mxu0  ;;  %v1402_v49 = vpop.f32.mrf.mxu1  ;;  %1574 = vmatpush.bf16.msra.mxu2 %v4374_v50 }
 0x293   : > { %v4780_v27 = vsel %vm1987_vm5, %v2381_v38, %v2382_v17  ;;  %v1369_v5 = vpack.c.bf16 %v1365_v19, %v1363_v23  ;;  %v1410_v35 = vpack.c.bf16 %v1402_v49, %v1400_v8  ;;  %1536 = vmatpush.bf16.msrb.mxu3 %v4677_v56 }
 0x294   : > { %6549 = vst [vmem:[#allocation8_spill] sm:$0xff] %v4780_v27 }
 0x295   : > { %1382 = vmatmul.bf16.gmra.mxu2 %v1369_v5  ;;  %1420 = vmatmul.bf16.vlgmr.msra.gmra.mxu3 %v1410_v35 }
 0x296   : > { %1575 = vmatpush.bf16.msra.mxu2 %v4384_v12 }
 0x297   : > { %1619 = vmatpush.bf16.msra.mxu3 %v4403_v59 }
 0x298   : > { %v943_v40 = vpop.f32.mrf.mxu2  ;;  %v986_v3 = vpop.f32.mrf.mxu3 }
 0x299   : > { %v950_v25 = vmul.f32 %v943_v40, %v943_v40  ;;  %v2198_v23 = vrot.slane %v943_v40, 2  ;;  %v2383_v8 = vrot.slane %v943_v40, 6  ;;  %v996_v62 = vmul.f32 %v986_v3, %v986_v3  ;;  %2294 = vrot.lane.b32.xlu0 %v943_v40, %s3856_s11  ;;  %2110 = vrot.lane.b32.xlu2 %v943_v40, %s3857_s16 }
 0x29a   : > { %v1405_v38 = vpop.f32.mrf.mxu1  ;;  %v1448_v19 = vpop.f32.mrf.mxu0  ;;  %1576 = vmatpush.bf16.msra.mxu2 %v4391_v41  ;;  %v836_v40 = vmul.f32 %v4697_v36, %v4697_v36 }
 0x29b   : > { %1620 = vmatpush.bf16.msra.mxu3 %v4416_v60  ;;  %v4795_v21 = vadd.f32 %v950_v25, %v729_v15  ;;  %v4799_v49 = vsel %vm1973_vm6, %v2197_v16, %v2198_v23  ;;  %v4803_v5 = vsel %vm1987_vm5, %v2382_v17, %v2383_v8  ;;  %v4805_v35 = vadd.f32 %v996_v62, %v835_v46 }
 0x29c   : > { %6550 = vst [vmem:[#allocation9_spill] sm:$0xff] %v4799_v49 }
 0x29d   : > { %6551 = vst [vmem:[#allocation10_spill] sm:$0xff] %v4803_v5  ;;  %3144 = vmatmul.msk.bf16.gmra.mxu1 %vm528_vm2, %v4296_v39  ;;  %3145 = vmatmul.msk.bf16.vlgmr.msra.gmra.mxu0 %vm528_vm2, %v4283_v4  ;;  %v2749_v39 = vrot.slane %v986_v3, 3  ;;  %v837_v3 = vmul.f32 %v4716_v2, %v4716_v2 }
 0x29e   : > { %1577 = vmatpush.bf16.msra.mxu2 %v4398_v47 }
 0x29f   : > { %1621 = vmatpush.bf16.msra.mxu3 %v4428_v63 }
 0x2a0   : > { %v4813_v15 = vpop.f32.mrf.mxu2  ;;  %v988_v16 = vpop.f32.mrf.mxu3 }
 0x2a1   : > { %v2199_v17 = vrot.slane %v4813_v15, 2  ;;  %v997_v46 = vmul.f32 %v988_v16, %v988_v16  ;;  %2660 = vrot.lane.b32.xlu1 %v988_v16, %s3858_s4  ;;  %2476 = vrot.lane.b32.xlu0 %v988_v16, %s3859_s5  ;;  %v2750_v25 = vrot.slane %v988_v16, 3 }
 0x2a2   : > { %v1407_v4 = vpop.f32.mrf.mxu1  ;;  %v1450_v8 = vpop.f32.mrf.mxu0  ;;  %1578 = vmatpush.bf16.msra.mxu2 %v4411_v53 }
 0x2a3   : > { %1622 = vmatpush.bf16.msra.mxu3 %v4436_v37  ;;  %v4824_v62 = vsel %vm1973_vm6, %v2198_v23, %v2199_v17  ;;  %v4826_v36 = vadd.f32 %v997_v46, %v836_v40  ;;  %v1411_v34 = vpack.c.bf16 %v1407_v4, %v1405_v38  ;;  %v4830_v55 = vsel %vm2015_vm3, %v2749_v39, %v2750_v25 }
 0x2a4   : > { %6552 = vst [vmem:[#allocation11_spill] sm:$0xff] %v4830_v55  ;;  %v1458_v27 = vpack.c.bf16 %v1450_v8, %v1448_v19  ;;  %v2565_v17 = vrot.slane %v988_v16, 5  ;;  %v838_v4 = vmul.f32 %v4742_v22, %v4742_v22 }
 0x2a5   : > { %1425 = vmatmul.bf16.gmra.mxu3 %v1411_v34 }
 0x2a6   : > { %1468 = vmatmul.bf16.vlgmr.msrb.gmra.mxu2 %v1458_v27 }
 0x2a7   : > { %1623 = vmatpush.bf16.msra.mxu3 %v4444_v29  ;;  %1694 = vmatpush.bf16.msrb.mxu2 %v4557_v0 }
 0x2a8   : > { %v991_v49 = vpop.f32.mrf.mxu3  ;;  %v1055_v23 = vpop.f32.mrf.mxu2 }
 0x2a9   : > { %v998_v40 = vmul.f32 %v991_v49, %v991_v49  ;;  %v2566_v46 = vrot.slane %v991_v49, 5  ;;  %v2751_v38 = vrot.slane %v991_v49, 3  ;;  %2662 = vrot.lane.b32.xlu2 %v991_v49, %s3858_s4  ;;  %2478 = vrot.lane.b32.xlu1 %v991_v49, %s3859_s5 }
 0x2aa   : > { %v1453_v19 = vpop.f32.mrf.mxu0  ;;  %v1517_v34 = vpop.f32.mrf.mxu1 }
 0x2ab   : > { %1624 = vmatpush.bf16.msra.mxu3 %v4452_v32  ;;  %v4839_v27 = vadd.f32 %v998_v40, %v837_v3  ;;  %v4843_v39 = vsel %vm2001_vm4, %v2565_v17, %v2566_v46  ;;  %v4847_v2 = vsel %vm2015_vm3, %v2750_v25, %v2751_v38  ;;  %1695 = vmatpush.bf16.msrb.mxu2 %v4622_v45 }
 0x2ac   : > { %6553 = vst [vmem:[#allocation12_spill] sm:$0xff] %v4843_v39 }
 0x2ad   : > { %6554 = vst [vmem:[#allocation13_spill] sm:$0xff] %v4847_v2  ;;  %3146 = vmatmul.msk.bf16.gmra.mxu0 %vm528_vm2, %v4309_v61  ;;  %3147 = vmatmul.msk.bf16.vlgmr.msrb.gmra.mxu1 %vm528_vm2, %v4318_v28 }
 0x2af   : > { %1625 = vmatpush.bf16.msra.mxu3 %v4463_v43  ;;  %1696 = vmatpush.bf16.msrb.mxu2 %v4634_v44 }
 0x2b0   : > { %v993_v49 = vpop.f32.mrf.mxu3  ;;  %v4856_v16 = vpop.f32.mrf.mxu2 }
 0x2b1   : > { %6555 = vst [vmem:[#allocation14_spill] sm:$0xff] %v4856_v16  ;;  %v999_v25 = vmul.f32 %v993_v49, %v993_v49  ;;  %v2567_v8 = vrot.slane %v993_v49, 5 }
 0x2b2   : > { %v1455_v3 = vpop.f32.mrf.mxu0  ;;  %v1519_v23 = vpop.f32.mrf.mxu1 }
 0x2b3   : > { %1626 = vmatpush.bf16.msra.mxu3 %v4471_v11  ;;  %v4861_v61 = vadd.f32 %v999_v25, %v838_v4  ;;  %v4865_v28 = vsel %vm2001_vm4, %v2566_v46, %v2567_v8  ;;  %v1459_v17 = vpack.c.bf16 %v1455_v3, %v1453_v19  ;;  %1697 = vmatpush.bf16.msrb.mxu2 %v4642_v7 }
 0x2b4   : > { %6556 = vst [vmem:[#allocation15_spill] sm:$0xff] %v4865_v28  ;;  %v1527_v40 = vpack.c.bf16 %v1519_v23, %v1517_v34  ;;  %v949_v46 = vmul.f32 %v4769_v30, %v4769_v30 }
 0x2b6   : > { %1473 = vmatmul.bf16.gmra.mxu2 %v1459_v17  ;;  %1537 = vmatmul.bf16.vlgmr.msrb.gmra.mxu3 %v1527_v40 }
 0x2b7   : > { %1698 = vmatpush.bf16.msrb.mxu2 %v4650_v18  ;;  %1736 = vmatpush.bf16.msrb.mxu3 %v4353_v26  ;;  %v728_v26 = vmul.f32 %v4592_v42, %v4592_v42 }
 0x2b8   : > { %v4870_v22 = vpop.f32.mrf.mxu2  ;;  %v1097_v38 = vpop.f32.mrf.mxu3 }
 0x2b9   : > { %v1107_v49 = vmul.f32 %v1097_v38, %v1097_v38  ;;  %v953_v34 = vadd.f32 %v949_v46, %v728_v26  ;;  %v2393_v8 = vrot.slane %v1097_v38, 6 }
 0x2ba   : > { %v1522_v4 = vpop.f32.mrf.mxu1  ;;  %v1559_v25 = vpop.f32.mrf.mxu0 }
 0x2bb   : > { %v4873_v55 = vadd.f32 %v1107_v49, %v4760_v1  ;;  %1699 = vmatpush.bf16.msrb.mxu2 %v4657_v54  ;;  %1737 = vmatpush.bf16.msrb.mxu3 %v4360_v9 }
 0x2bd   : > { %3148 = vmatmul.msk.bf16.gmra.mxu1 %vm528_vm2, %v4330_v51 }
 0x2bf   : > { %1700 = vmatpush.bf16.msrb.mxu2 %v4669_v48  ;;  %1738 = vmatpush.bf16.msrb.mxu3 %v4367_v14 }
 0x2c0   : > { %v1061_v19 = vpop.f32.mrf.mxu2  ;;  %v1099_v1 = vpop.f32.mrf.mxu3 }
 0x2c1   : > { %v1108_v3 = vmul.f32 %v1099_v1, %v1099_v1  ;;  %v2394_v23 = vrot.slane %v1099_v1, 6  ;;  %2303 = vrot.lane.b32.xlu1 %v1099_v1, %s3856_s11  ;;  %2119 = vrot.lane.b32.xlu0 %v1099_v1, %s3857_s16  ;;  %v2209_v38 = vrot.slane %v1099_v1, 2 }
 0x2c2   : > { %v1524_v9 = vpop.f32.mrf.mxu1  ;;  %v1561_v30 = vpop.f32.mrf.mxu0 }
 0x2c3   : > { %v4887_v51 = vadd.f32 %v1108_v3, %v953_v34  ;;  %v4891_v17 = vsel %vm1987_vm5, %v2393_v8, %v2394_v23  ;;  %v1528_v40 = vpack.c.bf16 %v1524_v9, %v1522_v4  ;;  %v1569_v14 = vpack.c.bf16 %v1561_v30, %v1559_v25  ;;  %1701 = vmatpush.bf16.msrb.mxu2 %v4677_v56 }
 0x2c4   : > { %6557 = vst [vmem:[#allocation16_spill] sm:$0xff] %v4891_v17  ;;  %1739 = vmatpush.bf16.msrb.mxu3 %v4374_v50  ;;  %v951_v3 = vmul.f32 %v4813_v15, %v4813_v15 }
 0x2c6   : > { %1541 = vmatmul.bf16.gmra.mxu3 %v1528_v40  ;;  %1579 = vmatmul.bf16.vlgmr.msra.gmra.mxu2 %v1569_v14 }
 0x2c7   : > { %1784 = vmatpush.bf16.msra.mxu2 %v4403_v59 }
 0x2c8   : > { %v1102_v49 = vpop.f32.mrf.mxu3  ;;  %v1145_v46 = vpop.f32.mrf.mxu2  ;;  %1740 = vmatpush.bf16.msrb.mxu3 %v4384_v12 }
 0x2c9   : > { %v1109_v26 = vmul.f32 %v1102_v49, %v1102_v49  ;;  %v2210_v19 = vrot.slane %v1102_v49, 2  ;;  %v2395_v34 = vrot.slane %v1102_v49, 6  ;;  %v1155_v8 = vmul.f32 %v1145_v46, %v1145_v46  ;;  %2305 = vrot.lane.b32.xlu2 %v1102_v49, %s3856_s11  ;;  %2121 = vrot.lane.b32.xlu1 %v1102_v49, %s3857_s16 }
 0x2ca   : > { %v1564_v4 = vpop.f32.mrf.mxu0  ;;  %v1607_v25 = vpop.f32.mrf.mxu1 }
 0x2cb   : > { %v4900_v50 = vadd.f32 %v1109_v26, %v4795_v21  ;;  %v4904_v59 = vsel %vm1973_vm6, %v2209_v38, %v2210_v19  ;;  %v4908_v12 = vsel %vm1987_vm5, %v2394_v23, %v2395_v34  ;;  %v4911_v1 = vadd.f32 %v1155_v8, %v4805_v35  ;;  %1785 = vmatpush.bf16.msra.mxu2 %v4416_v60 }
 0x2cc   : > { %6558 = vst [vmem:[#allocation17_spill] sm:$0xff] %v4904_v59  ;;  %1741 = vmatpush.bf16.msrb.mxu3 %v4391_v41  ;;  %v730_v21 = vmul.f32 %v4693_v33, %v4693_v33  ;;  %v2761_v41 = vrot.slane %v1145_v46, 3 }
 0x2cd   : > { %6559 = vst [vmem:[#allocation18_spill] sm:$0xff] %v4908_v12 }
 0x2ce   : > { %v955_v23 = vadd.f32 %v951_v3, %v730_v21 }
 0x2cf   : > { %1786 = vmatpush.bf16.msra.mxu2 %v4428_v63 }
 0x2d0   : > { %v1104_v9 = vpop.f32.mrf.mxu3  ;;  %v4920_v30 = vpop.f32.mrf.mxu2  ;;  %1742 = vmatpush.bf16.msrb.mxu3 %v4398_v47 }
 0x2d1   : > { %v1110_v35 = vmul.f32 %v1104_v9, %v1104_v9  ;;  %v2211_v40 = vrot.slane %v1104_v9, 2  ;;  %v1156_v60 = vmul.f32 %v4920_v30, %v4920_v30  ;;  %2671 = vrot.lane.b32.xlu0 %v4920_v30, %s3858_s4  ;;  %2487 = vrot.lane.b32.xlu2 %v4920_v30, %s3859_s5  ;;  %v6477_v63 = vrot.slane %v4920_v30, 3 }
 0x2d2   : > { %v1566_v15 = vpop.f32.mrf.mxu0  ;;  %v1609_v14 = vpop.f32.mrf.mxu1 }
 0x2d3   : > { %v4930_v38 = vadd.f32 %v1110_v35, %v955_v23  ;;  %v4934_v47 = vsel %vm1973_vm6, %v2210_v19, %v2211_v40  ;;  %v4937_v49 = vadd.f32 %v1156_v60, %v4826_v36  ;;  %v1570_v26 = vpack.c.bf16 %v1566_v15, %v1564_v4  ;;  %1787 = vmatpush.bf16.msra.mxu2 %v4436_v37  ;;  %v3816_v35 = vld [vmem:[%s6463_s2 + $0x68] sm:$0xff] }
 0x2d4   : > { %v4944_v46 = vsel %vm2015_vm3, %v2761_v41, %v6477_v63  ;;  %v1617_v34 = vpack.c.bf16 %v1609_v14, %v1607_v25  ;;  %1743 = vmatpush.bf16.msrb.mxu3 %v4411_v53 }
 0x2d5   : > { %6560 = vst [vmem:[#allocation19_spill] sm:$0xff] %v4944_v46 }
 0x2d6   : > { %1584 = vmatmul.bf16.gmra.mxu2 %v1570_v26  ;;  %1627 = vmatmul.bf16.vlgmr.msra.gmra.mxu3 %v1617_v34 }
 0x2d7   : > { %1788 = vmatpush.bf16.msra.mxu2 %v4444_v29 }
 0x2d8   : > { %1847 = vmatpush.bf16.msra.mxu3 %v4557_v0  ;;  %v4949_v36 = vpop.f32.mrf.mxu2  ;;  %v1214_v19 = vpop.f32.mrf.mxu3 }
 0x2d9   : > { %2489 = vrot.lane.b32.xlu0 %v4949_v36, %s3859_s5  ;;  %v3817_v19 = vld [vmem:[%s6463_s2 + $0x60] sm:$0xff] }
 0x2da   : > { %v1612_v37 = vpop.f32.mrf.mxu1  ;;  %v1682_v8 = vpop.f32.mrf.mxu0 }
 0x2db   : > { %1789 = vmatpush.bf16.msra.mxu2 %v4452_v32 }
 0x2dc   : > { %1848 = vmatpush.bf16.msra.mxu3 %v4622_v45 }
 0x2df   : > { %1790 = vmatpush.bf16.msra.mxu2 %v4463_v43  ;;  %v3814_v43 = vld [vmem:[%s6463_s2 + $0x78] sm:$0xff] }
 0x2e0   : > { %1849 = vmatpush.bf16.msra.mxu3 %v4634_v44  ;;  %v4957_v53 = vpop.f32.mrf.mxu2  ;;  %v4959_v29 = vpop.f32.mrf.mxu3 }
 0x2e1   : > { %6561 = vst [vmem:[#allocation20_spill] sm:$0xff] %v4959_v29  ;;  %v1158_v0 = vmul.f32 %v4957_v53, %v4957_v53 }
 0x2e2   : > { %v1614_v4 = vpop.f32.mrf.mxu1  ;;  %v1684_v25 = vpop.f32.mrf.mxu0 }
 0x2e3   : > { %v4964_v3 = vadd.f32 %v1158_v0, %v4861_v61  ;;  %v1618_v21 = vpack.c.bf16 %v1614_v4, %v1612_v37  ;;  %1791 = vmatpush.bf16.msra.mxu2 %v4471_v11  ;;  %v1692_v32 = vpack.c.bf16 %v1684_v25, %v1682_v8  ;;  %v3818_v37 = vld [vmem:[%s6463_s2 + $0x58] sm:$0xff] }
 0x2e4   : > { %1850 = vmatpush.bf16.msra.mxu3 %v4642_v7  ;;  %v3815_v7 = vld [vmem:[%s6463_s2 + $0x70] sm:$0xff]  ;;  %v3819_v8 = vld [vmem:[%s6463_s2 + $0xb8] sm:$0xff] }
 0x2e6   : > { %1632 = vmatmul.bf16.gmra.mxu3 %v1618_v21  ;;  %1702 = vmatmul.bf16.vlgmr.msrb.gmra.mxu2 %v1692_v32 }
 0x2e7   : > { %1889 = vmatpush.bf16.msrb.mxu2 %v3814_v43 }
 0x2e8   : > { %v4971_v45 = vpop.f32.mrf.mxu3  ;;  %v1256_v44 = vpop.f32.mrf.mxu2  ;;  %1851 = vmatpush.bf16.msra.mxu3 %v4650_v18 }
 0x2e9   : > { %v1266_v61 = vmul.f32 %v1256_v44, %v1256_v44  ;;  %v2405_v60 = vrot.slane %v1256_v44, 6 }
 0x2ea   : > { %v1687_v9 = vpop.f32.mrf.mxu0  ;;  %v1724_v23 = vpop.f32.mrf.mxu1 }
 0x2eb   : > { %v4975_v11 = vadd.f32 %v1266_v61, %v4873_v55  ;;  %1890 = vmatpush.bf16.msrb.mxu2 %v3815_v7 }
 0x2ec   : > { %1852 = vmatpush.bf16.msra.mxu3 %v4657_v54 }
 0x2ef   : > { %1891 = vmatpush.bf16.msrb.mxu2 %v3816_v35  ;;  %v3820_v35 = vld [vmem:[%s6463_s2 + $0x50] sm:$0xff] }
 0x2f0   : > { %v1220_v40 = vpop.f32.mrf.mxu3  ;;  %v1258_v18 = vpop.f32.mrf.mxu2  ;;  %1853 = vmatpush.bf16.msra.mxu3 %v4669_v48 }
 0x2f1   : > { %v1267_v41 = vmul.f32 %v1258_v18, %v1258_v18  ;;  %v2406_v55 = vrot.slane %v1258_v18, 6  ;;  %2314 = vrot.lane.b32.xlu0 %v1258_v18, %s3856_s11  ;;  %2130 = vrot.lane.b32.xlu2 %v1258_v18, %s3857_s16  ;;  %v2221_v0 = vrot.slane %v1258_v18, 2  ;;  %v3822_v40 = vld [vmem:[%s6463_s2 + $0x48] sm:$0xff] }
 0x2f2   : > { %v1689_v15 = vpop.f32.mrf.mxu0  ;;  %v1726_v14 = vpop.f32.mrf.mxu1 }
 0x2f3   : > { %v4989_v54 = vsel %vm1987_vm5, %v2405_v60, %v2406_v55  ;;  %v1693_v26 = vpack.c.bf16 %v1689_v15, %v1687_v9  ;;  %v1734_v34 = vpack.c.bf16 %v1726_v14, %v1724_v23  ;;  %1892 = vmatpush.bf16.msrb.mxu2 %v3817_v19  ;;  %v4995_v48 = vadd.f32 %v1267_v41, %v4887_v51 }
 0x2f4   : > { %6562 = vst [vmem:[#allocation21_spill] sm:$0xff] %v4989_v54  ;;  %1854 = vmatpush.bf16.msra.mxu3 %v4677_v56 }
 0x2f6   : > { %1706 = vmatmul.bf16.gmra.mxu2 %v1693_v26  ;;  %1744 = vmatmul.bf16.vlgmr.msrb.gmra.mxu3 %v1734_v34 }
 0x2f7   : > { %1893 = vmatpush.bf16.msrb.mxu2 %v3818_v37 }
 0x2f8   : > { %3762 = vmatpush.bf16.msrb.mxu3 %v3819_v8  ;;  %v1261_v4 = vpop.f32.mrf.mxu2  ;;  %v5004_v25 = vpop.f32.mrf.mxu3 }
 0x2f9   : > { %v1268_v51 = vmul.f32 %v1261_v4, %v1261_v4  ;;  %v2222_v21 = vrot.slane %v1261_v4, 2  ;;  %v2407_v32 = vrot.slane %v1261_v4, 6  ;;  %v1314_v56 = vmul.f32 %v5004_v25, %v5004_v25  ;;  %2132 = vrot.lane.b32.xlu0 %v1261_v4, %s3857_s16  ;;  %2316 = vrot.lane.b32.xlu1 %v1261_v4, %s3856_s11  ;;  %v3825_v4 = vld [vmem:[%s6463_s2 + $0xa0] sm:$0xff] }
 0x2fa   : > { %v1729_v43 = vpop.f32.mrf.mxu1  ;;  %v1772_v44 = vpop.f32.mrf.mxu0 }
 0x2fb   : > { %v5011_v61 = vadd.f32 %v1268_v51, %v4900_v50  ;;  %v5015_v9 = vsel %vm1973_vm6, %v2221_v0, %v2222_v21  ;;  %v5019_v23 = vsel %vm1987_vm5, %v2406_v55, %v2407_v32  ;;  %v5022_v7 = vadd.f32 %v1314_v56, %v4911_v1  ;;  %1894 = vmatpush.bf16.msrb.mxu2 %v3820_v35  ;;  %v3821_v50 = vld [vmem:[%s6463_s2 + $0xb0] sm:$0xff]  ;;  %v3823_v1 = vld [vmem:[%s6463_s2 + $0xa8] sm:$0xff]  ;;  %v3824_v0 = vld [vmem:[%s6463_s2 + $0x40] sm:$0xff] }
 0x2fc   : > { %6563 = vst [vmem:[#allocation22_spill] sm:$0xff] %v5015_v9  ;;  %3763 = vmatpush.bf16.msrb.mxu3 %v3821_v50  ;;  %v3828_v35 = vld [vmem:[%s6463_s2 + $0x88] sm:$0xff] }
 0x2fd   : > { %6564 = vst [vmem:[#allocation23_spill] sm:$0xff] %v5019_v23 }
 0x2ff   : > { %1895 = vmatpush.bf16.msrb.mxu2 %v3822_v40 }
 0x300   : > { %v1263_v18 = vpop.f32.mrf.mxu2  ;;  %v5033_v60 = vpop.f32.mrf.mxu3  ;;  %3764 = vmatpush.bf16.msrb.mxu3 %v3823_v1 }
 0x301   : > { %v1269_v41 = vmul.f32 %v1263_v18, %v1263_v18  ;;  %v2223_v55 = vrot.slane %v1263_v18, 2  ;;  %2498 = vrot.lane.b32.xlu1 %v5033_v60, %s3859_s5 }
 0x302   : > { %v1731_v15 = vpop.f32.mrf.mxu1  ;;  %v1774_v14 = vpop.f32.mrf.mxu0 }
 0x303   : > { %v5041_v26 = vadd.f32 %v1269_v41, %v4930_v38  ;;  %v5045_v34 = vsel %vm1973_vm6, %v2222_v21, %v2223_v55  ;;  %v1735_v19 = vpack.c.bf16 %v1731_v15, %v1729_v43  ;;  %v1782_v37 = vpack.c.bf16 %v1774_v14, %v1772_v44  ;;  %1896 = vmatpush.bf16.msrb.mxu2 %v3824_v0  ;;  %v3826_v21 = vld [vmem:[%s6463_s2 + $0x98] sm:$0xff]  ;;  %v3827_v43 = vld [vmem:[%s6463_s2 + $0x90] sm:$0xff]  ;;  %v3829_v15 = vld [vmem:[%s6463_s2 + $0x80] sm:$0xff] }
 0x304   : > { %6565 = vst [vmem:[#allocation24_spill] sm:$0xff] %v5045_v34  ;;  %3765 = vmatpush.bf16.msrb.mxu3 %v3825_v4 }
 0x306   : > { %1749 = vmatmul.bf16.gmra.mxu3 %v1735_v19  ;;  %1792 = vmatmul.bf16.vlgmr.msra.gmra.mxu2 %v1782_v37 }
 0x307   : > { %1937 = vmatpush.bf16.msra.mxu2 %v3819_v8 }
 0x308   : > { %v5053_v38 = vpop.f32.mrf.mxu3  ;;  %v1379_v51 = vpop.f32.mrf.mxu2  ;;  %3766 = vmatpush.bf16.msrb.mxu3 %v3826_v21 }
 0x309   : > { %2500 = vrot.lane.b32.xlu2 %v5053_v38, %s3859_s5 }
 0x30a   : > { %v1777_v32 = vpop.f32.mrf.mxu0  ;;  %v1835_v56 = vpop.f32.mrf.mxu1 }
 0x30b   : > { %1938 = vmatpush.bf16.msra.mxu2 %v3821_v50 }
 0x30c   : > { %3767 = vmatpush.bf16.msrb.mxu3 %v3827_v43 }
 0x30f   : > { %1939 = vmatpush.bf16.msra.mxu2 %v3823_v1 }
 0x310   : > { %v5063_v8 = vpop.f32.mrf.mxu3  ;;  %v5065_v44 = vpop.f32.mrf.mxu2  ;;  %3768 = vmatpush.bf16.msrb.mxu3 %v3828_v35 }
 0x311   : > { %6566 = vst [vmem:[#allocation25_spill] sm:$0xff] %v5065_v44  ;;  %v1317_v40 = vmul.f32 %v5063_v8, %v5063_v8 }
 0x312   : > { %v1779_v18 = vpop.f32.mrf.mxu0  ;;  %v1837_v50 = vpop.f32.mrf.mxu1 }
 0x313   : > { %v5073_v41 = vadd.f32 %v1317_v40, %v4964_v3  ;;  %v1783_v55 = vpack.c.bf16 %v1779_v18, %v1777_v32  ;;  %1940 = vmatpush.bf16.msra.mxu2 %v3825_v4  ;;  %v1845_v1 = vpack.c.bf16 %v1837_v50, %v1835_v56 }
 0x314   : > { %3769 = vmatpush.bf16.msrb.mxu3 %v3829_v15 }
 0x316   : > { %1797 = vmatmul.bf16.gmra.mxu2 %v1783_v55  ;;  %1855 = vmatmul.bf16.vlgmr.msra.gmra.mxu3 %v1845_v1 }
 0x317   : > { %1941 = vmatpush.bf16.msra.mxu2 %v3826_v21 }
 0x318   : > { %v5078_v14 = vpop.f32.mrf.mxu2  ;;  %v1421_v19 = vpop.f32.mrf.mxu3 }
 0x319   : > { %v1431_v37 = vmul.f32 %v1421_v19, %v1421_v19  ;;  %v2417_v56 = vrot.slane %v1421_v19, 6 }
 0x31a   : > { %v1840_v0 = vpop.f32.mrf.mxu1  ;;  %v1877_v51 = vpop.f32.mrf.mxu0 }
 0x31b   : > { %v1435_v3 = vadd.f32 %v1431_v37, %v4975_v11  ;;  %1942 = vmatpush.bf16.msra.mxu2 %v3827_v43 }
 0x31f   : > { %1943 = vmatpush.bf16.msra.mxu2 %v3828_v35 }
 0x320   : > { %v1385_v4 = vpop.f32.mrf.mxu2  ;;  %v1423_v32 = vpop.f32.mrf.mxu3 }
 0x321   : > { %v1432_v40 = vmul.f32 %v1423_v32, %v1423_v32  ;;  %v2418_v18 = vrot.slane %v1423_v32, 6  ;;  %2325 = vrot.lane.b32.xlu2 %v1423_v32, %s3856_s11  ;;  %2141 = vrot.lane.b32.xlu1 %v1423_v32, %s3857_s16  ;;  %v2233_v19 = vrot.slane %v1423_v32, 2 }
 0x322   : > { %v1842_v21 = vpop.f32.mrf.mxu1  ;;  %v1879_v50 = vpop.f32.mrf.mxu0 }
 0x323   : > { %v1436_v55 = vadd.f32 %v1432_v40, %v4995_v48  ;;  %v5086_v1 = vsel %vm1987_vm5, %v2417_v56, %v2418_v18  ;;  %v1846_v11 = vpack.c.bf16 %v1842_v21, %v1840_v0  ;;  %v1887_v43 = vpack.c.bf16 %v1879_v50, %v1877_v51  ;;  %1944 = vmatpush.bf16.msra.mxu2 %v3829_v15 }
 0x324   : > { %6567 = vst [vmem:[#allocation26_spill] sm:$0xff] %v5086_v1 }
 0x326   : > { %1859 = vmatmul.bf16.gmra.mxu3 %v1846_v11  ;;  %1897 = vmatmul.bf16.vlgmr.msrb.gmra.mxu2 %v1887_v43 }
 0x328   : > { %v1426_v35 = vpop.f32.mrf.mxu3 }
 0x329   : > { %v1433_v37 = vmul.f32 %v1426_v35, %v1426_v35  ;;  %v2234_v4 = vrot.slane %v1426_v35, 2  ;;  %v2419_v63 = vrot.slane %v1426_v35, 6  ;;  %v5088_v46 = vpop.f32.mrf.mxu2  ;;  %2327 = vrot.lane.b32.xlu0 %v1426_v35, %s3856_s11  ;;  %2143 = vrot.lane.b32.xlu2 %v1426_v35, %s3857_s16 }
 0x32a   : > { %v1479_v48 = vmul.f32 %v5088_v46, %v5088_v46  ;;  %v1882_v56 = vpop.f32.mrf.mxu0  ;;  %v1925_v0 = vpop.f32.mrf.mxu1 }
 0x32b   : > { %v1437_v15 = vadd.f32 %v1433_v37, %v5011_v61  ;;  %v5097_v51 = vsel %vm1973_vm6, %v2233_v19, %v2234_v4  ;;  %v5101_v32 = vsel %vm1987_vm5, %v2418_v18, %v2419_v63 }
 0x32c   : > { %6568 = vst [vmem:[#allocation27_spill] sm:$0xff] %v5097_v51  ;;  %v1483_v40 = vadd.f32 %v1479_v48, %v5022_v7 }
 0x32d   : > { %6569 = vst [vmem:[#allocation28_spill] sm:$0xff] %v5101_v32 }
 0x330   : > { %v1428_v21 = vpop.f32.mrf.mxu3 }
 0x331   : > { %v1434_v50 = vmul.f32 %v1428_v21, %v1428_v21  ;;  %v2235_v11 = vrot.slane %v1428_v21, 2  ;;  %v5104_v43 = vpop.f32.mrf.mxu2 }
 0x332   : > { %2509 = vrot.lane.b32.xlu0 %v5104_v43, %s3859_s5  ;;  %v1884_v35 = vpop.f32.mrf.mxu0  ;;  %v1927_v61 = vpop.f32.mrf.mxu1 }
 0x333   : > { %v1438_v37 = vadd.f32 %v1434_v50, %v5041_v26  ;;  %v5111_v19 = vsel %vm1973_vm6, %v2234_v4, %v2235_v11  ;;  %v1888_v63 = vpack.c.bf16 %v1884_v35, %v1882_v56  ;;  %v1935_v4 = vpack.c.bf16 %v1927_v61, %v1925_v0 }
 0x334   : > { %6570 = vst [vmem:[#allocation29_spill] sm:$0xff] %v5111_v19 }
 0x336   : > { %1902 = vmatmul.bf16.gmra.mxu2 %v1888_v63 }
 0x339   : > { %v5113_v18 = vpop.f32.mrf.mxu2  ;;  %v1538_v7 = vpop.f32.mrf.mxu3 }
 0x33a   : > { %2511 = vrot.lane.b32.xlu1 %v5113_v18, %s3859_s5  ;;  %v1930_v48 = vpop.f32.mrf.mxu1 }
 0x341   : > { %v5117_v21 = vpop.f32.mrf.mxu2  ;;  %v5119_v39 = vpop.f32.mrf.mxu3 }
 0x342   : > { %6571 = vst [vmem:[#allocation30_spill] sm:$0xff] %v5119_v39  ;;  %v1482_v26 = vmul.f32 %v5117_v21, %v5117_v21  ;;  %v1932_v50 = vpop.f32.mrf.mxu1 }
 0x343   : > { %v1936_v1 = vpack.c.bf16 %v1932_v50, %v1930_v48 }
 0x344   : > { %v1486_v56 = vadd.f32 %v1482_v26, %v5073_v41 }
 0x345   : > { %1950 = vmatmul.bf16.vlgmr.msrb.gmra.mxu3 %v1936_v1 }
 0x346   : > { %1945 = vmatmul.bf16.vlgmr.msra.gmra.mxu2 %v1935_v4 }
 0x349   : > { %v5124_v11 = vpop.f32.mrf.mxu3  ;;  %v1580_v35 = vpop.f32.mrf.mxu2 }
 0x34a   : > { %v1590_v63 = vmul.f32 %v1580_v35, %v1580_v35  ;;  %v2429_v51 = vrot.slane %v1580_v35, 6 }
 0x34c   : > { %v1594_v7 = vadd.f32 %v1590_v63, %v1435_v3 }
 0x351   : > { %v1544_v54 = vpop.f32.mrf.mxu3  ;;  %v1582_v17 = vpop.f32.mrf.mxu2 }
 0x352   : > { %v1591_v9 = vmul.f32 %v1582_v17, %v1582_v17  ;;  %v2430_v59 = vrot.slane %v1582_v17, 6  ;;  %2336 = vrot.lane.b32.xlu1 %v1582_v17, %s3856_s11  ;;  %2152 = vrot.lane.b32.xlu0 %v1582_v17, %s3857_s16  ;;  %v2245_v1 = vrot.slane %v1582_v17, 2 }
 0x354   : > { %v5128_v48 = vadd.f32 %v1591_v9, %v1436_v55  ;;  %v5132_v41 = vsel %vm1987_vm5, %v2429_v51, %v2430_v59 }
 0x355   : > { %6572 = vst [vmem:[#allocation31_spill] sm:$0xff] %v5132_v41 }
 0x359   : > { %v1585_v0 = vpop.f32.mrf.mxu2  ;;  %v5134_v61 = vpop.f32.mrf.mxu3 }
 0x35a   : > { %6573 = vst [vmem:[#allocation32_spill] sm:$0xff] %v5134_v61  ;;  %v1592_v3 = vmul.f32 %v1585_v0, %v1585_v0  ;;  %v2246_v54 = vrot.slane %v1585_v0, 2  ;;  %v2431_v26 = vrot.slane %v1585_v0, 6  ;;  %v1638_v50 = vmul.f32 %v5134_v61, %v5134_v61  ;;  %2154 = vrot.lane.b32.xlu1 %v1585_v0, %s3857_s16  ;;  %2338 = vrot.lane.b32.xlu2 %v1585_v0, %s3856_s11 }
 0x35c   : > { %v5140_v9 = vadd.f32 %v1592_v3, %v1437_v15  ;;  %v5144_v55 = vsel %vm1973_vm6, %v2245_v1, %v2246_v54  ;;  %v5148_v17 = vsel %vm1987_vm5, %v2430_v59, %v2431_v26  ;;  %v1642_v51 = vadd.f32 %v1638_v50, %v1483_v40 }
 0x35d   : > { %6574 = vst [vmem:[#allocation33_spill] sm:$0xff] %v5144_v55 }
 0x35e   : > { %6575 = vst [vmem:[#allocation34_spill] sm:$0xff] %v5148_v17 }
 0x361   : > { %v1587_v4 = vpop.f32.mrf.mxu2  ;;  %v5150_v35 = vpop.f32.mrf.mxu3 }
 0x362   : > { %v1593_v63 = vmul.f32 %v1587_v4, %v1587_v4  ;;  %v2247_v41 = vrot.slane %v1587_v4, 2  ;;  %2520 = vrot.lane.b32.xlu2 %v5150_v35, %s3859_s5 }
 0x364   : > { %v1597_v0 = vadd.f32 %v1593_v63, %v1438_v37  ;;  %v5156_v15 = vsel %vm1973_vm6, %v2246_v54, %v2247_v41 }
 0x365   : > { %6576 = vst [vmem:[#allocation35_spill] sm:$0xff] %v5156_v15 }
 0x369   : > { %v5158_v1 = vpop.f32.mrf.mxu3  ;;  %v1703_v3 = vpop.f32.mrf.mxu2 }
 0x36a   : > { %2522 = vrot.lane.b32.xlu0 %v5158_v1, %s3859_s5 }
 0x371   : > { %v5162_v59 = vpop.f32.mrf.mxu3  ;;  %v5164_v40 = vpop.f32.mrf.mxu2 }
 0x372   : > { %6577 = vst [vmem:[#allocation36_spill] sm:$0xff] %v5162_v59  ;;  %v1641_v26 = vmul.f32 %v5162_v59, %v5162_v59 }
 0x373   : > { %6578 = vst [vmem:[#allocation37_spill] sm:$0xff] %v5164_v40 }
 0x374   : > { %v1645_v50 = vadd.f32 %v1641_v26, %v1486_v56 }
 0x379   : > { %v5168_v4 = vpop.f32.mrf.mxu2  ;;  %v1745_v37 = vpop.f32.mrf.mxu3 }
 0x37a   : > { %v1755_v63 = vmul.f32 %v1745_v37, %v1745_v37  ;;  %v2441_v2 = vrot.slane %v1745_v37, 6 }
 0x37c   : > { %v1759_v41 = vadd.f32 %v1755_v63, %v1594_v7 }
 0x381   : > { %v1709_v54 = vpop.f32.mrf.mxu2  ;;  %v1747_v55 = vpop.f32.mrf.mxu3 }
 0x382   : > { %v2442_v3 = vrot.slane %v1747_v55, 6  ;;  %2347 = vrot.lane.b32.xlu0 %v1747_v55, %s3856_s11  ;;  %2163 = vrot.lane.b32.xlu2 %v1747_v55, %s3857_s16  ;;  %v2257_v56 = vrot.slane %v1747_v55, 2  ;;  %v1756_v61 = vmul.f32 %v1747_v55, %v1747_v55 }
 0x384   : > { %v5174_v10 = vsel %vm1987_vm5, %v2441_v2, %v2442_v3 }
 0x385   : > { %6579 = vst [vmem:[#allocation38_spill] sm:$0xff] %v5174_v10 }
 0x389   : > { %v1750_v28 = vpop.f32.mrf.mxu3  ;;  %v5176_v24 = vpop.f32.mrf.mxu2 }
 0x38a   : > { %6580 = vst [vmem:[#allocation39_spill] sm:$0xff] %v5176_v24  ;;  %v2258_v26 = vrot.slane %v1750_v28, 2  ;;  %v2443_v17 = vrot.slane %v1750_v28, 6  ;;  %v1803_v7 = vmul.f32 %v5176_v24, %v5176_v24  ;;  %2349 = vrot.lane.b32.xlu1 %v1750_v28, %s3856_s11  ;;  %2165 = vrot.lane.b32.xlu0 %v1750_v28, %s3857_s16  ;;  %v1757_v55 = vmul.f32 %v1750_v28, %v1750_v28 }
 0x38c   : > { %v5184_v37 = vsel %vm1973_vm6, %v2257_v56, %v2258_v26  ;;  %v5188_v2 = vsel %vm1987_vm5, %v2442_v3, %v2443_v17  ;;  %v5190_v63 = vadd.f32 %v1803_v7, %v1642_v51  ;;  %v5208_v3 = vpop.permute.xlu0 %2281 }
 0x38d   : > { %6581 = vst [vmem:[#allocation40_spill] sm:$0xff] %v5184_v37  ;;  %v5202_v37 = vpop.permute.xlu2 %2097 }
 0x38e   : > { %6582 = vst [vmem:[#allocation41_spill] sm:$0xff] %v5188_v2 }
 0x38f   : > { %6584 = vst [vmem:[#allocation43_spill] sm:$0xff] %v5202_v37 }
 0x390   : > { %6585 = vst [vmem:[#allocation44_spill] sm:$0xff] %v5208_v3 }
 0x391   : > { %v1752_v54 = vpop.f32.mrf.mxu3  ;;  %v5192_v10 = vpop.f32.mrf.mxu2 }
 0x392   : > { %v1758_v32 = vmul.f32 %v1752_v54, %v1752_v54  ;;  %v2259_v23 = vrot.slane %v1752_v54, 2  ;;  %2531 = vrot.lane.b32.xlu1 %v5192_v10, %s3859_s5 }
 0x394   : > { %v5196_v24 = vadd.f32 %v1758_v32, %v1597_v0  ;;  %v5200_v56 = vsel %vm1973_vm6, %v2258_v26, %v2259_v23  ;;  %v5218_v0 = vpop.permute.xlu0 %2099  ;;  %v5220_v26 = vpop.permute.xlu1 %2283 }
 0x395   : > { %6583 = vst [vmem:[#allocation42_spill] sm:$0xff] %v5200_v56  ;;  %v5210_v7 = vpop.permute.xlu2 %2649 }
 0x396   : > { %6586 = vst [vmem:[#allocation45_spill] sm:$0xff] %v5210_v7 }
 0x397   : > { %6589 = vst [vmem:[#allocation48_spill] sm:$0xff] %v5218_v0 }
 0x398   : > { %6590 = vst [vmem:[#allocation49_spill] sm:$0xff] %v5220_v26 }
 0x399   : > { %v5204_v17 = vpop.f32.mrf.mxu2  ;;  %v1856_v51 = vpop.f32.mrf.mxu3 }
 0x39a   : > { %2533 = vrot.lane.b32.xlu2 %v5204_v17, %s3859_s5 }
 0x39c   : > { %v5228_v5 = vpop.permute.xlu0 %2651  ;;  %v5230_v59 = vpop.permute.xlu1 %2465 }
 0x39d   : > { %v5224_v51 = vpop.permute.xlu2 %2467  ;;  %6592 = vst [vmem:[#allocation51_spill] sm:$0xff] %v5228_v5 }
 0x39e   : > { %6591 = vst [vmem:[#allocation50_spill] sm:$0xff] %v5224_v51 }
 0x39f   : > { %6593 = vst [vmem:[#allocation52_spill] sm:$0xff] %v5230_v59 }
 0x3a1   : > { %v5212_v54 = vpop.f32.mrf.mxu2  ;;  %v5214_v32 = vpop.f32.mrf.mxu3 }
 0x3a2   : > { %6587 = vst [vmem:[#allocation46_spill] sm:$0xff] %v5212_v54  ;;  %v1806_v23 = vmul.f32 %v5212_v54, %v5212_v54 }
 0x3a3   : > { %6588 = vst [vmem:[#allocation47_spill] sm:$0xff] %v5214_v32 }
 0x3a4   : > { %v5222_v37 = vadd.f32 %v1806_v23, %v1645_v50  ;;  %v1760_v23 = vadd.f32 %v1756_v61, %v5128_v48  ;;  %v5241_v59 = vpop.permute.xlu0 %2294  ;;  %v1761_v48 = vadd.f32 %v1757_v55, %v5140_v9  ;;  %v1157_v9 = vmul.f32 %v4949_v36, %v4949_v36 }
 0x3a5   : > { %v5232_v56 = vpop.permute.xlu2 %2292  ;;  %6596 = vst [vmem:[#allocation55_spill] sm:$0xff] %v5241_v59 }
 0x3a6   : > { %6594 = vst [vmem:[#allocation53_spill] sm:$0xff] %v5232_v56  ;;  %v5243_v56 = vpop.permute.xlu1 %2108 }
 0x3a7   : > { %6597 = vst [vmem:[#allocation56_spill] sm:$0xff] %v5243_v56 }
 0x3a9   : > { %v5226_v2 = vpop.f32.mrf.mxu3  ;;  %v1898_v3 = vpop.f32.mrf.mxu2 }
 0x3aa   : > { %v1908_v12 = vmul.f32 %v1898_v3, %v1898_v3  ;;  %v2453_v15 = vrot.slane %v1898_v3, 6 }
 0x3ac   : > { %v1912_v7 = vadd.f32 %v1908_v12, %v1759_v41 }
 0x3ad   : > { %v5251_v61 = vpop.permute.xlu2 %2110 }
 0x3ae   : > { %6598 = vst [vmem:[#allocation57_spill] sm:$0xff] %v5251_v61  ;;  %v5264_v55 = vpop.permute.xlu1 %2660 }
 0x3af   : > { %6601 = vst [vmem:[#allocation60_spill] sm:$0xff] %v5264_v55 }
 0x3b1   : > { %v1862_v54 = vpop.f32.mrf.mxu3  ;;  %v1900_v0 = vpop.f32.mrf.mxu2 }
 0x3b2   : > { %v1909_v26 = vmul.f32 %v1900_v0, %v1900_v0  ;;  %v2454_v50 = vrot.slane %v1900_v0, 6  ;;  %2358 = vrot.lane.b32.xlu2 %v1900_v0, %s3856_s11  ;;  %2174 = vrot.lane.b32.xlu1 %v1900_v0, %s3857_s16  ;;  %v1984_v54 = vrot.slane %v1912_v7, 6 }
 0x3b4   : > { %v5239_v12 = vsel %vm1987_vm5, %v2453_v15, %v2454_v50  ;;  %v1913_v41 = vadd.f32 %v1909_v26, %v1760_v23  ;;  %v2269_v15 = vrot.slane %v1900_v0, 2 }
 0x3b5   : > { %6595 = vst [vmem:[#allocation54_spill] sm:$0xff] %v5239_v12  ;;  %v5283_v55 = vpop.permute.xlu2 %2662 }
 0x3b6   : > { %1964 = vrot.lane.b32.xlu0 %v1913_v41, %s3857_s16  ;;  %v1985_v3 = vrot.slane %v1913_v41, 6  ;;  %v1970_v0 = vrot.slane %v1913_v41, 2  ;;  %6603 = vst [vmem:[#allocation62_spill] sm:$0xff] %v5283_v55 }
 0x3b8   : > { %v5248_v5 = vsel %vm1987_vm5, %v1984_v54, %v1985_v3 }
 0x3b9   : > { %v1903_v51 = vpop.f32.mrf.mxu2 }
 0x3ba   : > { %v1910_v26 = vmul.f32 %v1903_v51, %v1903_v51  ;;  %v2270_v23 = vrot.slane %v1903_v51, 2  ;;  %v2455_v12 = vrot.slane %v1903_v51, 6  ;;  %1978 = vrot.lane.b32.xlu2 %v1913_v41, %s3856_s11  ;;  %v1481_v41 = vmul.f32 %v5113_v18, %v5113_v18 }
 0x3bc   : > { %v5256_v28 = vsel %vm1973_vm6, %v2269_v15, %v2270_v23  ;;  %v5260_v7 = vsel %vm1987_vm5, %v2454_v50, %v2455_v12  ;;  %v1914_v54 = vadd.f32 %v1910_v26, %v1761_v48  ;;  %v1316_v15 = vmul.f32 %v5053_v38, %v5053_v38 }
 0x3bd   : > { %6599 = vst [vmem:[#allocation58_spill] sm:$0xff] %v5256_v28  ;;  %v5270_v28 = vpop.permute.xlu0 %2476  ;;  %v1161_v48 = vadd.f32 %v1157_v9, %v4839_v27  ;;  %v1315_v9 = vmul.f32 %v5033_v60, %v5033_v60 }
 0x3be   : > { %6600 = vst [vmem:[#allocation59_spill] sm:$0xff] %v5260_v7  ;;  %2360 = vrot.lane.b32.xlu0 %v1903_v51, %s3856_s11  ;;  %1966 = vrot.lane.b32.xlu1 %v1914_v54, %s3857_s16  ;;  %v1971_v56 = vrot.slane %v1914_v54, 2  ;;  %v1986_v59 = vrot.slane %v1914_v54, 6 }
 0x3bf   : > { %6602 = vst [vmem:[#allocation61_spill] sm:$0xff] %v5270_v28  ;;  %v1320_v28 = vadd.f32 %v1316_v15, %v1161_v48  ;;  %v5300_v48 = vpop.permute.xlu1 %2478 }
 0x3c0   : > { %v5274_v50 = vsel %vm1973_vm6, %v1970_v0, %v1971_v56  ;;  %v5278_v12 = vsel %vm1987_vm5, %v1985_v3, %v1986_v59  ;;  %v1640_v0 = vmul.f32 %v5158_v1, %v5158_v1  ;;  %v1805_v3 = vmul.f32 %v5204_v17, %v5204_v17  ;;  %6606 = vst [vmem:[#allocation65_spill] sm:$0xff] %v5300_v48 }
 0x3c1   : > { %v1905_v26 = vpop.f32.mrf.mxu2  ;;  %v1485_v27 = vadd.f32 %v1481_v41, %v1320_v28  ;;  %v1319_v41 = vadd.f32 %v1315_v9, %v4937_v49 }
 0x3c2   : > { %v1911_v61 = vmul.f32 %v1905_v26, %v1905_v26  ;;  %v2271_v7 = vrot.slane %v1905_v26, 2  ;;  %2176 = vrot.lane.b32.xlu2 %v1903_v51, %s3857_s16 }
 0x3c3   : > { %v1644_v15 = vadd.f32 %v1640_v0, %v1485_v27  ;;  %v1639_v0 = vmul.f32 %v5150_v35, %v5150_v35 }
 0x3c4   : > { %v1915_v19 = vadd.f32 %v1911_v61, %v5196_v24  ;;  %v5291_v59 = vsel %vm1973_vm6, %v2270_v23, %v2271_v7  ;;  %v1480_v24 = vmul.f32 %v5104_v43, %v5104_v43 }
 0x3c5   : > { %6604 = vst [vmem:[#allocation63_spill] sm:$0xff] %v5291_v59  ;;  %v5298_v51 = vpop.permute.xlu0 %2119  ;;  %v1809_v7 = vadd.f32 %v1805_v3, %v1644_v15 }
 0x3c6   : > { %v1972_v26 = vrot.slane %v1915_v19, 2  ;;  %1980 = vrot.lane.b32.xlu0 %v1914_v54, %s3856_s11  ;;  %6605 = vst [vmem:[#allocation64_spill] sm:$0xff] %v5298_v51  ;;  %v5314_v54 = vpop.permute.xlu2 %2305  ;;  %v1484_v55 = vadd.f32 %v1480_v24, %v1319_v41  ;;  %s3771_s11 = smul.u32 576, %s6893_s12 }
 0x3c7   : > { %6607 = vst [vmem:[#allocation66_spill] sm:$0xff] %v5314_v54  ;;  %v5325_v3 = vpop.permute.xlu1 %2303 }
 0x3c8   : > { %v5304_v61 = vpop.f32.mrf.mxu3  ;;  %v5308_v23 = vsel %vm1973_vm6, %v1971_v56, %v1972_v26  ;;  %v1804_v56 = vmul.f32 %v5192_v10, %v5192_v10  ;;  %v1643_v48 = vadd.f32 %v1639_v0, %v1484_v55  ;;  %6609 = vst [vmem:[#allocation68_spill] sm:$0xff] %v5325_v3 }
 0x3c9   : > { %v1946_v28 = vpop.f32.mrf.mxu2  ;;  %v1958_v19 = vmul.f32 %v5304_v61, %v5304_v61  ;;  %2544 = vrot.lane.b32.xlu1 %v5304_v61, %s3859_s5  ;;  %v2638_v9 = vrot.slane %v5304_v61, 5  ;;  %v2823_v54 = vrot.slane %v5304_v61, 3 }
 0x3ca   : > { %v1956_v27 = vmul.f32 %v1946_v28, %v1946_v28  ;;  %v1808_v49 = vadd.f32 %v1804_v56, %v1643_v48  ;;  %v2821_v41 = vrot.slane %v1946_v28, 3 }
 0x3cb   : > { %v1962_v51 = vadd.f32 %v1958_v19, %v1809_v7 }
 0x3cc   : > { %v1960_v26 = vadd.f32 %v1956_v27, %v5190_v63 }
 0x3cd   : > { %1994 = vrot.lane.b32.xlu2 %v1962_v51, %s3859_s5  ;;  %v5323_v59 = vpop.permute.xlu0 %2671  ;;  %v2014_v3 = vrot.slane %v1962_v51, 3 }
 0x3ce   : > { %6608 = vst [vmem:[#allocation67_spill] sm:$0xff] %v5323_v59  ;;  %v5336_v0 = vpop.permute.xlu2 %2487 }
 0x3cf   : > { %6611 = vst [vmem:[#allocation70_spill] sm:$0xff] %v5336_v0 }
 0x3d0   : > { %v1953_v15 = vpop.f32.mrf.mxu3 }
 0x3d1   : > { %v1948_v19 = vpop.f32.mrf.mxu2  ;;  %v1959_v24 = vmul.f32 %v1953_v15, %v1953_v15  ;;  %v2639_v7 = vrot.slane %v1953_v15, 5  ;;  %2008 = vrot.lane.b32.xlu1 %v1962_v51, %s3858_s4 }
 0x3d2   : > { %v1957_v63 = vmul.f32 %v1948_v19, %v1948_v19  ;;  %v2637_v27 = vrot.slane %v1948_v19, 5  ;;  %v2822_v34 = vrot.slane %v1948_v19, 3  ;;  %2542 = vrot.lane.b32.xlu0 %v1948_v19, %s3859_s5 }
 0x3d3   : > { %v1963_v55 = vadd.f32 %v1959_v24, %v5222_v37  ;;  %v5334_v48 = vsel %vm2001_vm4, %v2638_v9, %v2639_v7  ;;  %v1999_v24 = vrot.slane %v1962_v51, 5  ;;  %v2012_v7 = vrot.slane %v1960_v26, 3  ;;  %v5371_v51 = vpop.permute.xlu1 %2121 }
 0x3d4   : > { %6610 = vst [vmem:[#allocation69_spill] sm:$0xff] %v5334_v48  ;;  %v5340_v56 = vsel %vm2001_vm4, %v2637_v27, %v2638_v9  ;;  %v5344_v28 = vsel %vm2015_vm3, %v2822_v34, %v2823_v54  ;;  %v5348_v15 = vsel %vm2015_vm3, %v2821_v41, %v2822_v34  ;;  %v1961_v59 = vadd.f32 %v1957_v63, %v1808_v49 }
 0x3d5   : > { %6612 = vst [vmem:[#allocation71_spill] sm:$0xff] %v5340_v56  ;;  %v2000_v37 = vrot.slane %v1963_v55, 5  ;;  %2682 = vrot.lane.b32.xlu2 %v5033_v60, %s3858_s4  ;;  %v5368_v26 = vpop.permute.xlu0 %2489 }
 0x3d6   : > { %6613 = vst [vmem:[#allocation72_spill] sm:$0xff] %v5348_v15  ;;  %v2013_v0 = vrot.slane %v1961_v59, 3  ;;  %v1998_v48 = vrot.slane %v1961_v59, 5  ;;  %v5374_v41 = vpop.permute.xlu2 %2130 }
 0x3d7   : > { %v5354_v9 = vsel %vm2001_vm4, %v1999_v24, %v2000_v37  ;;  %6614 = vst [vmem:[#allocation73_spill] sm:$0xff] %v5368_v26 }
 0x3d8   : > { %v5358_v54 = vsel %vm2015_vm3, %v2013_v0, %v2014_v3  ;;  %v5362_v34 = vsel %vm2015_vm3, %v2012_v7, %v2013_v0  ;;  %v5366_v49 = vsel %vm2001_vm4, %v1998_v48, %v1999_v24  ;;  %6615 = vst [vmem:[#allocation74_spill] sm:$0xff] %v5374_v41 }
 0x3d9   : > { %1992 = vrot.lane.b32.xlu1 %v1961_v59, %s3859_s5 }
 0x3da   : > { %2006 = vrot.lane.b32.xlu0 %v1961_v59, %s3858_s4 }
 0x3db   : > { %v5382_v63 = vpop.permute.xlu1 %2316 }
 0x3dd   : > { %2695 = vrot.lane.b32.xlu2 %v5113_v18, %s3858_s4  ;;  %v5378_v3 = vpop.permute.xlu0 %2314 }
 0x3de   : > { %6616 = vst [vmem:[#allocation75_spill] sm:$0xff] %v5378_v3  ;;  %v5386_v27 = vpop.permute.xlu2 %2500 }
 0x3df   : > { %6617 = vst [vmem:[#allocation76_spill] sm:$0xff] %v5386_v27 }
 0x3e1   : > { %2673 = vrot.lane.b32.xlu1 %v4949_v36, %s3858_s4 }
 0x3e2   : > { %2684 = vrot.lane.b32.xlu0 %v5053_v38, %s3858_s4 }
 0x3e3   : > { %v5396_v55 = vpop.permute.xlu1 %2498 }
 0x3e4   : > { %6618 = vst [vmem:[#allocation77_spill] sm:$0xff] %v5396_v55 }
 0x3e5   : > { %2715 = vrot.lane.b32.xlu2 %v5192_v10, %s3858_s4  ;;  %v5394_v59 = vpop.permute.xlu0 %2132 }
 0x3e6   : > { %v5398_v48 = vpop.permute.xlu2 %2325 }
 0x3e7   : > { %6619 = vst [vmem:[#allocation78_spill] sm:$0xff] %v5398_v48 }
 0x3e9   : > { %2693 = vrot.lane.b32.xlu1 %v5104_v43, %s3858_s4 }
 0x3ea   : > { %2704 = vrot.lane.b32.xlu0 %v5150_v35, %s3858_s4 }
 0x3eb   : > { %v5408_v37 = vpop.permute.xlu1 %2141 }
 0x3ec   : > { %6621 = vst [vmem:[#allocation80_spill] sm:$0xff] %v5408_v37 }
 0x3ed   : > { %2728 = vrot.lane.b32.xlu2 %v5304_v61, %s3858_s4  ;;  %v5406_v0 = vpop.permute.xlu0 %2327 }
 0x3ee   : > { %6620 = vst [vmem:[#allocation79_spill] sm:$0xff] %v5406_v0  ;;  %v5410_v24 = vpop.permute.xlu2 %2143 }
 0x3f1   : > { %2706 = vrot.lane.b32.xlu1 %v5158_v1, %s3858_s4 }
 0x3f2   : > { %2717 = vrot.lane.b32.xlu0 %v5204_v17, %s3858_s4 }
 0x3f3   : > { %v5413_v7 = vpop.permute.xlu1 %2511 }
 0x3f4   : > { %6622 = vst [vmem:[#allocation81_spill] sm:$0xff] %v5413_v7 }
 0x3f5   : > { %v5415_v15 = vpop.permute.xlu0 %2509 }
 0x3f6   : > { %6623 = vst [vmem:[#allocation82_spill] sm:$0xff] %v5415_v15  ;;  %v5417_v56 = vpop.permute.xlu2 %2338  ;;  %v904_v15 = vmul.f32 %v4744_v52, %v4744_v52  ;;  %v1546_v52 = vmul.f32 %v5119_v39, %v5119_v39  ;;  %v1864_v39 = vmul.f32 %v5214_v32, %v5214_v32 }
 0x3f7   : > { %6624 = vst [vmem:[#allocation83_spill] sm:$0xff] %v5417_v56 }
 0x3f9   : > { %2726 = vrot.lane.b32.xlu1 %v1948_v19, %s3858_s4  ;;  %s5874_s4 = scalar_lea.vmem %s6464_s3, %s3771_s11 }
 0x3fb   : > { %v5419_v61 = vpop.permute.xlu1 %2336 }
 0x3fc   : > { %6625 = vst [vmem:[#allocation84_spill] sm:$0xff] %v5419_v61  ;;  %v621_v61 = vmul.f32 %v4490_v13, %v4490_v13 }
 0x3fd   : > { %v5421_v55 = vpop.permute.xlu0 %2152 }
 0x3fe   : > { %6626 = vst [vmem:[#allocation85_spill] sm:$0xff] %v5421_v55  ;;  %v5423_v48 = vpop.permute.xlu2 %2520  ;;  %v906_v55 = vadd.f32 %v904_v15, %v621_v61  ;;  %v905_v15 = vmul.f32 %v4755_v31, %v4755_v31 }
 0x3ff   : > { %6627 = vst [vmem:[#allocation86_spill] sm:$0xff] %v5423_v48  ;;  %v1063_v48 = vmul.f32 %v4856_v16, %v4856_v16 }
 0x403   : > { %v5427_v41 = vpop.permute.xlu1 %2154 }
 0x405   : > { %v5425_v3 = vpop.permute.xlu0 %2522 }
 0x406   : > { %6628 = vst [vmem:[#allocation87_spill] sm:$0xff] %v5425_v3  ;;  %v5429_v37 = vpop.permute.xlu2 %2163  ;;  %v1222_v3 = vmul.f32 %v4959_v29, %v4959_v29 }
 0x407   : > { %6629 = vst [vmem:[#allocation88_spill] sm:$0xff] %v5429_v37  ;;  %v1065_v37 = vadd.f32 %v1063_v48, %v906_v55  ;;  %v1711_v55 = vmul.f32 %v5164_v40, %v5164_v40  ;;  %v622_v48 = vmul.f32 %v4497_v20, %v4497_v20 }
 0x409   : > { %v1224_v26 = vadd.f32 %v1222_v3, %v1065_v37  ;;  %v1064_v3 = vmul.f32 %v4870_v22, %v4870_v22 }
 0x40b   : > { %v5433_v19 = vpop.permute.xlu1 %2349 }
 0x40c   : > { %6631 = vst [vmem:[#allocation90_spill] sm:$0xff] %v5433_v19 }
 0x40d   : > { %v5431_v27 = vpop.permute.xlu0 %2347 }
 0x40e   : > { %6630 = vst [vmem:[#allocation89_spill] sm:$0xff] %v5431_v27  ;;  %v5437_v7 = vpop.permute.xlu2 %2533  ;;  %v1387_v27 = vmul.f32 %v5065_v44, %v5065_v44 }
 0x40f   : > { %6632 = vst [vmem:[#allocation91_spill] sm:$0xff] %v5437_v7 }
 0x410   : > { %v1389_v61 = vadd.f32 %v1387_v27, %v1224_v26  ;;  %v1388_v26 = vmul.f32 %v5078_v14, %v5078_v14 }
 0x412   : > { %v1548_v37 = vadd.f32 %v1546_v52, %v1389_v61  ;;  %v1547_v52 = vmul.f32 %v5124_v11, %v5124_v11 }
 0x413   : > { %v5451_v7 = vpop.permute.xlu1 %2531 }
 0x414   : > { %6633 = vst [vmem:[#allocation92_spill] sm:$0xff] %v5451_v7  ;;  %v907_v7 = vadd.f32 %v905_v15, %v622_v48  ;;  %v1713_v44 = vadd.f32 %v1711_v55, %v1548_v37  ;;  %v1712_v15 = vmul.f32 %v5168_v4, %v5168_v4  ;;  %v1865_v48 = vmul.f32 %v5226_v2, %v5226_v2 }
 0x415   : > { %v5449_v19 = vpop.permute.xlu0 %2165 }
 0x416   : > { %v5453_v13 = vpop.permute.xlu2 %2358  ;;  %v1066_v29 = vadd.f32 %v1064_v3, %v907_v7  ;;  %v1866_v27 = vadd.f32 %v1864_v39, %v1713_v44 }
 0x417   : > { %6634 = vst [vmem:[#allocation93_spill] sm:$0xff] %v5453_v13  ;;  %v1223_v13 = vmul.f32 %v4971_v45, %v4971_v45 }
 0x419   : > { %v1225_v56 = vadd.f32 %v1223_v13, %v1066_v29 }
 0x41b   : > { %v1390_v32 = vadd.f32 %v1388_v26, %v1225_v56 }
 0x41d   : > { %v1549_v7 = vadd.f32 %v1547_v52, %v1390_v32 }
 0x41e   : > { %v1979_v0 = vpop.permute.xlu2 %1978 }
 0x41f   : > { %v1714_v44 = vadd.f32 %v1712_v15, %v1549_v7 }
 0x421   : > { %v1867_v37 = vadd.f32 %v1865_v48, %v1714_v44 }
 0x424   : > { %v5469_v40 = vpop.permute.xlu1 %2174 }
 0x425   : > { %6635 = vst [vmem:[#allocation94_spill] sm:$0xff] %v5469_v40 }
 0x428   : > { %v1965_v16 = vpop.permute.xlu0 %1964 }
 0x429   : > { %v1968_v61 = vadd.f32 %v1965_v16, %v1866_v27  ;;  %v5481_v27 = vpop.permute.xlu2 %2176 }
 0x42b   : > { %v1976_v55 = vadd.f32 %v5274_v50, %v1968_v61 }
 0x42d   : > { %v1982_v39 = vadd.f32 %v1979_v0, %v1976_v55 }
 0x42f   : > { %v1990_v3 = vadd.f32 %v5248_v5, %v1982_v39 }
 0x430   : > { %v5479_v13 = vpop.permute.xlu0 %2360  ;;  %v1967_v29 = vpop.permute.xlu1 %1966 }
 0x431   : > { %v1969_v16 = vadd.f32 %v1967_v29, %v1867_v37  ;;  %v1995_v52 = vpop.permute.xlu2 %1994  ;;  %v2369_v37 = vrot.slane %v4584_v6, 6 }
 0x433   : > { %v1977_v56 = vadd.f32 %v5308_v23, %v1969_v16 }
 0x438   : > { %v1981_v26 = vpop.permute.xlu0 %1980 }
 0x439   : > { %v1983_v40 = vadd.f32 %v1981_v26, %v1977_v56  ;;  %v2370_v56 = vrot.slane %v4592_v42, 6  ;;  %v2186_v26 = vrot.slane %v4607_v58, 2 }
 0x43b   : > { %v1991_v32 = vadd.f32 %v5278_v12, %v1983_v40  ;;  %v5485_v50 = vpop.permute.xlu1 %2544 }
 0x43d   : > { %v1997_v0 = vadd.f32 %v1995_v52, %v1991_v32  ;;  %v2371_v32 = vrot.slane %v4607_v58, 6  ;;  %v2577_v58 = vrot.slane %v4920_v30, 5 }
 0x43f   : > { %v2005_v61 = vadd.f32 %v5354_v9, %v1997_v0  ;;  %v2185_v9 = vrot.slane %v4592_v42, 2  ;;  %v5501_v0 = vsel %vm1987_vm5, %v2369_v37, %v2370_v56  ;;  %v2372_v42 = vsel %vm1987_vm5, %v2370_v56, %v2371_v32 }
 0x440   : > { %v2602_v37 = vrot.slane %v5113_v18, 5  ;;  %v2601_v56 = vrot.slane %v5104_v43, 5 }
 0x441   : > { %v5505_v6 = vsel %vm1973_vm6, %v2185_v9, %v2186_v26  ;;  %v2603_v9 = vrot.slane %v5117_v21, 5 }
 0x443   : > { %v2009_v5 = vpop.permute.xlu1 %2008 }
 0x444   : > { %v2011_v15 = vadd.f32 %v2009_v5, %v2005_v61  ;;  %v5488_v55 = vpop.permute.xlu0 %2542  ;;  %v2763_v5 = vrot.slane %v4949_v36, 3 }
 0x445   : > { %6636 = vst [vmem:[#allocation95_spill] sm:$0xff] %v5488_v55  ;;  %v2811_v55 = vrot.slane %v5204_v17, 3 }
 0x446   : > { %v2019_v7 = vadd.f32 %v5358_v54, %v2011_v15  ;;  %v2579_v15 = vrot.slane %v4957_v53, 5  ;;  %v2787_v53 = vrot.slane %v5113_v18, 3 }
 0x448   : > { %v2021_v48 = vmax.f32 %v2019_v7, 1e-24  ;;  %v2774_v7 = vrot.slane %v5033_v60, 3 }
 0x44a   : > { %3802 = vrsqrt.f32 %v2021_v48  ;;  %vm2038_vm8 = vweird.f32 %v2021_v48 }
 0x44b   : > { %v1993_v39 = vpop.permute.xlu1 %1992 }
 0x44c   : > { %v1996_v23 = vadd.f32 %v1993_v39, %v1990_v3  ;;  %v2007_v29 = vpop.permute.xlu0 %2006  ;;  %v2187_v3 = vrot.slane %v4693_v33, 2  ;;  %v2578_v33 = vrot.slane %v4949_v36, 5  ;;  %v2590_v39 = vrot.slane %v5053_v38, 5 }
 0x44d   : > { %v2589_v36 = vrot.slane %v5033_v60, 5 }
 0x44e   : > { %v2004_v44 = vadd.f32 %v5366_v49, %v1996_v23  ;;  %v2775_v23 = vrot.slane %v5053_v38, 3  ;;  %v5527_v38 = vsel %vm2001_vm4, %v2577_v58, %v2578_v33  ;;  %v2580_v60 = vsel %vm2001_vm4, %v2578_v33, %v2579_v15 }
 0x44f   : > { %6637 = vst [vmem:[#allocation96_spill] sm:$0xff] %v5527_v38  ;;  %v5545_v21 = vsel %vm2001_vm4, %v2589_v36, %v2590_v39 }
 0x450   : > { %v3803_v40 = vpop.eup %3802  ;;  %v2010_v12 = vadd.f32 %v2007_v29, %v2004_v44  ;;  %v2591_v29 = vrot.slane %v5063_v8, 5  ;;  %v2785_v8 = vrot.slane %v5088_v46, 3  ;;  %6641 = vst [vmem:[#allocation99_spill] sm:$0xff] %v5545_v21  ;;  %v5549_v46 = vsel %vm2015_vm3, %v2774_v7, %v2775_v23  ;;  %v6648_v23 = vld [vmem:[#allocation63_spill] sm:$0xff] }
 0x451   : > { %v2033_v16 = vmul.f32 %v3803_v40, %v2021_v48  ;;  %vm2039_vm7 = vweird.f32 %v3803_v40  ;;  %v6639_v48 = vrot.slane %v4920_v30, 3  ;;  %v6661_v21 = vld [vmem:[#allocation39_spill] sm:$0xff] }
 0x452   : > { %v2018_v54 = vadd.f32 %v5362_v34, %v2010_v12  ;;  %v2188_v34 = vsel %vm1973_vm6, %v2186_v26, %v2187_v3  ;;  %v2786_v12 = vrot.slane %v5104_v43, 3  ;;  %vm2040_vm9 = vmor %vm2038_vm8, %vm2039_vm7  ;;  %v2592_v30 = vsel %vm2001_vm4, %v2590_v39, %v2591_v29  ;;  %v6647_v39 = vld [vmem:[#allocation42_spill] sm:$0xff] }
 0x453   : > { %v2034_v52 = vmul.f32 %v3803_v40, %v2033_v16  ;;  %v2773_v16 = vrot.slane %v5004_v25, 3  ;;  %v2764_v25 = vsel %vm2015_vm3, %v6639_v48, %v2763_v5  ;;  %v2604_v3 = vsel %vm2001_vm4, %v2602_v37, %v2603_v9  ;;  %v6644_v5 = vld [vmem:[#allocation24_spill] sm:$0xff]  ;;  %v6651_v9 = vld [vmem:[#allocation46_spill] sm:$0xff] }
 0x454   : > { %v5555_v43 = vsel %vm2015_vm3, %v2785_v8, %v2786_v12  ;;  %v5563_v32 = vsel %vm2015_vm3, %v2786_v12, %v2787_v53  ;;  %v2613_v12 = vrot.slane %v5150_v35, 5  ;;  %v2626_v53 = vrot.slane %v5204_v17, 5 }
 0x455   : > { %v2035_v49 = vmul.f32 0.5, %v2034_v52  ;;  %v5541_v18 = vsel %vm2015_vm3, %v2773_v16, %v2774_v7  ;;  %6642 = vst [vmem:[#allocation100_spill] sm:$0xff] %v5555_v43  ;;  %v6650_v16 = vld [vmem:[#allocation36_spill] sm:$0xff]  ;;  %v2627_v8 = vrot.slane %v6651_v9, 5  ;;  %v6656_v9 = vld [vmem:[#allocation34_spill] sm:$0xff]  ;;  %v6657_v43 = vld [vmem:[#allocation41_spill] sm:$0xff] }
 0x456   : > { %6640 = vst [vmem:[#allocation98_spill] sm:$0xff] %v5541_v18  ;;  %v2615_v36 = vrot.slane %v6650_v16, 5  ;;  %v6659_v18 = vld [vmem:[#allocation59_spill] sm:$0xff]  ;;  %v2809_v38 = vrot.slane %v6661_v21, 3 }
 0x457   : > { %v2036_v61 = vsub.f32 1.5, %v2035_v49  ;;  %v5571_v49 = vmax.f32 %v2018_v54, 1e-24  ;;  %v6646_v54 = vld [vmem:[#allocation35_spill] sm:$0xff] }
 0x459   : > { %v2037_v44 = vmul.f32 %v3803_v40, %v2036_v61  ;;  %3804 = vrsqrt.f32 %v5571_v49  ;;  %vm2028_vm10 = vweird.f32 %v5571_v49 }
 0x45b   : > { %v5531_v26 = vsel %vm2040_vm9, %v3803_v40, %v2037_v44  ;;  %v5559_v40 = vsel %vm2001_vm4, %v2601_v56, %v2602_v37  ;;  %v6649_v44 = vld [vmem:[#allocation32_spill] sm:$0xff]  ;;  %v2614_v37 = vrot.slane %v5158_v1, 5 }
 0x45c   : > { %6638 = vst [vmem:[#allocation97_spill] sm:$0xff] %v5531_v26  ;;  %v5569_v52 = vmul.f32 %v5449_v19, %v5531_v26  ;;  %v5574_v58 = vmul.f32 %v2188_v34, %v5531_v26  ;;  %v5578_v61 = vmul.f32 %v4824_v62, %v5531_v26  ;;  %v5582_v33 = vmul.f32 %v4934_v47, %v5531_v26  ;;  %v6645_v19 = vld [vmem:[#allocation29_spill] sm:$0xff] }
 0x45d   : > { %6643 = vst [vmem:[#allocation101_spill] sm:$0xff] %v5559_v40  ;;  %v5586_v15 = vmul.f32 %v6644_v5, %v5531_v26  ;;  %v5590_v7 = vmul.f32 %v6645_v19, %v5531_v26  ;;  %v5594_v34 = vmul.f32 %v6646_v54, %v5531_v26  ;;  %v5598_v62 = vmul.f32 %v6647_v39, %v5531_v26  ;;  %v6652_v5 = vld [vmem:[#allocation10_spill] sm:$0xff] }
 0x45e   : > { %v5602_v47 = vmul.f32 %v6648_v23, %v5531_v26  ;;  %v2797_v29 = vrot.slane %v6649_v44, 3  ;;  %v5612_v56 = vmul.f32 %v5479_v13, %v5531_v26  ;;  %v5616_v48 = vmul.f32 %v2372_v42, %v5531_v26  ;;  %v6653_v54 = vld [vmem:[#allocation18_spill] sm:$0xff]  ;;  %v6654_v23 = vld [vmem:[#allocation23_spill] sm:$0xff]  ;;  %v6655_v13 = vld [vmem:[#allocation28_spill] sm:$0xff] }
 0x45f   : > { %v5620_v19 = vmul.f32 %v6652_v5, %v5531_v26  ;;  %v5624_v39 = vmul.f32 %v6653_v54, %v5531_v26  ;;  %v5628_v44 = vmul.f32 %v6654_v23, %v5531_v26  ;;  %v5632_v16 = vmul.f32 %v6655_v13, %v5531_v26 }
 0x460   : > { %v5636_v42 = vmul.f32 %v6656_v9, %v5531_v26  ;;  %v5640_v5 = vmul.f32 %v6657_v43, %v5531_v26  ;;  %v5644_v54 = vmul.f32 %v6659_v18, %v5531_v26  ;;  %v2798_v40 = vrot.slane %v5150_v35, 3  ;;  %v6663_v35 = vld [vmem:[#allocation2_spill] sm:$0xff] }
 0x461   : > { %v2799_v23 = vrot.slane %v5158_v1, 3  ;;  %v2616_v13 = vsel %vm2001_vm4, %v2614_v37, %v2615_v36  ;;  %v2810_v9 = vrot.slane %v5192_v10, 3  ;;  %v2628_v43 = vsel %vm2001_vm4, %v2626_v53, %v2627_v8  ;;  %v6665_v1 = vld [vmem:[#allocation15_spill] sm:$0xff] }
 0x462   : > { %6658 = vst [vmem:[#allocation24_spill] sm:$0xff] %v5640_v5  ;;  %v5657_v18 = vmul.f32 %v5485_v50, %v5531_v26  ;;  %v5665_v36 = vmul.f32 %v6665_v1, %v5531_v26  ;;  %v5668_v21 = vmul.f32 %v2580_v60, %v5531_v26  ;;  %v5671_v17 = vmul.f32 %v2592_v30, %v5531_v26  ;;  %v3805_v5 = vpop.eup %3804 }
 0x463   : > { %6660 = vst [vmem:[#allocation29_spill] sm:$0xff] %v5644_v54  ;;  %v5661_v54 = vmul.f32 %v6663_v35, %v5531_v26  ;;  %v5674_v8 = vmul.f32 %v2604_v3, %v5531_v26  ;;  %v5677_v50 = vmul.f32 %v2616_v13, %v5531_v26  ;;  %v5680_v35 = vmul.f32 %v2628_v43, %v5531_v26  ;;  %v6677_v13 = vld [vmem:[#allocation13_spill] sm:$0xff] }
 0x464   : > { %6662 = vst [vmem:[#allocation35_spill] sm:$0xff] %v5657_v18  ;;  %v5688_v60 = vsel %vm2015_vm3, %v2797_v29, %v2798_v40  ;;  %v2625_v30 = vrot.slane %v5192_v10, 5  ;;  %v5701_v43 = vsel %vm2001_vm4, %v2613_v12, %v2614_v37  ;;  %v5709_v29 = vsel %vm2015_vm3, %v2809_v38, %v2810_v9 }
 0x465   : > { %6664 = vst [vmem:[#allocation42_spill] sm:$0xff] %v5661_v54  ;;  %v6672_v54 = vld [vmem:[#allocation69_spill] sm:$0xff]  ;;  %v5712_v10 = vmul.f32 %v2764_v25, %v5531_v26  ;;  %v5724_v12 = vmul.f32 %v5344_v28, %v5531_v26  ;;  %v2043_v38 = vmul.f32 %v5531_v26, %v4497_v20  ;;  %v5731_v25 = vmul.f32 %v5531_v26, %v4755_v31 }
 0x466   : > { %6666 = vst [vmem:[#allocation63_spill] sm:$0xff] %v5665_v36  ;;  %v5684_v1 = vmul.f32 %v6672_v54, %v5531_v26  ;;  %v5705_v54 = vsel %vm2015_vm3, %v2798_v40, %v2799_v23  ;;  %v2023_v40 = vmul.f32 %v3805_v5, %v5571_v49  ;;  %v5735_v37 = vmul.f32 %v5531_v26, %v4870_v22  ;;  %v6709_v36 = vld [vmem:[#allocation3_spill] sm:$0xff] }
 0x467   : > { %6667 = vst [vmem:[#allocation32_spill] sm:$0xff] %v5668_v21  ;;  %v5740_v57 = vmul.f32 %v5531_v26, %v4971_v45  ;;  %v5744_v28 = vmul.f32 %v5531_v26, %v5078_v14  ;;  %v5748_v20 = vmul.f32 %v5531_v26, %v5124_v11  ;;  %v5756_v22 = vmul.f32 %v5531_v26, %v5226_v2  ;;  %v6686_v45 = vld [vmem:[#allocation48_spill] sm:$0xff]  ;;  %v6687_v14 = vld [vmem:[#allocation57_spill] sm:$0xff] }
 0x468   : > { %6668 = vst [vmem:[#allocation36_spill] sm:$0xff] %v5671_v17  ;;  %v6675_v17 = vld [vmem:[#allocation6_spill] sm:$0xff]  ;;  %v2024_v31 = vmul.f32 %v3805_v5, %v2023_v40  ;;  %v5764_v23 = vmul.f32 %v6687_v14, %v5531_v26  ;;  %v5768_v11 = vmul.f32 %v5371_v51, %v5531_v26  ;;  %v5776_v2 = vmul.f32 %v5410_v24, %v5531_v26  ;;  %v6688_v51 = vld [vmem:[#allocation49_spill] sm:$0xff] }
 0x469   : > { %6669 = vst [vmem:[#allocation46_spill] sm:$0xff] %v5674_v8  ;;  %v5693_v3 = vmul.f32 %v6675_v17, %v5531_v26  ;;  %v5716_v17 = vsel %vm2001_vm4, %v2625_v30, %v2626_v53  ;;  %v5760_v53 = vmul.f32 %v6686_v45, %v5531_v26  ;;  %v5780_v30 = vmul.f32 %v5427_v41, %v5531_v26  ;;  %v6690_v24 = vld [vmem:[#allocation66_spill] sm:$0xff] }
 0x46a   : > { %6670 = vst [vmem:[#allocation10_spill] sm:$0xff] %v5677_v50  ;;  %v5697_v50 = vmul.f32 %v6677_v13, %v5531_v26  ;;  %v5720_v13 = vsel %vm2015_vm3, %v2810_v9, %v2811_v55  ;;  %v5752_v55 = vmul.f32 %v5531_v26, %v5168_v4  ;;  %v5772_v4 = vmul.f32 %v5394_v59, %v5531_v26  ;;  %v6689_v59 = vld [vmem:[#allocation55_spill] sm:$0xff] }
 0x46b   : > { %6671 = vst [vmem:[#allocation18_spill] sm:$0xff] %v5680_v35  ;;  %v2025_v9 = vmul.f32 0.5, %v2024_v31  ;;  %v5784_v40 = vmul.f32 %v5481_v27, %v5531_v26  ;;  %v5788_v45 = vmul.f32 %v6688_v51, %v5531_v26  ;;  %v5792_v14 = vmul.f32 %v6689_v59, %v5531_v26  ;;  %v6691_v27 = vld [vmem:[#allocation79_spill] sm:$0xff]  ;;  %v6693_v59 = vld [vmem:[#allocation90_spill] sm:$0xff] }
 0x46c   : > { %6673 = vst [vmem:[#allocation23_spill] sm:$0xff] %v5684_v1  ;;  %v5800_v41 = vmul.f32 %v5382_v63, %v5531_v26  ;;  %vm2029_vm11 = vweird.f32 %v3805_v5  ;;  %v6692_v51 = vld [vmem:[#allocation83_spill] sm:$0xff]  ;;  %v6695_v63 = vld [vmem:[#allocation65_spill] sm:$0xff] }
 0x46d   : > { %6674 = vst [vmem:[#allocation28_spill] sm:$0xff] %v5688_v60  ;;  %v2026_v31 = vsub.f32 1.5, %v2025_v9  ;;  %v5812_v60 = vmul.f32 %v6693_v59, %v5531_v26  ;;  %v5821_v9 = vmul.f32 %v6695_v63, %v5531_v26  ;;  %v6698_v59 = vld [vmem:[#allocation81_spill] sm:$0xff]  ;;  %v6701_v63 = vld [vmem:[#allocation91_spill] sm:$0xff]  ;;  %vm2030_vm12 = vmor %vm2028_vm10, %vm2029_vm11 }
 0x46e   : > { %6676 = vst [vmem:[#allocation34_spill] sm:$0xff] %v5693_v3  ;;  %v5833_v1 = vmul.f32 %v6698_v59, %v5531_v26  ;;  %v5841_v8 = vmul.f32 %v6701_v63, %v5531_v26  ;;  %v5855_v59 = vmul.f32 %v5549_v46, %v5531_v26  ;;  %v6713_v46 = vld [vmem:[#allocation25_spill] sm:$0xff] }
 0x46f   : > { %6678 = vst [vmem:[#allocation41_spill] sm:$0xff] %v5697_v50 }
 0x470   : > { %6679 = vst [vmem:[#allocation59_spill] sm:$0xff] %v5701_v43 }
 0x471   : > { %6680 = vst [vmem:[#allocation39_spill] sm:$0xff] %v5705_v54  ;;  %v2027_v54 = vmul.f32 %v3805_v5, %v2026_v31  ;;  %v6705_v31 = vld [vmem:[#allocation62_spill] sm:$0xff] }
 0x472   : > { %6681 = vst [vmem:[#allocation2_spill] sm:$0xff] %v5709_v29  ;;  %v5804_v29 = vmul.f32 %v6691_v27, %v5531_v26  ;;  %v6696_v27 = vld [vmem:[#allocation73_spill] sm:$0xff] }
 0x473   : > { %6682 = vst [vmem:[#allocation15_spill] sm:$0xff] %v5712_v10  ;;  %v5825_v50 = vmul.f32 %v6696_v27, %v5531_v26  ;;  %v6703_v27 = vld [vmem:[#allocation51_spill] sm:$0xff]  ;;  %v5861_v63 = vsel %vm2030_vm12, %v3805_v5, %v2027_v54  ;;  %v6714_v5 = vld [vmem:[#allocation30_spill] sm:$0xff]  ;;  %v6715_v54 = vld [vmem:[#allocation37_spill] sm:$0xff] }
 0x474   : > { %6683 = vst [vmem:[#allocation69_spill] sm:$0xff] %v5716_v17  ;;  %v5845_v21 = vmul.f32 %v6703_v27, %v5531_v26  ;;  %v2042_v27 = vmul.f32 %v5861_v63, %v6709_v36  ;;  %v6711_v17 = vld [vmem:[#allocation14_spill] sm:$0xff]  ;;  %v2076_v36 = vmul.f32 %v5861_v63, %v6714_v5 }
 0x475   : > { %6684 = vst [vmem:[#allocation6_spill] sm:$0xff] %v5720_v13  ;;  %v5808_v13 = vmul.f32 %v6692_v51, %v5531_v26  ;;  %v6697_v51 = vld [vmem:[#allocation76_spill] sm:$0xff] }
 0x476   : > { %6685 = vst [vmem:[#allocation13_spill] sm:$0xff] %v5724_v12  ;;  %v5796_v12 = vmul.f32 %v6690_v24, %v5531_v26  ;;  %v6694_v24 = vld [vmem:[#allocation50_spill] sm:$0xff]  ;;  %v5829_v3 = vmul.f32 %v6697_v51, %v5531_v26  ;;  %v5851_v51 = vmul.f32 %v6705_v31, %v5531_v26  ;;  %v2055_v31 = vmul.f32 %v5861_v63, %v6711_v17  ;;  %v6716_v17 = vld [vmem:[#allocation47_spill] sm:$0xff] }
 0x477   : > { %v5816_v10 = vmul.f32 %v6694_v24, %v5531_v26  ;;  %v6699_v24 = vld [vmem:[#allocation87_spill] sm:$0xff]  ;;  %6702 = vst [vmem:[#allocation57_spill] sm:$0xff] %v5841_v8  ;;  %v3351_v8 = vpack.c.bf16 %v5748_v20, %v2076_v36 }
 0x478   : > { %v5837_v35 = vmul.f32 %v6699_v24, %v5531_v26  ;;  %6704 = vst [vmem:[#allocation49_spill] sm:$0xff] %v5845_v21  ;;  %v5859_v24 = vmul.f32 %v5563_v32, %v5531_v26  ;;  %v6710_v21 = vld [vmem:[#allocation7_spill] sm:$0xff]  ;;  %v2069_v32 = vmul.f32 %v5861_v63, %v6713_v46  ;;  %v3336_v26 = vpack.c.bf16 %v5735_v37, %v2055_v31  ;;  %v6719_v37 = vld [vmem:[#allocation64_spill] sm:$0xff] }
 0x479   : > { %6706 = vst [vmem:[#allocation55_spill] sm:$0xff] %v5851_v51  ;;  %v2048_v49 = vmul.f32 %v5861_v63, %v6710_v21  ;;  %v6712_v51 = vld [vmem:[#allocation20_spill] sm:$0xff]  ;;  %v2083_v21 = vmul.f32 %v5861_v63, %v6715_v54  ;;  %v6717_v54 = vld [vmem:[#allocation43_spill] sm:$0xff] }
 0x47a   : > { %6700 = vst [vmem:[#allocation48_spill] sm:$0xff] %v5837_v35  ;;  %v2062_v43 = vmul.f32 %v5861_v63, %v6712_v51  ;;  %v3326_v51 = vpack.c.bf16 %v2043_v38, %v2042_v27  ;;  %v3346_v46 = vpack.c.bf16 %v5744_v28, %v2069_v32  ;;  %v2101_v38 = vmul.f32 %v6717_v54, %v5861_v63  ;;  %v6721_v28 = vld [vmem:[#allocation80_spill] sm:$0xff]  ;;  %v6724_v32 = vld [vmem:[#allocation94_spill] sm:$0xff] }
 0x47b   : > { %6707 = vst [vmem:[#allocation66_spill] sm:$0xff] %v5855_v59  ;;  %v3331_v59 = vpack.c.bf16 %v5731_v25, %v2048_v49  ;;  %v3356_v5 = vpack.c.bf16 %v5752_v55, %v2083_v21  ;;  %v6718_v25 = vld [vmem:[#allocation56_spill] sm:$0xff]  ;;  %v2123_v49 = vmul.f32 %v6719_v37, %v5861_v63  ;;  %v2145_v20 = vmul.f32 %v6721_v28, %v5861_v63  ;;  %v6722_v55 = vld [vmem:[#allocation85_spill] sm:$0xff] }
 0x47c   : > { %6708 = vst [vmem:[#allocation79_spill] sm:$0xff] %v5859_v24  ;;  %v2090_v24 = vmul.f32 %v5861_v63, %v6716_v17  ;;  %v3341_v18 = vpack.c.bf16 %v5740_v57, %v2062_v43  ;;  %v2112_v27 = vmul.f32 %v6718_v25, %v5861_v63  ;;  %v6720_v43 = vld [vmem:[#allocation74_spill] sm:$0xff]  ;;  %v5911_v36 = vmul.f32 %v6724_v32, %v5861_v63  ;;  %v6734_v32 = vld [vmem:[#allocation68_spill] sm:$0xff] }
 0x47d   : > { %3327 = vst [vmem:[%s5874_s4] sm:$0xff] %v3326_v51   ;;  %v2134_v57 = vmul.f32 %v6720_v43, %v5861_v63  ;;  %v3366_v21 = vpack.c.bf16 %v5760_v53, %v2101_v38  ;;  %v3376_v17 = vpack.c.bf16 %v5768_v11, %v2123_v49  ;;  %v3386_v54 = vpack.c.bf16 %v5776_v2, %v2145_v20  ;;  %v6727_v2 = vld [vmem:[#allocation22_spill] sm:$0xff]  ;;  %v6730_v38 = vld [vmem:[#allocation40_spill] sm:$0xff] }
 0x47e   : > { %v3361_v35 = vpack.c.bf16 %v5756_v22, %v2090_v24  ;;  %3683 = vst [vmem:[%s5874_s4 + $0x8] sm:$0xff] %v3331_v59   ;;  %v2156_v22 = vmul.f32 %v6722_v55, %v5861_v63  ;;  %v6723_v24 = vld [vmem:[#allocation88_spill] sm:$0xff]  ;;  %v3371_v59 = vpack.c.bf16 %v5764_v23, %v2112_v27  ;;  %v2190_v53 = vmul.f32 %v5505_v6, %v5861_v63  ;;  %v6725_v23 = vld [vmem:[#allocation9_spill] sm:$0xff]  ;;  %v6731_v49 = vld [vmem:[#allocation58_spill] sm:$0xff]  ;;  %v5965_v55 = vpop.permute.xlu2 %2682 }
 0x47f   : > { %v5907_v31 = vmul.f32 %v6723_v24, %v5861_v63  ;;  %3684 = vst [vmem:[%s5874_s4 + $0x10] sm:$0xff] %v3336_v26   ;;  %v3381_v51 = vpack.c.bf16 %v5772_v4, %v2134_v57  ;;  %v3401_v26 = vpack.c.bf16 %v5784_v40, %v5911_v36  ;;  %v5930_v11 = vmul.f32 %v6725_v23, %v5861_v63  ;;  %v6729_v6 = vld [vmem:[#allocation33_spill] sm:$0xff] }
 0x480   : > { %3685 = vst [vmem:[%s5874_s4 + $0x18] sm:$0xff] %v3341_v18   ;;  %v3391_v25 = vpack.c.bf16 %v5780_v30, %v2156_v22  ;;  %v6726_v18 = vld [vmem:[#allocation17_spill] sm:$0xff]  ;;  %v5938_v30 = vmul.f32 %v6727_v2, %v5861_v63  ;;  %v5951_v27 = vmul.f32 %v6730_v38, %v5861_v63  ;;  %v5955_v43 = vmul.f32 %v6731_v49, %v5861_v63  ;;  %v6010_v49 = vpop.permute.xlu0 %2684 }
 0x481   : > { %v3396_v37 = vpack.c.bf16 %v5569_v52, %v5907_v31  ;;  %3686 = vst [vmem:[%s5874_s4 + $0x20] sm:$0xff] %v3346_v46   ;;  %v5934_v4 = vmul.f32 %v6726_v18, %v5861_v63  ;;  %v6728_v52 = vld [vmem:[#allocation27_spill] sm:$0xff]  ;;  %v5947_v46 = vmul.f32 %v6729_v6, %v5861_v63  ;;  %v3411_v57 = vpack.c.bf16 %v5578_v61, %v5930_v11  ;;  %v6737_v18 = vld [vmem:[#allocation84_spill] sm:$0xff]  ;;  %v6738_v2 = vld [vmem:[#allocation89_spill] sm:$0xff] }
 0x482   : > { %3687 = vst [vmem:[%s5874_s4 + $0x28] sm:$0xff] %v3351_v8   ;;  %v5943_v40 = vmul.f32 %v6728_v52, %v5861_v63  ;;  %v3406_v8 = vpack.c.bf16 %v5574_v58, %v2190_v53  ;;  %v5987_v36 = vmul.f32 %v6734_v32, %v5861_v63  ;;  %v6735_v53 = vld [vmem:[#allocation75_spill] sm:$0xff]  ;;  %v6004_v52 = vmul.f32 %v6738_v2, %v5861_v63  ;;  %v6739_v6 = vld [vmem:[#allocation93_spill] sm:$0xff] }
 0x483   : > { %3688 = vst [vmem:[%s5874_s4 + $0x30] sm:$0xff] %v3356_v5   ;;  %v3416_v28 = vpack.c.bf16 %v5582_v33, %v5934_v4  ;;  %v6732_v33 = vld [vmem:[#allocation44_spill] sm:$0xff]  ;;  %v5991_v23 = vmul.f32 %v6735_v53, %v5861_v63  ;;  %v6000_v4 = vmul.f32 %v6737_v18, %v5861_v63  ;;  %v6008_v38 = vmul.f32 %v6739_v6, %v5861_v63  ;;  %v6764_v58 = vld [vmem:[#allocation95_spill] sm:$0xff] }
 0x484   : > { %3689 = vst [vmem:[%s5874_s4 + $0x38] sm:$0xff] %v3361_v35   ;;  %v5979_v24 = vmul.f32 %v6732_v33, %v5861_v63  ;;  %v6733_v35 = vld [vmem:[#allocation53_spill] sm:$0xff]  ;;  %v6035_v6 = vmul.f32 %v5501_v0, %v5861_v63  ;;  %v6744_v0 = vld [vmem:[#allocation31_spill] sm:$0xff] }
 0x485   : > { %3690 = vst [vmem:[%s5874_s4 + $0x40] sm:$0xff] %v3366_v21   ;;  %v5983_v31 = vmul.f32 %v6733_v35, %v5861_v63  ;;  %v6736_v21 = vld [vmem:[#allocation78_spill] sm:$0xff]  ;;  %v6056_v35 = vmul.f32 %v6744_v0, %v5861_v63 }
 0x486   : > { %3691 = vst [vmem:[%s5874_s4 + $0x48] sm:$0xff] %v3371_v59   ;;  %v5996_v11 = vmul.f32 %v6736_v21, %v5861_v63  ;;  %v6012_v59 = vpop.permute.xlu1 %2673  ;;  %v6741_v21 = vld [vmem:[#allocation16_spill] sm:$0xff]  ;;  %v6101_v20 = vpop.permute.xlu2 %2695 }
 0x487   : > { %3692 = vst [vmem:[%s5874_s4 + $0x50] sm:$0xff] %v3376_v17   ;;  %v6043_v32 = vmul.f32 %v6741_v21, %v5861_v63  ;;  %v6742_v17 = vld [vmem:[#allocation21_spill] sm:$0xff]  ;;  %v6747_v21 = vld [vmem:[#allocation54_spill] sm:$0xff] }
 0x488   : > { %3693 = vst [vmem:[%s5874_s4 + $0x58] sm:$0xff] %v3381_v51   ;;  %v6740_v51 = vld [vmem:[#allocation8_spill] sm:$0xff]  ;;  %v6047_v18 = vmul.f32 %v6742_v17, %v5861_v63  ;;  %v6064_v61 = vmul.f32 %v6747_v21, %v5861_v63  ;;  %v6760_v17 = vld [vmem:[#allocation86_spill] sm:$0xff] }
 0x489   : > { %3694 = vst [vmem:[%s5874_s4 + $0x60] sm:$0xff] %v3386_v54   ;;  %v6039_v53 = vmul.f32 %v6740_v51, %v5861_v63  ;;  %v6743_v54 = vld [vmem:[#allocation26_spill] sm:$0xff]  ;;  %v6749_v21 = vld [vmem:[#allocation24_spill] sm:$0xff] }
 0x48a   : > { %3695 = vst [vmem:[%s5874_s4 + $0x68] sm:$0xff] %v3391_v25   ;;  %v6052_v2 = vmul.f32 %v6743_v54, %v5861_v63  ;;  %v6745_v51 = vld [vmem:[#allocation38_spill] sm:$0xff]  ;;  %v6751_v54 = vld [vmem:[#allocation52_spill] sm:$0xff] }
 0x48b   : > { %v6060_v33 = vmul.f32 %v6745_v51, %v5861_v63  ;;  %6748 = vst [vmem:[#allocation90_spill] sm:$0xff] %v6064_v61  ;;  %v6087_v5 = vmul.f32 %v6751_v54, %v5861_v63  ;;  %v6755_v51 = vld [vmem:[#allocation70_spill] sm:$0xff]  ;;  %v6762_v61 = vld [vmem:[#allocation92_spill] sm:$0xff] }
 0x48c   : > { %3696 = vst [vmem:[%s5874_s4 + $0x70] sm:$0xff] %v3396_v37   ;;  %v6095_v22 = vmul.f32 %v6755_v51, %v5861_v63  ;;  %v6757_v37 = vld [vmem:[#allocation77_spill] sm:$0xff]  ;;  %v6114_v51 = vmul.f32 %v6762_v61, %v5861_v63 }
 0x48d   : > { %6746 = vst [vmem:[#allocation83_spill] sm:$0xff] %v6060_v33  ;;  %v6099_v25 = vmul.f32 %v6757_v37, %v5861_v63  ;;  %v6118_v37 = vmul.f32 %v6764_v58, %v5861_v63  ;;  %v6766_v58 = vpack.c.bf16 %v5586_v15, %v5938_v30  ;;  %v2705_v33 = vpop.permute.xlu0 %2704  ;;  %v6771_v15 = vld [vmem:[#allocation5_spill] sm:$0xff] }
 0x48e   : > { %3697 = vst [vmem:[%s5874_s4 + $0x78] sm:$0xff] %v3401_v26   ;;  %v6753_v26 = vld [vmem:[#allocation61_spill] sm:$0xff]  ;;  %v6129_v61 = vpop.permute.xlu1 %2693  ;;  %v6149_v30 = vmul.f32 %v6771_v15, %v5861_v63  ;;  %v6780_v15 = vld [vmem:[#allocation59_spill] sm:$0xff] }
 0x48f   : > { %3698 = vst [vmem:[%s5874_s4 + $0x80] sm:$0xff] %v3406_v8   ;;  %v6091_v0 = vmul.f32 %v6753_v26, %v5861_v63  ;;  %v6759_v8 = vld [vmem:[#allocation82_spill] sm:$0xff]  ;;  %v6110_v26 = vmul.f32 %v6760_v17, %v5861_v63 }
 0x490   : > { %6752 = vst [vmem:[#allocation50_spill] sm:$0xff] %v6087_v5  ;;  %v6106_v54 = vmul.f32 %v6759_v8, %v5861_v63  ;;  %v6775_v5 = vld [vmem:[#allocation96_spill] sm:$0xff] }
 0x491   : > { %6754 = vst [vmem:[#allocation65_spill] sm:$0xff] %v6091_v0  ;;  %v6157_v0 = vmul.f32 %v6775_v5, %v5861_v63  ;;  %v6782_v5 = vld [vmem:[#allocation69_spill] sm:$0xff]  ;;  %v6789_v8 = vld [vmem:[#allocation32_spill] sm:$0xff] }
 0x492   : > { %6756 = vst [vmem:[#allocation73_spill] sm:$0xff] %v6095_v22  ;;  %v6776_v22 = vld [vmem:[#allocation99_spill] sm:$0xff]  ;;  %v6177_v17 = vmul.f32 %v6782_v5, %v5861_v63  ;;  %v6790_v5 = vld [vmem:[#allocation36_spill] sm:$0xff] }
 0x493   : > { %6758 = vst [vmem:[#allocation76_spill] sm:$0xff] %v6099_v25  ;;  %v6770_v25 = vpack.c.bf16 %v5590_v7, %v5943_v40  ;;  %v6777_v7 = vpack.c.bf16 %v5594_v34, %v5947_v46  ;;  %v6778_v40 = vld [vmem:[#allocation101_spill] sm:$0xff]  ;;  %v6786_v34 = vpack.c.bf16 %v5598_v62, %v5951_v27  ;;  %v6787_v46 = vld [vmem:[#allocation42_spill] sm:$0xff]  ;;  %v2716_v62 = vpop.permute.xlu2 %2715 }
 0x494   : > { %3699 = vst [vmem:[%s5874_s4 + $0x88] sm:$0xff] %v3411_v57   ;;  %v6796_v57 = vpack.c.bf16 %v5788_v45, %v5979_v24  ;;  %v6805_v45 = vld [vmem:[#allocation39_spill] sm:$0xff] }
 0x495   : > { %6761 = vst [vmem:[#allocation81_spill] sm:$0xff] %v6110_v26 }
 0x496   : > { %6763 = vst [vmem:[#allocation87_spill] sm:$0xff] %v6114_v51 }
 0x497   : > { %6765 = vst [vmem:[#allocation91_spill] sm:$0xff] %v6118_v37  ;;  %v6161_v37 = vmul.f32 %v6776_v22, %v5861_v63  ;;  %v6784_v22 = vld [vmem:[#allocation71_spill] sm:$0xff] }
 0x498   : > { %3700 = vst [vmem:[%s5874_s4 + $0x90] sm:$0xff] %v3416_v28   ;;  %v6181_v51 = vmul.f32 %v6784_v22, %v5861_v63  ;;  %v6791_v22 = vpack.c.bf16 %v5602_v47, %v5955_v43  ;;  %v6797_v47 = vld [vmem:[#allocation45_spill] sm:$0xff] }
 0x499   : > { %3701 = vst [vmem:[%s5874_s4 + $0x98] sm:$0xff] %v6766_v58   ;;  %v6773_v58 = vld [vmem:[#allocation12_spill] sm:$0xff]  ;;  %v6213_v43 = vmul.f32 %v6797_v47, %v5861_v63  ;;  %v6807_v47 = vld [vmem:[#allocation19_spill] sm:$0xff] }
 0x49a   : > { %3702 = vst [vmem:[%s5874_s4 + $0xa0] sm:$0xff] %v6770_v25   ;;  %v6153_v28 = vmul.f32 %v6773_v58, %v5861_v63  ;;  %v6169_v25 = vmul.f32 %v6778_v40, %v5861_v63  ;;  %v6173_v58 = vmul.f32 %v6780_v15, %v5861_v63  ;;  %v6788_v40 = vld [vmem:[#allocation63_spill] sm:$0xff] }
 0x49b   : > { %6772 = vst [vmem:[#allocation51_spill] sm:$0xff] %v6149_v30  ;;  %v6802_v15 = vld [vmem:[#allocation11_spill] sm:$0xff]  ;;  %v6814_v30 = vld [vmem:[#allocation34_spill] sm:$0xff] }
 0x49c   : > { %6774 = vst [vmem:[#allocation62_spill] sm:$0xff] %v6153_v28  ;;  %v6225_v26 = vmul.f32 %v6802_v15, %v5861_v63  ;;  %v6809_v15 = vld [vmem:[#allocation100_spill] sm:$0xff] }
 0x49d   : > { %3703 = vst [vmem:[%s5874_s4 + $0xa8] sm:$0xff] %v6777_v7   ;;  %v6800_v7 = vld [vmem:[#allocation4_spill] sm:$0xff] }
 0x49e   : > { %6779 = vst [vmem:[#allocation3_spill] sm:$0xff] %v6169_v25  ;;  %v6821_v25 = vld [vmem:[#allocation6_spill] sm:$0xff] }
 0x49f   : > { %6781 = vst [vmem:[#allocation7_spill] sm:$0xff] %v6173_v58  ;;  %v6221_v58 = vmul.f32 %v6800_v7, %v5861_v63  ;;  %v6808_v7 = vld [vmem:[#allocation98_spill] sm:$0xff] }
 0x4a0   : > { %6783 = vst [vmem:[#allocation14_spill] sm:$0xff] %v6177_v17  ;;  %v6241_v28 = vmul.f32 %v6808_v7, %v5861_v63  ;;  %v6245_v17 = vmul.f32 %v6809_v15, %v5861_v63  ;;  %v6815_v7 = vld [vmem:[#allocation41_spill] sm:$0xff]  ;;  %v6816_v15 = vpack.c.bf16 %v5800_v41, %v5991_v23  ;;  %v6822_v41 = vpack.c.bf16 %v5804_v29, %v5996_v11  ;;  %v6823_v23 = vld [vmem:[#allocation2_spill] sm:$0xff]  ;;  %v2718_v11 = vpop.permute.xlu0 %2717 }
 0x4a1   : > { %6785 = vst [vmem:[#allocation20_spill] sm:$0xff] %v6181_v51  ;;  %v6804_v51 = vld [vmem:[#allocation97_spill] sm:$0xff] }
 0x4a2   : > { %3704 = vst [vmem:[%s5874_s4 + $0xb0] sm:$0xff] %v6786_v34   ;;  %v6229_v24 = vmul.f32 %v6805_v45, %v6804_v51  ;;  %v6811_v45 = vpack.c.bf16 %v5796_v12, %v5987_v36  ;;  %v6817_v12 = vld [vmem:[#allocation15_spill] sm:$0xff]  ;;  %v6820_v34 = vld [vmem:[#allocation28_spill] sm:$0xff]  ;;  %v2687_v29 = vmul.f32 %v6010_v49, %v6804_v51  ;;  %v6829_v49 = vpack.c.bf16 %v5612_v56, %v6008_v38 }
 0x4a3   : > { %3705 = vst [vmem:[%s5874_s4 + $0xb8] sm:$0xff] %v6791_v22   ;;  %v6798_v22 = vld [vmem:[#allocation60_spill] sm:$0xff]  ;;  %v2719_v56 = vmul.f32 %v2716_v62, %v5861_v63  ;;  %v2720_v38 = vmul.f32 %v2718_v11, %v6804_v51  ;;  %v2729_v62 = vpop.permute.xlu2 %2728  ;;  %v6845_v11 = vld [vmem:[#allocation73_spill] sm:$0xff] }
 0x4a4   : > { %3706 = vst [vmem:[%s5874_s4 + $0xc0] sm:$0xff] %v6796_v57   ;;  %v6217_v27 = vmul.f32 %v6798_v22, %v5861_v63  ;;  %v6806_v57 = vpack.c.bf16 %v5792_v14, %v5983_v31  ;;  %v6237_v22 = vmul.f32 %v6807_v47, %v5861_v63  ;;  %v6812_v14 = vld [vmem:[#allocation49_spill] sm:$0xff]  ;;  %v6819_v47 = vld [vmem:[#allocation79_spill] sm:$0xff]  ;;  %v6824_v31 = vld [vmem:[#allocation72_spill] sm:$0xff] }
 0x4a5   : > { %6801 = vst [vmem:[#allocation30_spill] sm:$0xff] %v6221_v58  ;;  %v6271_v58 = vmul.f32 %v6820_v34, %v5861_v63  ;;  %v2826_v36 = vmul.f32 %v6824_v31, %v5861_v63  ;;  %v6825_v34 = vpack.c.bf16 %v5808_v13, %v6000_v4  ;;  %v6826_v31 = vpack.c.bf16 %v5812_v60, %v6004_v52  ;;  %v6827_v13 = vld [vmem:[#allocation13_spill] sm:$0xff] }
 0x4a6   : > { %6799 = vst [vmem:[#allocation25_spill] sm:$0xff] %v6217_v27  ;;  %v2707_v27 = vpop.permute.xlu1 %2706  ;;  %v2708_v60 = vmul.f32 %v2705_v33, %v5861_v63  ;;  %v2697_v52 = vmul.f32 %v6129_v61, %v5861_v63  ;;  %v6831_v33 = vpack.c.bf16 %v5620_v19, %v6039_v53  ;;  %v6833_v61 = vpack.c.bf16 %v5628_v44, %v6047_v18  ;;  %v6836_v18 = vld [vmem:[#allocation83_spill] sm:$0xff] }
 0x4a7   : > { %6803 = vst [vmem:[#allocation37_spill] sm:$0xff] %v6225_v26  ;;  %v6275_v26 = vmul.f32 %v6821_v25, %v6804_v51  ;;  %v3671_v25 = vpack.c.bf16 %v6229_v24, %v6271_v58  ;;  %v3681_v4 = vpack.c.bf16 %v6827_v13, %v2826_v36  ;;  %v6830_v36 = vpack.c.bf16 %v5616_v48, %v6035_v6 }
 0x4a8   : > { %3707 = vst [vmem:[%s5874_s4 + $0xc8] sm:$0xff] %v6806_v57   ;;  %v6813_v57 = vld [vmem:[#allocation55_spill] sm:$0xff]  ;;  %v6832_v48 = vpack.c.bf16 %v5624_v39, %v6043_v32  ;;  %v3636_v6 = vpack.c.bf16 %v2720_v38, %v2719_v56  ;;  %v6834_v53 = vpack.c.bf16 %v5632_v16, %v6052_v2  ;;  %v6835_v39 = vpack.c.bf16 %v5636_v42, %v6056_v35  ;;  %v6838_v2 = vld [vmem:[#allocation29_spill] sm:$0xff]  ;;  %v6841_v42 = vld [vmem:[#allocation50_spill] sm:$0xff] }
 0x4a9   : > { %6810 = vst [vmem:[#allocation47_spill] sm:$0xff] %v6245_v17  ;;  %v2686_v17 = vmul.f32 %v5965_v55, %v5861_v63  ;;  %v2676_v55 = vmul.f32 %v6012_v59, %v6804_v51  ;;  %v2731_v44 = vmul.f32 %v2729_v62, %v6804_v51  ;;  %v6842_v35 = vpack.c.bf16 %v5816_v10, %v6841_v42  ;;  %v6872_v62 = vld [vmem:[#allocation14_spill] sm:$0xff] }
 0x4aa   : > { %3708 = vst [vmem:[%s5874_s4 + $0xd0] sm:$0xff] %v6811_v45   ;;  %v6818_v45 = vld [vmem:[#allocation66_spill] sm:$0xff]  ;;  %v6849_v10 = vpack.c.bf16 %v5833_v1, %v6106_v54  ;;  %v6863_v56 = vpack.c.bf16 %v6789_v8, %v6157_v0  ;;  %v6864_v38 = vpack.c.bf16 %v6790_v5, %v6161_v37  ;;  %v6874_v8 = vld [vmem:[#allocation23_spill] sm:$0xff]  ;;  %v6877_v5 = vpack.c.bf16 %v6812_v14, %v6213_v43 }
 0x4ab   : > { %3709 = vst [vmem:[%s5874_s4 + $0xd8] sm:$0xff] %v6816_v15   ;;  %v2814_v15 = vmul.f32 %v6823_v23, %v5861_v63  ;;  %v6828_v23 = vld [vmem:[#allocation67_spill] sm:$0xff]  ;;  %v3621_v24 = vpack.c.bf16 %v2687_v29, %v2686_v17  ;;  %v6843_v29 = vld [vmem:[#allocation65_spill] sm:$0xff]  ;;  %v6861_v54 = vld [vmem:[#allocation62_spill] sm:$0xff]  ;;  %v6885_v43 = vpack.c.bf16 %v6818_v45, %v6241_v28 }
 0x4ac   : > { %3710 = vst [vmem:[%s5874_s4 + $0xe0] sm:$0xff] %v6822_v41   ;;  %v2675_v58 = vmul.f32 %v6828_v23, %v5861_v63  ;;  %v6850_v23 = vld [vmem:[#allocation48_spill] sm:$0xff] }
 0x4ad   : > { %3711 = vst [vmem:[%s5874_s4 + $0xe8] sm:$0xff] %v6825_v34   ;;  %v3676_v41 = vpack.c.bf16 %v6275_v26, %v2814_v15  ;;  %v2698_v26 = vmul.f32 %v6101_v20, %v6804_v51  ;;  %v2709_v20 = vmul.f32 %v2707_v27, %v6804_v51  ;;  %v6837_v27 = vpack.c.bf16 %v6749_v21, %v6836_v18  ;;  %v6839_v15 = vld [vmem:[#allocation90_spill] sm:$0xff] }
 0x4ae   : > { %3712 = vst [vmem:[%s5874_s4 + $0xf0] sm:$0xff] %v6826_v31   ;;  %v3616_v59 = vpack.c.bf16 %v2676_v55, %v2675_v58  ;;  %v2727_v32 = vpop.permute.xlu1 %2726  ;;  %v6840_v34 = vpack.c.bf16 %v6838_v2, %v6839_v15  ;;  %v6844_v21 = vpack.c.bf16 %v5821_v9, %v6843_v29  ;;  %v6847_v31 = vld [vmem:[#allocation76_spill] sm:$0xff]  ;;  %v6851_v58 = vld [vmem:[#allocation81_spill] sm:$0xff]  ;;  %v6880_v18 = vld [vmem:[#allocation30_spill] sm:$0xff]  ;;  %v6884_v15 = vpack.c.bf16 %v6817_v12, %v6237_v22 }
 0x4af   : > { %3713 = vst [vmem:[%s5874_s4 + $0xf8] sm:$0xff] %v6829_v49   ;;  %v3626_v17 = vpack.c.bf16 %v2698_v26, %v2697_v52  ;;  %v3631_v19 = vpack.c.bf16 %v2709_v20, %v2708_v60  ;;  %v2730_v16 = vmul.f32 %v2727_v32, %v5861_v63  ;;  %v6846_v63 = vpack.c.bf16 %v5825_v50, %v6845_v11  ;;  %v6853_v55 = vld [vmem:[#allocation57_spill] sm:$0xff]  ;;  %v6854_v49 = vld [vmem:[#allocation87_spill] sm:$0xff] }
 0x4b0   : > { %3714 = vst [vmem:[%s5874_s4 + $0x100] sm:$0xff] %v6830_v36   ;;  %v6848_v13 = vpack.c.bf16 %v5829_v3, %v6847_v31  ;;  %v6852_v9 = vpack.c.bf16 %v6850_v23, %v6851_v58  ;;  %v6855_v50 = vpack.c.bf16 %v6853_v55, %v6854_v49  ;;  %v6856_v60 = vld [vmem:[#allocation35_spill] sm:$0xff]  ;;  %v6862_v36 = vpack.c.bf16 %v6788_v40, %v6861_v54  ;;  %v6878_v32 = vld [vmem:[#allocation25_spill] sm:$0xff] }
 0x4b1   : > { %3715 = vst [vmem:[%s5874_s4 + $0x108] sm:$0xff] %v6831_v33   ;;  %v3641_v51 = vpack.c.bf16 %v2731_v44, %v2730_v16  ;;  %v6857_v52 = vld [vmem:[#allocation91_spill] sm:$0xff]  ;;  %v6865_v33 = vld [vmem:[#allocation46_spill] sm:$0xff]  ;;  %v6879_v44 = vpack.c.bf16 %v6813_v57, %v6878_v32  ;;  %v6882_v16 = vld [vmem:[#allocation37_spill] sm:$0xff] }
 0x4b2   : > { %3716 = vst [vmem:[%s5874_s4 + $0x110] sm:$0xff] %v6832_v48   ;;  %v6858_v3 = vpack.c.bf16 %v6856_v60, %v6857_v52  ;;  %v6859_v26 = vld [vmem:[#allocation51_spill] sm:$0xff]  ;;  %v6868_v48 = vld [vmem:[#allocation10_spill] sm:$0xff]  ;;  %v6883_v2 = vpack.c.bf16 %v6815_v7, %v6882_v16 }
 0x4b3   : > { %3717 = vst [vmem:[%s5874_s4 + $0x118] sm:$0xff] %v6833_v61   ;;  %v6860_v1 = vpack.c.bf16 %v6787_v46, %v6859_v26  ;;  %v6866_v20 = vld [vmem:[#allocation3_spill] sm:$0xff] }
 0x4b4   : > { %3718 = vst [vmem:[%s5874_s4 + $0x120] sm:$0xff] %v6834_v53   ;;  %v6867_v46 = vpack.c.bf16 %v6865_v33, %v6866_v20  ;;  %v6869_v61 = vld [vmem:[#allocation7_spill] sm:$0xff]  ;;  %v6871_v53 = vld [vmem:[#allocation18_spill] sm:$0xff] }
 0x4b5   : > { %3719 = vst [vmem:[%s5874_s4 + $0x128] sm:$0xff] %v6835_v39   ;;  %v6870_v40 = vpack.c.bf16 %v6868_v48, %v6869_v61  ;;  %v6873_v0 = vpack.c.bf16 %v6871_v53, %v6872_v62  ;;  %v6875_v39 = vld [vmem:[#allocation20_spill] sm:$0xff]  ;;  %v6886_v14 = vld [vmem:[#allocation47_spill] sm:$0xff] }
 0x4b6   : > { %3720 = vst [vmem:[%s5874_s4 + $0x130] sm:$0xff] %v6837_v27   ;;  %v6876_v37 = vpack.c.bf16 %v6874_v8, %v6875_v39  ;;  %v6881_v27 = vpack.c.bf16 %v6814_v30, %v6880_v18  ;;  %v6887_v57 = vpack.c.bf16 %v6819_v47, %v6886_v14 }
 0x4b7   : > { %3721 = vst [vmem:[%s5874_s4 + $0x138] sm:$0xff] %v6840_v34  }
 0x4b8   : > { %3722 = vst [vmem:[%s5874_s4 + $0x140] sm:$0xff] %v6842_v35  }
 0x4b9   : > { %3723 = vst [vmem:[%s5874_s4 + $0x148] sm:$0xff] %v6844_v21  }
 0x4ba   : > { %3724 = vst [vmem:[%s5874_s4 + $0x150] sm:$0xff] %v6846_v63  }
 0x4bb   : > { %3725 = vst [vmem:[%s5874_s4 + $0x158] sm:$0xff] %v6848_v13  }
 0x4bc   : > { %3726 = vst [vmem:[%s5874_s4 + $0x160] sm:$0xff] %v6849_v10  }
 0x4bd   : > { %3727 = vst [vmem:[%s5874_s4 + $0x168] sm:$0xff] %v6852_v9  }
 0x4be   : > { %3728 = vst [vmem:[%s5874_s4 + $0x170] sm:$0xff] %v6855_v50  }
 0x4bf   : > { %3729 = vst [vmem:[%s5874_s4 + $0x178] sm:$0xff] %v6858_v3  }
 0x4c0   : > { %3730 = vst [vmem:[%s5874_s4 + $0x180] sm:$0xff] %v6860_v1  }
 0x4c1   : > { %3731 = vst [vmem:[%s5874_s4 + $0x188] sm:$0xff] %v6862_v36  }
 0x4c2   : > { %3732 = vst [vmem:[%s5874_s4 + $0x190] sm:$0xff] %v6863_v56  }
 0x4c3   : > { %3733 = vst [vmem:[%s5874_s4 + $0x198] sm:$0xff] %v6864_v38  }
 0x4c4   : > { %3734 = vst [vmem:[%s5874_s4 + $0x1a0] sm:$0xff] %v6867_v46  }
 0x4c5   : > { %3735 = vst [vmem:[%s5874_s4 + $0x1a8] sm:$0xff] %v6870_v40  }
 0x4c6   : > { %3736 = vst [vmem:[%s5874_s4 + $0x1b0] sm:$0xff] %v6873_v0  }
 0x4c7   : > { %3737 = vst [vmem:[%s5874_s4 + $0x1b8] sm:$0xff] %v6876_v37  }
 0x4c8   : > { %3738 = vst [vmem:[%s5874_s4 + $0x1c0] sm:$0xff] %v6877_v5  }
 0x4c9   : > { %3739 = vst [vmem:[%s5874_s4 + $0x1c8] sm:$0xff] %v6879_v44  }
 0x4ca   : > { %3746 = vst [vmem:[%s5874_s4 + $0x200] sm:$0xff] %v6881_v27  }
 0x4cb   : > { %3747 = vst [vmem:[%s5874_s4 + $0x208] sm:$0xff] %v6883_v2  }
 0x4cc   : > { %3748 = vst [vmem:[%s5874_s4 + $0x210] sm:$0xff] %v6884_v15  }
 0x4cd   : > { %3749 = vst [vmem:[%s5874_s4 + $0x218] sm:$0xff] %v6885_v43  }
 0x4ce   : > { %3750 = vst [vmem:[%s5874_s4 + $0x220] sm:$0xff] %v6887_v57  }
 0x4cf   : > { %3751 = vst [vmem:[%s5874_s4 + $0x228] sm:$0xff] %v3671_v25  }
 0x4d0   : > { %3752 = vst [vmem:[%s5874_s4 + $0x230] sm:$0xff] %v3676_v41  }
 0x4d1   : > { %3753 = vst [vmem:[%s5874_s4 + $0x238] sm:$0xff] %v3681_v4  }
 0x4d2   : > { %3741 = vst [vmem:[%s5874_s4 + $0x1d8] sm:$0xff] %v3621_v24  }
 0x4d3   : > { %3740 = vst [vmem:[%s5874_s4 + $0x1d0] sm:$0xff] %v3616_v59  }
 0x4d4   : > { %3742 = vst [vmem:[%s5874_s4 + $0x1e0] sm:$0xff] %v3626_v17  }
 0x4d5   : > { %3744 = vst [vmem:[%s5874_s4 + $0x1f0] sm:$0xff] %v3636_v6  }
 0x4d6   : > { %3743 = vst [vmem:[%s5874_s4 + $0x1e8] sm:$0xff] %v3631_v19  }
 0x4d7   : > { %3745 = vst [vmem:[%s5874_s4 + $0x1f8] sm:$0xff] %v3641_v51  }
 0x4d8 PF: > { %s13_s14 = sadd.s32 1, %s3852_s14   ;;  %s6888_s12 = smov %s3848_s13 }
 0x4d9   : > { %p10_p5 = scmp.ge.s32.totalorder %s13_s14, 4   ;;  %s6889_s13 = smov %s6891_s15 }
 0x4db   :  { %12 = sbr.rel (!%p10_p5) target bundleno = 2 (0x2), region = 140 }

</bundles_post_ra>
